<compile_context>
chip_gen: v5e
topology: v5e:2x2
jax: 0.10.0
libtpu: 0.0.40
codegen_flags: <defaults>
</compile_context>

<pallas_src>
import functools

import numpy as np
import jax
import jax.numpy as jnp
from jax.experimental import pallas as pl
from jax.experimental.pallas import tpu as pltpu


def _vmem_specs(n):
    return [pl.BlockSpec(memory_space=pltpu.MemorySpace.VMEM) for _ in range(n)]


# --------------------------- fused forward kernel ----------------------------
def fused_kernel(x_ref, wih_ref, whh_ref, bl_ref, w1_ref, b1_ref,
                 t1_ref, bt1_ref, wc2_ref, bc2_ref, wo_ref, bo_ref,
                 out_ref, *, T, B, H):
    f32 = jnp.float32
    bf16 = jnp.bfloat16

    # ---------------- LSTM (zero init state; gate order i,f,g,o) ----------------
    wih = wih_ref[...]                    # (D, 4H)  bf16
    whh = whh_ref[...]                    # (H, 4H)  bf16
    bias = bl_ref[...]                    # (1, 4H)  f32  (b_ih + b_hh)

    # Input projection hoisted off the serial h->h dependency chain.
    xp = [jnp.dot(x_ref[t].astype(bf16), wih, preferred_element_type=f32) + bias
          for t in range(T)]

    h = jnp.zeros((B, H), f32)
    c = jnp.zeros((B, H), f32)
    flat_rows = []
    for t in range(T):                    # T is static -> fully unrolled recurrence
        gates = xp[t] + jnp.dot(h.astype(bf16), whh, preferred_element_type=f32)
        i = jax.nn.sigmoid(gates[:, 0 * H:1 * H])
        f = jax.nn.sigmoid(gates[:, 1 * H:2 * H])
        g = jnp.tanh(gates[:, 2 * H:3 * H])
        o = jax.nn.sigmoid(gates[:, 3 * H:4 * H])
        c = f * c + i * g
        h = o * jnp.tanh(c)
        # .view(X.shape[0], -1): row t = [h[0,:], h[1,:], ..., h[B-1,:]].
        flat_rows.append(jnp.concatenate([h[b:b + 1, :] for b in range(B)], axis=1))
    lstm_flat = jnp.concatenate(flat_rows, axis=0)        # (T, B*H) = (T, 960)

    # ---------------- Linear(960, 256) + ReLU  (== the 16x16x1 conv input) ------
    feat = jnp.dot(lstm_flat.astype(bf16), w1_ref[...], preferred_element_type=f32)
    feat = jnp.maximum(feat + b1_ref[...], 0.0)           # (T, 256), lane = ih*16+iw

    # ---------------- Conv2d(1,32,4,2,1) + ReLU as one Toeplitz matmul ----------
    c1 = jnp.dot(feat.astype(bf16), t1_ref[...], preferred_element_type=f32)
    c1 = jnp.maximum(c1 + bt1_ref[...], 0.0)              # (T, 8*8*32) NHWC-flat
    c1 = c1.astype(bf16)                                  # lane = (ih*8+iw)*32 + ci

    # ---------------- Conv2d(32,64,4,2,1) + ReLU, compact im2col ----------------
    # Weight row index = dh*128 + dw*32 + ci; padding handled by statically
    # skipping out-of-range kernel rows (dh) and clipping kernel columns (dw), so
    # every LHS operand is a contiguous static lane slice of c1.
    wc2 = wc2_ref[...]                                    # (512, 64) bf16
    bc2 = bc2_ref[...]                                    # (1, 64)  f32
    CIN, W_IN, KW = 32, 8, 4
    c2 = {}
    for oh in range(4):
        for ow in range(4):
            iw0 = ow * 2 - 1                      # leftmost (possibly padded) column
            lo = max(0, -iw0)                     # first in-bounds kernel column
            hi = min(KW, W_IN - iw0)              # one past last in-bounds column
            width = (hi - lo) * CIN
            acc = bc2
            for dh in range(KW):
                ih = oh * 2 + dh - 1
                if 0 <= ih < 8:                   # padded rows contribute nothing
                    s = (ih * W_IN + iw0 + lo) * CIN
                    w0 = dh * KW * CIN + lo * CIN
                    acc = acc + jnp.dot(c1[:, s:s + width], wc2[w0:w0 + width, :],
                                        preferred_element_type=f32)
            c2[(oh, ow)] = jnp.maximum(acc, 0.0)          # (T, 64)

    # ---------------- MaxPool2d(4,2,1): 4x4 -> 2x2 ------------------------------
    # -inf padding never wins, so each output is the max of a clipped 3x3 window.
    # (The trailing nn.ReLU() is a no-op: c2 >= 0 already.)
    def win(r0, c0):
        m = c2[(r0, c0)]
        for dr in range(3):
            for dc in range(3):
                if dr or dc:
                    m = jnp.maximum(m, c2[(r0 + dr, c0 + dc)])
        return m

    # Lane order (ph*2+pw)*64 + ch; w_out rows were permuted host-side to match
    # PyTorch's (c, ph, pw) flatten, so the math is identical.
    pooled = jnp.concatenate([win(0, 0), win(0, 1), win(1, 0), win(1, 1)], axis=-1)

    # ---------------- Linear(256, out_dim) + Sigmoid ----------------------------
    y = jnp.dot(pooled, wo_ref[...], preferred_element_type=f32) + bo_ref[...]
    out_ref[...] = jax.nn.sigmoid(y)


# --------------------------------- wrapper -----------------------------------
@jax.jit
def cnn_with_lstm_forward(X, hidden, params):
    # `hidden` mirrors the PyTorch signature but is unused, as in the reference.
    del hidden
    T, B, _ = X.shape
    H = params["w_hh"].shape[0]
    out_dim = params["w_out"].shape[-1]
    return pl.pallas_call(
        functools.partial(fused_kernel, T=T, B=B, H=H),
        out_shape=jax.ShapeDtypeStruct((T, out_dim), jnp.float32),
        in_specs=_vmem_specs(12),
        out_specs=pl.BlockSpec(memory_space=pltpu.MemorySpace.VMEM),
    )(X, params["w_ih"], params["w_hh"], params["b_lstm"],
      params["w1"], params["b1"], params["t1"], params["bt1"],
      params["w_c2"], params["b_c2"], params["w_out"], params["b_out"])


# ------------------------------ param building -------------------------------
def _conv_toeplitz_nhwc(w_oihw, h_in, w_in, stride, pad):
    """Dense Toeplitz matrix for Conv2d(stride, pad), built once on host.

    Row index    = (ih*w_in  + iw)*Cin  + ci   (NHWC-flat input)
    Column index = (oh*w_out + ow)*Cout + co   (NHWC-flat output)
    """
    w = np.asarray(w_oihw, np.float32)
    c_out, c_in, kh, kw = w.shape
    h_o = (h_in + 2 * pad - kh) // stride + 1
    w_o = (w_in + 2 * pad - kw) // stride + 1
    t = np.zeros((h_in * w_in * c_in, h_o * w_o * c_out), np.float32)
    for oh in range(h_o):
        for ow in range(w_o):
            col0 = (oh * w_o + ow) * c_out
            for dh in range(kh):
                ih = oh * stride + dh - pad
                if ih < 0 or ih >= h_in:
                    continue
                for dw in range(kw):
                    iw = ow * stride + dw - pad
                    if iw < 0 or iw >= w_in:
                        continue
                    row0 = (ih * w_in + iw) * c_in
                    t[row0:row0 + c_in, col0:col0 + c_out] = w[:, :, dh, dw].T
    return jnp.asarray(t)


def init_params(key, input_dim, hidden_dim, output_dim):
    """Deterministic PyTorch-shaped params, permuted/cast into kernel layouts."""
    ks = jax.random.split(key, 12)

    def u(k, shape, fan_in):
        bound = 1.0 / np.sqrt(float(fan_in))
        return jax.random.uniform(k, shape, jnp.float32, -bound, bound)

    H, D = hidden_dim, input_dim
    w_ih = u(ks[0], (4 * H, D), H)                      # lstm.weight_ih_l0
    w_hh = u(ks[1], (4 * H, H), H)                      # lstm.weight_hh_l0
    b_ih = u(ks[2], (4 * H,), H)
    b_hh = u(ks[3], (4 * H,), H)
    w1_pt = u(ks[4], (256, H * 30), H * 30)             # linear[0]
    b1 = u(ks[5], (256,), H * 30)
    wc1_pt = u(ks[6], (32, 1, 4, 4), 1 * 16)            # conv_layer[0]
    bc1 = u(ks[7], (32,), 1 * 16)
    wc2_pt = u(ks[8], (64, 32, 4, 4), 32 * 16)          # conv_layer[2]
    bc2 = u(ks[9], (64,), 32 * 16)
    wout_pt = u(ks[10], (output_dim, 64 * 2 * 2), 256)  # linear_out[0]
    bout = u(ks[11], (output_dim,), 256)

    bf16 = jnp.bfloat16
    return dict(
        # LSTM: PyTorch (4H,D)/(4H,H) -> fused-gate (D,4H)/(H,4H), bf16 for the MXU;
        # gate order i,f,g,o preserved; combined b_ih+b_hh bias kept f32.
        w_ih=jnp.transpose(w_ih).astype(bf16),
        w_hh=jnp.transpose(w_hh).astype(bf16),
        b_lstm=(b_ih + b_hh).reshape(1, 4 * H),
        # Dense: x @ W^T + b  ->  pass W^T (bf16).
        w1=jnp.transpose(w1_pt).astype(bf16), b1=b1.reshape(1, -1),
        # Conv1 as a dense Toeplitz matmul (NHWC-flat in/out), bf16; bias tiled
        # over the 8x8 output positions (f32).
        t1=_conv_toeplitz_nhwc(wc1_pt, 16, 16, 2, 1).astype(bf16),   # (256, 2048)
        bt1=jnp.tile(bc1, 8 * 8).reshape(1, -1),                     # (1, 2048)
        # Conv2 compact im2col weight: row = dh*128 + dw*32 + ci, col = co.
        w_c2=jnp.transpose(wc2_pt, (2, 3, 1, 0)).reshape(4 * 4 * 32, 64).astype(bf16),
        b_c2=bc2.reshape(1, -1),
        # PyTorch flattens the pooled NCHW tensor as (c, ph, pw); the kernel emits
        # ((ph*2+pw)*64 + c) lanes: permute weight rows so the math is identical.
        w_out=jnp.transpose(wout_pt.reshape(output_dim, 64, 2, 2),
                            (2, 3, 1, 0)).reshape(2 * 2 * 64, output_dim),
        b_out=bout.reshape(1, -1),
    )


if __name__ == "__main__":
    input_dim, hidden_dim, output_dim = 8, 32, 4
    batch_n = 2                     # X.shape[0]; middle dim must be 30 (module assumes it)

    key = jax.random.PRNGKey(0)
    kx, kp = jax.random.split(key)
    X = jax.random.normal(kx, (batch_n, 30, input_dim), jnp.float32)
    hidden = None                   # unused by forward(), mirrors the PyTorch call
    params = init_params(kp, input_dim, hidden_dim, output_dim)

    out = cnn_with_lstm_forward(X, hidden, params)
    out = jax.block_until_ready(out)
    assert out.shape == (batch_n, output_dim)
    assert bool(jnp.all(jnp.isfinite(out)))
    print("KERNEL_OK")
</pallas_src>

<mosaic_0001>
module attributes {stable_mosaic.version = 11 : i64} {
  func.func @fused_kernel(%arg0: memref<2x30x8xf32, #tpu.memory_space<vmem>>, %arg1: memref<8x128xbf16, #tpu.memory_space<vmem>>, %arg2: memref<32x128xbf16, #tpu.memory_space<vmem>>, %arg3: memref<1x128xf32, #tpu.memory_space<vmem>>, %arg4: memref<960x256xbf16, #tpu.memory_space<vmem>>, %arg5: memref<1x256xf32, #tpu.memory_space<vmem>>, %arg6: memref<256x2048xbf16, #tpu.memory_space<vmem>>, %arg7: memref<1x2048xf32, #tpu.memory_space<vmem>>, %arg8: memref<512x64xbf16, #tpu.memory_space<vmem>>, %arg9: memref<1x64xf32, #tpu.memory_space<vmem>>, %arg10: memref<256x4xf32, #tpu.memory_space<vmem>>, %arg11: memref<1x4xf32, #tpu.memory_space<vmem>>, %arg12: memref<2x4xf32, #tpu.memory_space<vmem>>) attributes {dimension_semantics = [], scalar_prefetch = 0 : i64, scratch_operands = 0 : i64, tpu.core_type = #tpu.core_type<tc>} {
    %c0 = arith.constant 0 : index
    %c0_0 = arith.constant 0 : index
    %0 = vector.load %arg1[%c0, %c0_0] : memref<8x128xbf16, #tpu.memory_space<vmem>>, vector<8x128xbf16>
    %c0_1 = arith.constant 0 : index
    %c0_2 = arith.constant 0 : index
    %1 = vector.load %arg2[%c0_1, %c0_2] : memref<32x128xbf16, #tpu.memory_space<vmem>>, vector<32x128xbf16>
    %c0_3 = arith.constant 0 : index
    %c0_4 = arith.constant 0 : index
    %2 = vector.load %arg3[%c0_3, %c0_4] : memref<1x128xf32, #tpu.memory_space<vmem>>, vector<1x128xf32>
    %c0_5 = arith.constant 0 : index
    %c0_6 = arith.constant 0 : index
    %c0_7 = arith.constant 0 : index
    %3 = vector.load %arg0[%c0_5, %c0_6, %c0_7] : memref<2x30x8xf32, #tpu.memory_space<vmem>>, vector<1x30x8xf32>
    %4 = vector.shape_cast %3 : vector<1x30x8xf32> to vector<30x8xf32>
    %5 = arith.truncf %4 : vector<30x8xf32> to vector<30x8xbf16>
    %cst = arith.constant dense<0.000000e+00> : vector<30x128xf32>
    %6 = tpu.matmul %5, %0, %cst {dimension_numbers = #tpu.dot_dimension_numbers<[1], [0], [0], [1], [0, 0, 1, 1], [], []>} : vector<30x8xbf16>, vector<8x128xbf16>, vector<30x128xf32> -> vector<30x128xf32>
    %7 = vector.broadcast %2 : vector<1x128xf32> to vector<30x128xf32>
    %8 = arith.addf %6, %7 : vector<30x128xf32>
    %c1 = arith.constant 1 : index
    %c0_8 = arith.constant 0 : index
    %c0_9 = arith.constant 0 : index
    %9 = vector.load %arg0[%c1, %c0_8, %c0_9] : memref<2x30x8xf32, #tpu.memory_space<vmem>>, vector<1x30x8xf32>
    %10 = vector.shape_cast %9 : vector<1x30x8xf32> to vector<30x8xf32>
    %11 = arith.truncf %10 : vector<30x8xf32> to vector<30x8xbf16>
    %cst_10 = arith.constant dense<0.000000e+00> : vector<30x128xf32>
    %12 = tpu.matmul %11, %0, %cst_10 {dimension_numbers = #tpu.dot_dimension_numbers<[1], [0], [0], [1], [0, 0, 1, 1], [], []>} : vector<30x8xbf16>, vector<8x128xbf16>, vector<30x128xf32> -> vector<30x128xf32>
    %13 = vector.broadcast %2 : vector<1x128xf32> to vector<30x128xf32>
    %14 = arith.addf %12, %13 : vector<30x128xf32>
    %cst_11 = arith.constant 0.000000e+00 : f32
    %15 = vector.broadcast %cst_11 : f32 to vector<30x32xf32>
    %cst_12 = arith.constant 0.000000e+00 : f32
    %16 = vector.broadcast %cst_12 : f32 to vector<30x32xf32>
    %17 = arith.truncf %15 : vector<30x32xf32> to vector<30x32xbf16>
    %cst_13 = arith.constant dense<0.000000e+00> : vector<30x128xf32>
    %18 = tpu.matmul %17, %1, %cst_13 {dimension_numbers = #tpu.dot_dimension_numbers<[1], [0], [0], [1], [0, 0, 1, 1], [], []>} : vector<30x32xbf16>, vector<32x128xbf16>, vector<30x128xf32> -> vector<30x128xf32>
    %19 = arith.addf %8, %18 : vector<30x128xf32>
    %20 = vector.extract_strided_slice %19 {offsets = [0, 0], sizes = [30, 32], strides = [1, 1]} : vector<30x128xf32> to vector<30x32xf32>
    %21 = arith.negf %20 : vector<30x32xf32>
    %22 = math.exp %21 : vector<30x32xf32>
    %cst_14 = arith.constant 1.000000e+00 : f32
    %23 = vector.broadcast %cst_14 : f32 to vector<30x32xf32>
    %24 = arith.addf %23, %22 : vector<30x32xf32>
    %25 = arith.divf %23, %24 : vector<30x32xf32>
    %26 = vector.extract_strided_slice %19 {offsets = [0, 32], sizes = [30, 32], strides = [1, 1]} : vector<30x128xf32> to vector<30x32xf32>
    %27 = arith.negf %26 : vector<30x32xf32>
    %28 = math.exp %27 : vector<30x32xf32>
    %cst_15 = arith.constant 1.000000e+00 : f32
    %29 = vector.broadcast %cst_15 : f32 to vector<30x32xf32>
    %30 = arith.addf %29, %28 : vector<30x32xf32>
    %31 = arith.divf %29, %30 : vector<30x32xf32>
    %32 = vector.extract_strided_slice %19 {offsets = [0, 64], sizes = [30, 32], strides = [1, 1]} : vector<30x128xf32> to vector<30x32xf32>
    %33 = math.tanh %32 : vector<30x32xf32>
    %34 = vector.extract_strided_slice %19 {offsets = [0, 96], sizes = [30, 32], strides = [1, 1]} : vector<30x128xf32> to vector<30x32xf32>
    %35 = arith.negf %34 : vector<30x32xf32>
    %36 = math.exp %35 : vector<30x32xf32>
    %cst_16 = arith.constant 1.000000e+00 : f32
    %37 = vector.broadcast %cst_16 : f32 to vector<30x32xf32>
    %38 = arith.addf %37, %36 : vector<30x32xf32>
    %39 = arith.divf %37, %38 : vector<30x32xf32>
    %40 = arith.mulf %31, %16 : vector<30x32xf32>
    %41 = arith.mulf %25, %33 : vector<30x32xf32>
    %42 = arith.addf %40, %41 : vector<30x32xf32>
    %43 = math.tanh %42 : vector<30x32xf32>
    %44 = arith.mulf %39, %43 : vector<30x32xf32>
    %45 = vector.extract_strided_slice %44 {offsets = [0, 0], sizes = [1, 32], strides = [1, 1]} : vector<30x32xf32> to vector<1x32xf32>
    %46 = vector.extract_strided_slice %44 {offsets = [1, 0], sizes = [1, 32], strides = [1, 1]} : vector<30x32xf32> to vector<1x32xf32>
    %47 = vector.extract_strided_slice %44 {offsets = [2, 0], sizes = [1, 32], strides = [1, 1]} : vector<30x32xf32> to vector<1x32xf32>
    %48 = vector.extract_strided_slice %44 {offsets = [3, 0], sizes = [1, 32], strides = [1, 1]} : vector<30x32xf32> to vector<1x32xf32>
    %49 = vector.extract_strided_slice %44 {offsets = [4, 0], sizes = [1, 32], strides = [1, 1]} : vector<30x32xf32> to vector<1x32xf32>
    %50 = vector.extract_strided_slice %44 {offsets = [5, 0], sizes = [1, 32], strides = [1, 1]} : vector<30x32xf32> to vector<1x32xf32>
    %51 = vector.extract_strided_slice %44 {offsets = [6, 0], sizes = [1, 32], strides = [1, 1]} : vector<30x32xf32> to vector<1x32xf32>
    %52 = vector.extract_strided_slice %44 {offsets = [7, 0], sizes = [1, 32], strides = [1, 1]} : vector<30x32xf32> to vector<1x32xf32>
    %53 = vector.extract_strided_slice %44 {offsets = [8, 0], sizes = [1, 32], strides = [1, 1]} : vector<30x32xf32> to vector<1x32xf32>
    %54 = vector.extract_strided_slice %44 {offsets = [9, 0], sizes = [1, 32], strides = [1, 1]} : vector<30x32xf32> to vector<1x32xf32>
    %55 = vector.extract_strided_slice %44 {offsets = [10, 0], sizes = [1, 32], strides = [1, 1]} : vector<30x32xf32> to vector<1x32xf32>
    %56 = vector.extract_strided_slice %44 {offsets = [11, 0], sizes = [1, 32], strides = [1, 1]} : vector<30x32xf32> to vector<1x32xf32>
    %57 = vector.extract_strided_slice %44 {offsets = [12, 0], sizes = [1, 32], strides = [1, 1]} : vector<30x32xf32> to vector<1x32xf32>
    %58 = vector.extract_strided_slice %44 {offsets = [13, 0], sizes = [1, 32], strides = [1, 1]} : vector<30x32xf32> to vector<1x32xf32>
    %59 = vector.extract_strided_slice %44 {offsets = [14, 0], sizes = [1, 32], strides = [1, 1]} : vector<30x32xf32> to vector<1x32xf32>
    %60 = vector.extract_strided_slice %44 {offsets = [15, 0], sizes = [1, 32], strides = [1, 1]} : vector<30x32xf32> to vector<1x32xf32>
    %61 = vector.extract_strided_slice %44 {offsets = [16, 0], sizes = [1, 32], strides = [1, 1]} : vector<30x32xf32> to vector<1x32xf32>
    %62 = vector.extract_strided_slice %44 {offsets = [17, 0], sizes = [1, 32], strides = [1, 1]} : vector<30x32xf32> to vector<1x32xf32>
    %63 = vector.extract_strided_slice %44 {offsets = [18, 0], sizes = [1, 32], strides = [1, 1]} : vector<30x32xf32> to vector<1x32xf32>
    %64 = vector.extract_strided_slice %44 {offsets = [19, 0], sizes = [1, 32], strides = [1, 1]} : vector<30x32xf32> to vector<1x32xf32>
    %65 = vector.extract_strided_slice %44 {offsets = [20, 0], sizes = [1, 32], strides = [1, 1]} : vector<30x32xf32> to vector<1x32xf32>
    %66 = vector.extract_strided_slice %44 {offsets = [21, 0], sizes = [1, 32], strides = [1, 1]} : vector<30x32xf32> to vector<1x32xf32>
    %67 = vector.extract_strided_slice %44 {offsets = [22, 0], sizes = [1, 32], strides = [1, 1]} : vector<30x32xf32> to vector<1x32xf32>
    %68 = vector.extract_strided_slice %44 {offsets = [23, 0], sizes = [1, 32], strides = [1, 1]} : vector<30x32xf32> to vector<1x32xf32>
    %69 = vector.extract_strided_slice %44 {offsets = [24, 0], sizes = [1, 32], strides = [1, 1]} : vector<30x32xf32> to vector<1x32xf32>
    %70 = vector.extract_strided_slice %44 {offsets = [25, 0], sizes = [1, 32], strides = [1, 1]} : vector<30x32xf32> to vector<1x32xf32>
    %71 = vector.extract_strided_slice %44 {offsets = [26, 0], sizes = [1, 32], strides = [1, 1]} : vector<30x32xf32> to vector<1x32xf32>
    %72 = vector.extract_strided_slice %44 {offsets = [27, 0], sizes = [1, 32], strides = [1, 1]} : vector<30x32xf32> to vector<1x32xf32>
    %73 = vector.extract_strided_slice %44 {offsets = [28, 0], sizes = [1, 32], strides = [1, 1]} : vector<30x32xf32> to vector<1x32xf32>
    %74 = vector.extract_strided_slice %44 {offsets = [29, 0], sizes = [1, 32], strides = [1, 1]} : vector<30x32xf32> to vector<1x32xf32>
    %75 = tpu.concatenate %45, %46, %47, %48, %49, %50, %51, %52, %53, %54, %55, %56, %57, %58, %59, %60 in 1 : vector<1x32xf32>, vector<1x32xf32>, vector<1x32xf32>, vector<1x32xf32>, vector<1x32xf32>, vector<1x32xf32>, vector<1x32xf32>, vector<1x32xf32>, vector<1x32xf32>, vector<1x32xf32>, vector<1x32xf32>, vector<1x32xf32>, vector<1x32xf32>, vector<1x32xf32>, vector<1x32xf32>, vector<1x32xf32> -> vector<1x512xf32>
    %76 = tpu.concatenate %61, %62, %63, %64, %65, %66, %67, %68, %69, %70, %71, %72, %73, %74 in 1 : vector<1x32xf32>, vector<1x32xf32>, vector<1x32xf32>, vector<1x32xf32>, vector<1x32xf32>, vector<1x32xf32>, vector<1x32xf32>, vector<1x32xf32>, vector<1x32xf32>, vector<1x32xf32>, vector<1x32xf32>, vector<1x32xf32>, vector<1x32xf32>, vector<1x32xf32> -> vector<1x448xf32>
    %77 = tpu.concatenate %75, %76 in 1 : vector<1x512xf32>, vector<1x448xf32> -> vector<1x960xf32>
    %78 = arith.truncf %44 : vector<30x32xf32> to vector<30x32xbf16>
    %cst_17 = arith.constant dense<0.000000e+00> : vector<30x128xf32>
    %79 = tpu.matmul %78, %1, %cst_17 {dimension_numbers = #tpu.dot_dimension_numbers<[1], [0], [0], [1], [0, 0, 1, 1], [], []>} : vector<30x32xbf16>, vector<32x128xbf16>, vector<30x128xf32> -> vector<30x128xf32>
    %80 = arith.addf %14, %79 : vector<30x128xf32>
    %81 = vector.extract_strided_slice %80 {offsets = [0, 0], sizes = [30, 32], strides = [1, 1]} : vector<30x128xf32> to vector<30x32xf32>
    %82 = arith.negf %81 : vector<30x32xf32>
    %83 = math.exp %82 : vector<30x32xf32>
    %cst_18 = arith.constant 1.000000e+00 : f32
    %84 = vector.broadcast %cst_18 : f32 to vector<30x32xf32>
    %85 = arith.addf %84, %83 : vector<30x32xf32>
    %86 = arith.divf %84, %85 : vector<30x32xf32>
    %87 = vector.extract_strided_slice %80 {offsets = [0, 32], sizes = [30, 32], strides = [1, 1]} : vector<30x128xf32> to vector<30x32xf32>
    %88 = arith.negf %87 : vector<30x32xf32>
    %89 = math.exp %88 : vector<30x32xf32>
    %cst_19 = arith.constant 1.000000e+00 : f32
    %90 = vector.broadcast %cst_19 : f32 to vector<30x32xf32>
    %91 = arith.addf %90, %89 : vector<30x32xf32>
    %92 = arith.divf %90, %91 : vector<30x32xf32>
    %93 = vector.extract_strided_slice %80 {offsets = [0, 64], sizes = [30, 32], strides = [1, 1]} : vector<30x128xf32> to vector<30x32xf32>
    %94 = math.tanh %93 : vector<30x32xf32>
    %95 = vector.extract_strided_slice %80 {offsets = [0, 96], sizes = [30, 32], strides = [1, 1]} : vector<30x128xf32> to vector<30x32xf32>
    %96 = arith.negf %95 : vector<30x32xf32>
    %97 = math.exp %96 : vector<30x32xf32>
    %cst_20 = arith.constant 1.000000e+00 : f32
    %98 = vector.broadcast %cst_20 : f32 to vector<30x32xf32>
    %99 = arith.addf %98, %97 : vector<30x32xf32>
    %100 = arith.divf %98, %99 : vector<30x32xf32>
    %101 = arith.mulf %92, %42 : vector<30x32xf32>
    %102 = arith.mulf %86, %94 : vector<30x32xf32>
    %103 = arith.addf %101, %102 : vector<30x32xf32>
    %104 = math.tanh %103 : vector<30x32xf32>
    %105 = arith.mulf %100, %104 : vector<30x32xf32>
    %106 = vector.extract_strided_slice %105 {offsets = [0, 0], sizes = [1, 32], strides = [1, 1]} : vector<30x32xf32> to vector<1x32xf32>
    %107 = vector.extract_strided_slice %105 {offsets = [1, 0], sizes = [1, 32], strides = [1, 1]} : vector<30x32xf32> to vector<1x32xf32>
    %108 = vector.extract_strided_slice %105 {offsets = [2, 0], sizes = [1, 32], strides = [1, 1]} : vector<30x32xf32> to vector<1x32xf32>
    %109 = vector.extract_strided_slice %105 {offsets = [3, 0], sizes = [1, 32], strides = [1, 1]} : vector<30x32xf32> to vector<1x32xf32>
    %110 = vector.extract_strided_slice %105 {offsets = [4, 0], sizes = [1, 32], strides = [1, 1]} : vector<30x32xf32> to vector<1x32xf32>
    %111 = vector.extract_strided_slice %105 {offsets = [5, 0], sizes = [1, 32], strides = [1, 1]} : vector<30x32xf32> to vector<1x32xf32>
    %112 = vector.extract_strided_slice %105 {offsets = [6, 0], sizes = [1, 32], strides = [1, 1]} : vector<30x32xf32> to vector<1x32xf32>
    %113 = vector.extract_strided_slice %105 {offsets = [7, 0], sizes = [1, 32], strides = [1, 1]} : vector<30x32xf32> to vector<1x32xf32>
    %114 = vector.extract_strided_slice %105 {offsets = [8, 0], sizes = [1, 32], strides = [1, 1]} : vector<30x32xf32> to vector<1x32xf32>
    %115 = vector.extract_strided_slice %105 {offsets = [9, 0], sizes = [1, 32], strides = [1, 1]} : vector<30x32xf32> to vector<1x32xf32>
    %116 = vector.extract_strided_slice %105 {offsets = [10, 0], sizes = [1, 32], strides = [1, 1]} : vector<30x32xf32> to vector<1x32xf32>
    %117 = vector.extract_strided_slice %105 {offsets = [11, 0], sizes = [1, 32], strides = [1, 1]} : vector<30x32xf32> to vector<1x32xf32>
    %118 = vector.extract_strided_slice %105 {offsets = [12, 0], sizes = [1, 32], strides = [1, 1]} : vector<30x32xf32> to vector<1x32xf32>
    %119 = vector.extract_strided_slice %105 {offsets = [13, 0], sizes = [1, 32], strides = [1, 1]} : vector<30x32xf32> to vector<1x32xf32>
    %120 = vector.extract_strided_slice %105 {offsets = [14, 0], sizes = [1, 32], strides = [1, 1]} : vector<30x32xf32> to vector<1x32xf32>
    %121 = vector.extract_strided_slice %105 {offsets = [15, 0], sizes = [1, 32], strides = [1, 1]} : vector<30x32xf32> to vector<1x32xf32>
    %122 = vector.extract_strided_slice %105 {offsets = [16, 0], sizes = [1, 32], strides = [1, 1]} : vector<30x32xf32> to vector<1x32xf32>
    %123 = vector.extract_strided_slice %105 {offsets = [17, 0], sizes = [1, 32], strides = [1, 1]} : vector<30x32xf32> to vector<1x32xf32>
    %124 = vector.extract_strided_slice %105 {offsets = [18, 0], sizes = [1, 32], strides = [1, 1]} : vector<30x32xf32> to vector<1x32xf32>
    %125 = vector.extract_strided_slice %105 {offsets = [19, 0], sizes = [1, 32], strides = [1, 1]} : vector<30x32xf32> to vector<1x32xf32>
    %126 = vector.extract_strided_slice %105 {offsets = [20, 0], sizes = [1, 32], strides = [1, 1]} : vector<30x32xf32> to vector<1x32xf32>
    %127 = vector.extract_strided_slice %105 {offsets = [21, 0], sizes = [1, 32], strides = [1, 1]} : vector<30x32xf32> to vector<1x32xf32>
    %128 = vector.extract_strided_slice %105 {offsets = [22, 0], sizes = [1, 32], strides = [1, 1]} : vector<30x32xf32> to vector<1x32xf32>
    %129 = vector.extract_strided_slice %105 {offsets = [23, 0], sizes = [1, 32], strides = [1, 1]} : vector<30x32xf32> to vector<1x32xf32>
    %130 = vector.extract_strided_slice %105 {offsets = [24, 0], sizes = [1, 32], strides = [1, 1]} : vector<30x32xf32> to vector<1x32xf32>
    %131 = vector.extract_strided_slice %105 {offsets = [25, 0], sizes = [1, 32], strides = [1, 1]} : vector<30x32xf32> to vector<1x32xf32>
    %132 = vector.extract_strided_slice %105 {offsets = [26, 0], sizes = [1, 32], strides = [1, 1]} : vector<30x32xf32> to vector<1x32xf32>
    %133 = vector.extract_strided_slice %105 {offsets = [27, 0], sizes = [1, 32], strides = [1, 1]} : vector<30x32xf32> to vector<1x32xf32>
    %134 = vector.extract_strided_slice %105 {offsets = [28, 0], sizes = [1, 32], strides = [1, 1]} : vector<30x32xf32> to vector<1x32xf32>
    %135 = vector.extract_strided_slice %105 {offsets = [29, 0], sizes = [1, 32], strides = [1, 1]} : vector<30x32xf32> to vector<1x32xf32>
    %136 = tpu.concatenate %106, %107, %108, %109, %110, %111, %112, %113, %114, %115, %116, %117, %118, %119, %120, %121 in 1 : vector<1x32xf32>, vector<1x32xf32>, vector<1x32xf32>, vector<1x32xf32>, vector<1x32xf32>, vector<1x32xf32>, vector<1x32xf32>, vector<1x32xf32>, vector<1x32xf32>, vector<1x32xf32>, vector<1x32xf32>, vector<1x32xf32>, vector<1x32xf32>, vector<1x32xf32>, vector<1x32xf32>, vector<1x32xf32> -> vector<1x512xf32>
    %137 = tpu.concatenate %122, %123, %124, %125, %126, %127, %128, %129, %130, %131, %132, %133, %134, %135 in 1 : vector<1x32xf32>, vector<1x32xf32>, vector<1x32xf32>, vector<1x32xf32>, vector<1x32xf32>, vector<1x32xf32>, vector<1x32xf32>, vector<1x32xf32>, vector<1x32xf32>, vector<1x32xf32>, vector<1x32xf32>, vector<1x32xf32>, vector<1x32xf32>, vector<1x32xf32> -> vector<1x448xf32>
    %138 = tpu.concatenate %136, %137 in 1 : vector<1x512xf32>, vector<1x448xf32> -> vector<1x960xf32>
    %139 = tpu.concatenate %77, %138 in 0 : vector<1x960xf32>, vector<1x960xf32> -> vector<2x960xf32>
    %140 = arith.truncf %139 : vector<2x960xf32> to vector<2x960xbf16>
    %c0_21 = arith.constant 0 : index
    %c0_22 = arith.constant 0 : index
    %141 = vector.load %arg4[%c0_21, %c0_22] : memref<960x256xbf16, #tpu.memory_space<vmem>>, vector<960x256xbf16>
    %cst_23 = arith.constant dense<0.000000e+00> : vector<2x256xf32>
    %142 = tpu.matmul %140, %141, %cst_23 {dimension_numbers = #tpu.dot_dimension_numbers<[1], [0], [0], [1], [0, 0, 1, 1], [], []>} : vector<2x960xbf16>, vector<960x256xbf16>, vector<2x256xf32> -> vector<2x256xf32>
    %c0_24 = arith.constant 0 : index
    %c0_25 = arith.constant 0 : index
    %143 = vector.load %arg5[%c0_24, %c0_25] : memref<1x256xf32, #tpu.memory_space<vmem>>, vector<1x256xf32>
    %144 = vector.broadcast %143 : vector<1x256xf32> to vector<2x256xf32>
    %145 = arith.addf %142, %144 : vector<2x256xf32>
    %cst_26 = arith.constant 0.000000e+00 : f32
    %146 = vector.broadcast %cst_26 : f32 to vector<2x256xf32>
    %147 = arith.maximumf %145, %146 : vector<2x256xf32>
    %148 = arith.truncf %147 : vector<2x256xf32> to vector<2x256xbf16>
    %c0_27 = arith.constant 0 : index
    %c0_28 = arith.constant 0 : index
    %149 = vector.load %arg6[%c0_27, %c0_28] : memref<256x2048xbf16, #tpu.memory_space<vmem>>, vector<256x2048xbf16>
    %cst_29 = arith.constant dense<0.000000e+00> : vector<2x2048xf32>
    %150 = tpu.matmul %148, %149, %cst_29 {dimension_numbers = #tpu.dot_dimension_numbers<[1], [0], [0], [1], [0, 0, 1, 1], [], []>} : vector<2x256xbf16>, vector<256x2048xbf16>, vector<2x2048xf32> -> vector<2x2048xf32>
    %c0_30 = arith.constant 0 : index
    %c0_31 = arith.constant 0 : index
    %151 = vector.load %arg7[%c0_30, %c0_31] : memref<1x2048xf32, #tpu.memory_space<vmem>>, vector<1x2048xf32>
    %152 = vector.broadcast %151 : vector<1x2048xf32> to vector<2x2048xf32>
    %153 = arith.addf %150, %152 : vector<2x2048xf32>
    %cst_32 = arith.constant 0.000000e+00 : f32
    %154 = vector.broadcast %cst_32 : f32 to vector<2x2048xf32>
    %155 = arith.maximumf %153, %154 : vector<2x2048xf32>
    %156 = arith.truncf %155 : vector<2x2048xf32> to vector<2x2048xbf16>
    %c0_33 = arith.constant 0 : index
    %c0_34 = arith.constant 0 : index
    %157 = vector.load %arg8[%c0_33, %c0_34] : memref<512x64xbf16, #tpu.memory_space<vmem>>, vector<512x64xbf16>
    %c0_35 = arith.constant 0 : index
    %c0_36 = arith.constant 0 : index
    %158 = vector.load %arg9[%c0_35, %c0_36] : memref<1x64xf32, #tpu.memory_space<vmem>>, vector<1x64xf32>
    %159 = vector.extract_strided_slice %156 {offsets = [0, 0], sizes = [2, 96], strides = [1, 1]} : vector<2x2048xbf16> to vector<2x96xbf16>
    %160 = vector.extract_strided_slice %157 {offsets = [160, 0], sizes = [96, 64], strides = [1, 1]} : vector<512x64xbf16> to vector<96x64xbf16>
    %cst_37 = arith.constant dense<0.000000e+00> : vector<2x64xf32>
    %161 = tpu.matmul %159, %160, %cst_37 {dimension_numbers = #tpu.dot_dimension_numbers<[1], [0], [0], [1], [0, 0, 1, 1], [], []>} : vector<2x96xbf16>, vector<96x64xbf16>, vector<2x64xf32> -> vector<2x64xf32>
    %162 = vector.broadcast %158 : vector<1x64xf32> to vector<2x64xf32>
    %163 = arith.addf %162, %161 : vector<2x64xf32>
    %164 = vector.extract_strided_slice %156 {offsets = [0, 256], sizes = [2, 96], strides = [1, 1]} : vector<2x2048xbf16> to vector<2x96xbf16>
    %165 = vector.extract_strided_slice %157 {offsets = [288, 0], sizes = [96, 64], strides = [1, 1]} : vector<512x64xbf16> to vector<96x64xbf16>
    %cst_38 = arith.constant dense<0.000000e+00> : vector<2x64xf32>
    %166 = tpu.matmul %164, %165, %cst_38 {dimension_numbers = #tpu.dot_dimension_numbers<[1], [0], [0], [1], [0, 0, 1, 1], [], []>} : vector<2x96xbf16>, vector<96x64xbf16>, vector<2x64xf32> -> vector<2x64xf32>
    %167 = arith.addf %163, %166 : vector<2x64xf32>
    %168 = vector.extract_strided_slice %156 {offsets = [0, 512], sizes = [2, 96], strides = [1, 1]} : vector<2x2048xbf16> to vector<2x96xbf16>
    %169 = vector.extract_strided_slice %157 {offsets = [416, 0], sizes = [96, 64], strides = [1, 1]} : vector<512x64xbf16> to vector<96x64xbf16>
    %cst_39 = arith.constant dense<0.000000e+00> : vector<2x64xf32>
    %170 = tpu.matmul %168, %169, %cst_39 {dimension_numbers = #tpu.dot_dimension_numbers<[1], [0], [0], [1], [0, 0, 1, 1], [], []>} : vector<2x96xbf16>, vector<96x64xbf16>, vector<2x64xf32> -> vector<2x64xf32>
    %171 = arith.addf %167, %170 : vector<2x64xf32>
    %cst_40 = arith.constant 0.000000e+00 : f32
    %172 = vector.broadcast %cst_40 : f32 to vector<2x64xf32>
    %173 = arith.maximumf %171, %172 : vector<2x64xf32>
    %174 = vector.extract_strided_slice %156 {offsets = [0, 32], sizes = [2, 128], strides = [1, 1]} : vector<2x2048xbf16> to vector<2x128xbf16>
    %175 = vector.extract_strided_slice %157 {offsets = [128, 0], sizes = [128, 64], strides = [1, 1]} : vector<512x64xbf16> to vector<128x64xbf16>
    %cst_41 = arith.constant dense<0.000000e+00> : vector<2x64xf32>
    %176 = tpu.matmul %174, %175, %cst_41 {dimension_numbers = #tpu.dot_dimension_numbers<[1], [0], [0], [1], [0, 0, 1, 1], [], []>} : vector<2x128xbf16>, vector<128x64xbf16>, vector<2x64xf32> -> vector<2x64xf32>
    %177 = vector.broadcast %158 : vector<1x64xf32> to vector<2x64xf32>
    %178 = arith.addf %177, %176 : vector<2x64xf32>
    %179 = vector.extract_strided_slice %156 {offsets = [0, 288], sizes = [2, 128], strides = [1, 1]} : vector<2x2048xbf16> to vector<2x128xbf16>
    %180 = vector.extract_strided_slice %157 {offsets = [256, 0], sizes = [128, 64], strides = [1, 1]} : vector<512x64xbf16> to vector<128x64xbf16>
    %cst_42 = arith.constant dense<0.000000e+00> : vector<2x64xf32>
    %181 = tpu.matmul %179, %180, %cst_42 {dimension_numbers = #tpu.dot_dimension_numbers<[1], [0], [0], [1], [0, 0, 1, 1], [], []>} : vector<2x128xbf16>, vector<128x64xbf16>, vector<2x64xf32> -> vector<2x64xf32>
    %182 = arith.addf %178, %181 : vector<2x64xf32>
    %183 = vector.extract_strided_slice %156 {offsets = [0, 544], sizes = [2, 128], strides = [1, 1]} : vector<2x2048xbf16> to vector<2x128xbf16>
    %184 = vector.extract_strided_slice %157 {offsets = [384, 0], sizes = [128, 64], strides = [1, 1]} : vector<512x64xbf16> to vector<128x64xbf16>
    %cst_43 = arith.constant dense<0.000000e+00> : vector<2x64xf32>
    %185 = tpu.matmul %183, %184, %cst_43 {dimension_numbers = #tpu.dot_dimension_numbers<[1], [0], [0], [1], [0, 0, 1, 1], [], []>} : vector<2x128xbf16>, vector<128x64xbf16>, vector<2x64xf32> -> vector<2x64xf32>
    %186 = arith.addf %182, %185 : vector<2x64xf32>
    %cst_44 = arith.constant 0.000000e+00 : f32
    %187 = vector.broadcast %cst_44 : f32 to vector<2x64xf32>
    %188 = arith.maximumf %186, %187 : vector<2x64xf32>
    %189 = vector.extract_strided_slice %156 {offsets = [0, 96], sizes = [2, 128], strides = [1, 1]} : vector<2x2048xbf16> to vector<2x128xbf16>
    %190 = vector.extract_strided_slice %157 {offsets = [128, 0], sizes = [128, 64], strides = [1, 1]} : vector<512x64xbf16> to vector<128x64xbf16>
    %cst_45 = arith.constant dense<0.000000e+00> : vector<2x64xf32>
    %191 = tpu.matmul %189, %190, %cst_45 {dimension_numbers = #tpu.dot_dimension_numbers<[1], [0], [0], [1], [0, 0, 1, 1], [], []>} : vector<2x128xbf16>, vector<128x64xbf16>, vector<2x64xf32> -> vector<2x64xf32>
    %192 = vector.broadcast %158 : vector<1x64xf32> to vector<2x64xf32>
    %193 = arith.addf %192, %191 : vector<2x64xf32>
    %194 = vector.extract_strided_slice %156 {offsets = [0, 352], sizes = [2, 128], strides = [1, 1]} : vector<2x2048xbf16> to vector<2x128xbf16>
    %195 = vector.extract_strided_slice %157 {offsets = [256, 0], sizes = [128, 64], strides = [1, 1]} : vector<512x64xbf16> to vector<128x64xbf16>
    %cst_46 = arith.constant dense<0.000000e+00> : vector<2x64xf32>
    %196 = tpu.matmul %194, %195, %cst_46 {dimension_numbers = #tpu.dot_dimension_numbers<[1], [0], [0], [1], [0, 0, 1, 1], [], []>} : vector<2x128xbf16>, vector<128x64xbf16>, vector<2x64xf32> -> vector<2x64xf32>
    %197 = arith.addf %193, %196 : vector<2x64xf32>
    %198 = vector.extract_strided_slice %156 {offsets = [0, 608], sizes = [2, 128], strides = [1, 1]} : vector<2x2048xbf16> to vector<2x128xbf16>
    %199 = vector.extract_strided_slice %157 {offsets = [384, 0], sizes = [128, 64], strides = [1, 1]} : vector<512x64xbf16> to vector<128x64xbf16>
    %cst_47 = arith.constant dense<0.000000e+00> : vector<2x64xf32>
    %200 = tpu.matmul %198, %199, %cst_47 {dimension_numbers = #tpu.dot_dimension_numbers<[1], [0], [0], [1], [0, 0, 1, 1], [], []>} : vector<2x128xbf16>, vector<128x64xbf16>, vector<2x64xf32> -> vector<2x64xf32>
    %201 = arith.addf %197, %200 : vector<2x64xf32>
    %cst_48 = arith.constant 0.000000e+00 : f32
    %202 = vector.broadcast %cst_48 : f32 to vector<2x64xf32>
    %203 = arith.maximumf %201, %202 : vector<2x64xf32>
    %204 = vector.extract_strided_slice %156 {offsets = [0, 160], sizes = [2, 96], strides = [1, 1]} : vector<2x2048xbf16> to vector<2x96xbf16>
    %205 = vector.extract_strided_slice %157 {offsets = [128, 0], sizes = [96, 64], strides = [1, 1]} : vector<512x64xbf16> to vector<96x64xbf16>
    %cst_49 = arith.constant dense<0.000000e+00> : vector<2x64xf32>
    %206 = tpu.matmul %204, %205, %cst_49 {dimension_numbers = #tpu.dot_dimension_numbers<[1], [0], [0], [1], [0, 0, 1, 1], [], []>} : vector<2x96xbf16>, vector<96x64xbf16>, vector<2x64xf32> -> vector<2x64xf32>
    %207 = vector.broadcast %158 : vector<1x64xf32> to vector<2x64xf32>
    %208 = arith.addf %207, %206 : vector<2x64xf32>
    %209 = vector.extract_strided_slice %156 {offsets = [0, 416], sizes = [2, 96], strides = [1, 1]} : vector<2x2048xbf16> to vector<2x96xbf16>
    %210 = vector.extract_strided_slice %157 {offsets = [256, 0], sizes = [96, 64], strides = [1, 1]} : vector<512x64xbf16> to vector<96x64xbf16>
    %cst_50 = arith.constant dense<0.000000e+00> : vector<2x64xf32>
    %211 = tpu.matmul %209, %210, %cst_50 {dimension_numbers = #tpu.dot_dimension_numbers<[1], [0], [0], [1], [0, 0, 1, 1], [], []>} : vector<2x96xbf16>, vector<96x64xbf16>, vector<2x64xf32> -> vector<2x64xf32>
    %212 = arith.addf %208, %211 : vector<2x64xf32>
    %213 = vector.extract_strided_slice %156 {offsets = [0, 672], sizes = [2, 96], strides = [1, 1]} : vector<2x2048xbf16> to vector<2x96xbf16>
    %214 = vector.extract_strided_slice %157 {offsets = [384, 0], sizes = [96, 64], strides = [1, 1]} : vector<512x64xbf16> to vector<96x64xbf16>
    %cst_51 = arith.constant dense<0.000000e+00> : vector<2x64xf32>
    %215 = tpu.matmul %213, %214, %cst_51 {dimension_numbers = #tpu.dot_dimension_numbers<[1], [0], [0], [1], [0, 0, 1, 1], [], []>} : vector<2x96xbf16>, vector<96x64xbf16>, vector<2x64xf32> -> vector<2x64xf32>
    %216 = arith.addf %212, %215 : vector<2x64xf32>
    %cst_52 = arith.constant 0.000000e+00 : f32
    %217 = vector.broadcast %cst_52 : f32 to vector<2x64xf32>
    %218 = arith.maximumf %216, %217 : vector<2x64xf32>
    %219 = vector.extract_strided_slice %156 {offsets = [0, 256], sizes = [2, 96], strides = [1, 1]} : vector<2x2048xbf16> to vector<2x96xbf16>
    %220 = vector.extract_strided_slice %157 {offsets = [32, 0], sizes = [96, 64], strides = [1, 1]} : vector<512x64xbf16> to vector<96x64xbf16>
    %cst_53 = arith.constant dense<0.000000e+00> : vector<2x64xf32>
    %221 = tpu.matmul %219, %220, %cst_53 {dimension_numbers = #tpu.dot_dimension_numbers<[1], [0], [0], [1], [0, 0, 1, 1], [], []>} : vector<2x96xbf16>, vector<96x64xbf16>, vector<2x64xf32> -> vector<2x64xf32>
    %222 = vector.broadcast %158 : vector<1x64xf32> to vector<2x64xf32>
    %223 = arith.addf %222, %221 : vector<2x64xf32>
    %224 = vector.extract_strided_slice %156 {offsets = [0, 512], sizes = [2, 96], strides = [1, 1]} : vector<2x2048xbf16> to vector<2x96xbf16>
    %225 = vector.extract_strided_slice %157 {offsets = [160, 0], sizes = [96, 64], strides = [1, 1]} : vector<512x64xbf16> to vector<96x64xbf16>
    %cst_54 = arith.constant dense<0.000000e+00> : vector<2x64xf32>
    %226 = tpu.matmul %224, %225, %cst_54 {dimension_numbers = #tpu.dot_dimension_numbers<[1], [0], [0], [1], [0, 0, 1, 1], [], []>} : vector<2x96xbf16>, vector<96x64xbf16>, vector<2x64xf32> -> vector<2x64xf32>
    %227 = arith.addf %223, %226 : vector<2x64xf32>
    %228 = vector.extract_strided_slice %156 {offsets = [0, 768], sizes = [2, 96], strides = [1, 1]} : vector<2x2048xbf16> to vector<2x96xbf16>
    %229 = vector.extract_strided_slice %157 {offsets = [288, 0], sizes = [96, 64], strides = [1, 1]} : vector<512x64xbf16> to vector<96x64xbf16>
    %cst_55 = arith.constant dense<0.000000e+00> : vector<2x64xf32>
    %230 = tpu.matmul %228, %229, %cst_55 {dimension_numbers = #tpu.dot_dimension_numbers<[1], [0], [0], [1], [0, 0, 1, 1], [], []>} : vector<2x96xbf16>, vector<96x64xbf16>, vector<2x64xf32> -> vector<2x64xf32>
    %231 = arith.addf %227, %230 : vector<2x64xf32>
    %232 = vector.extract_strided_slice %156 {offsets = [0, 1024], sizes = [2, 96], strides = [1, 1]} : vector<2x2048xbf16> to vector<2x96xbf16>
    %233 = vector.extract_strided_slice %157 {offsets = [416, 0], sizes = [96, 64], strides = [1, 1]} : vector<512x64xbf16> to vector<96x64xbf16>
    %cst_56 = arith.constant dense<0.000000e+00> : vector<2x64xf32>
    %234 = tpu.matmul %232, %233, %cst_56 {dimension_numbers = #tpu.dot_dimension_numbers<[1], [0], [0], [1], [0, 0, 1, 1], [], []>} : vector<2x96xbf16>, vector<96x64xbf16>, vector<2x64xf32> -> vector<2x64xf32>
    %235 = arith.addf %231, %234 : vector<2x64xf32>
    %cst_57 = arith.constant 0.000000e+00 : f32
    %236 = vector.broadcast %cst_57 : f32 to vector<2x64xf32>
    %237 = arith.maximumf %235, %236 : vector<2x64xf32>
    %238 = vector.extract_strided_slice %156 {offsets = [0, 288], sizes = [2, 128], strides = [1, 1]} : vector<2x2048xbf16> to vector<2x128xbf16>
    %239 = vector.extract_strided_slice %157 {offsets = [0, 0], sizes = [128, 64], strides = [1, 1]} : vector<512x64xbf16> to vector<128x64xbf16>
    %cst_58 = arith.constant dense<0.000000e+00> : vector<2x64xf32>
    %240 = tpu.matmul %238, %239, %cst_58 {dimension_numbers = #tpu.dot_dimension_numbers<[1], [0], [0], [1], [0, 0, 1, 1], [], []>} : vector<2x128xbf16>, vector<128x64xbf16>, vector<2x64xf32> -> vector<2x64xf32>
    %241 = vector.broadcast %158 : vector<1x64xf32> to vector<2x64xf32>
    %242 = arith.addf %241, %240 : vector<2x64xf32>
    %243 = vector.extract_strided_slice %156 {offsets = [0, 544], sizes = [2, 128], strides = [1, 1]} : vector<2x2048xbf16> to vector<2x128xbf16>
    %244 = vector.extract_strided_slice %157 {offsets = [128, 0], sizes = [128, 64], strides = [1, 1]} : vector<512x64xbf16> to vector<128x64xbf16>
    %cst_59 = arith.constant dense<0.000000e+00> : vector<2x64xf32>
    %245 = tpu.matmul %243, %244, %cst_59 {dimension_numbers = #tpu.dot_dimension_numbers<[1], [0], [0], [1], [0, 0, 1, 1], [], []>} : vector<2x128xbf16>, vector<128x64xbf16>, vector<2x64xf32> -> vector<2x64xf32>
    %246 = arith.addf %242, %245 : vector<2x64xf32>
    %247 = vector.extract_strided_slice %156 {offsets = [0, 800], sizes = [2, 128], strides = [1, 1]} : vector<2x2048xbf16> to vector<2x128xbf16>
    %248 = vector.extract_strided_slice %157 {offsets = [256, 0], sizes = [128, 64], strides = [1, 1]} : vector<512x64xbf16> to vector<128x64xbf16>
    %cst_60 = arith.constant dense<0.000000e+00> : vector<2x64xf32>
    %249 = tpu.matmul %247, %248, %cst_60 {dimension_numbers = #tpu.dot_dimension_numbers<[1], [0], [0], [1], [0, 0, 1, 1], [], []>} : vector<2x128xbf16>, vector<128x64xbf16>, vector<2x64xf32> -> vector<2x64xf32>
    %250 = arith.addf %246, %249 : vector<2x64xf32>
    %251 = vector.extract_strided_slice %156 {offsets = [0, 1056], sizes = [2, 128], strides = [1, 1]} : vector<2x2048xbf16> to vector<2x128xbf16>
    %252 = vector.extract_strided_slice %157 {offsets = [384, 0], sizes = [128, 64], strides = [1, 1]} : vector<512x64xbf16> to vector<128x64xbf16>
    %cst_61 = arith.constant dense<0.000000e+00> : vector<2x64xf32>
    %253 = tpu.matmul %251, %252, %cst_61 {dimension_numbers = #tpu.dot_dimension_numbers<[1], [0], [0], [1], [0, 0, 1, 1], [], []>} : vector<2x128xbf16>, vector<128x64xbf16>, vector<2x64xf32> -> vector<2x64xf32>
    %254 = arith.addf %250, %253 : vector<2x64xf32>
    %cst_62 = arith.constant 0.000000e+00 : f32
    %255 = vector.broadcast %cst_62 : f32 to vector<2x64xf32>
    %256 = arith.maximumf %254, %255 : vector<2x64xf32>
    %257 = vector.extract_strided_slice %156 {offsets = [0, 352], sizes = [2, 128], strides = [1, 1]} : vector<2x2048xbf16> to vector<2x128xbf16>
    %258 = vector.extract_strided_slice %157 {offsets = [0, 0], sizes = [128, 64], strides = [1, 1]} : vector<512x64xbf16> to vector<128x64xbf16>
    %cst_63 = arith.constant dense<0.000000e+00> : vector<2x64xf32>
    %259 = tpu.matmul %257, %258, %cst_63 {dimension_numbers = #tpu.dot_dimension_numbers<[1], [0], [0], [1], [0, 0, 1, 1], [], []>} : vector<2x128xbf16>, vector<128x64xbf16>, vector<2x64xf32> -> vector<2x64xf32>
    %260 = vector.broadcast %158 : vector<1x64xf32> to vector<2x64xf32>
    %261 = arith.addf %260, %259 : vector<2x64xf32>
    %262 = vector.extract_strided_slice %156 {offsets = [0, 608], sizes = [2, 128], strides = [1, 1]} : vector<2x2048xbf16> to vector<2x128xbf16>
    %263 = vector.extract_strided_slice %157 {offsets = [128, 0], sizes = [128, 64], strides = [1, 1]} : vector<512x64xbf16> to vector<128x64xbf16>
    %cst_64 = arith.constant dense<0.000000e+00> : vector<2x64xf32>
    %264 = tpu.matmul %262, %263, %cst_64 {dimension_numbers = #tpu.dot_dimension_numbers<[1], [0], [0], [1], [0, 0, 1, 1], [], []>} : vector<2x128xbf16>, vector<128x64xbf16>, vector<2x64xf32> -> vector<2x64xf32>
    %265 = arith.addf %261, %264 : vector<2x64xf32>
    %266 = vector.extract_strided_slice %156 {offsets = [0, 864], sizes = [2, 128], strides = [1, 1]} : vector<2x2048xbf16> to vector<2x128xbf16>
    %267 = vector.extract_strided_slice %157 {offsets = [256, 0], sizes = [128, 64], strides = [1, 1]} : vector<512x64xbf16> to vector<128x64xbf16>
    %cst_65 = arith.constant dense<0.000000e+00> : vector<2x64xf32>
    %268 = tpu.matmul %266, %267, %cst_65 {dimension_numbers = #tpu.dot_dimension_numbers<[1], [0], [0], [1], [0, 0, 1, 1], [], []>} : vector<2x128xbf16>, vector<128x64xbf16>, vector<2x64xf32> -> vector<2x64xf32>
    %269 = arith.addf %265, %268 : vector<2x64xf32>
    %270 = vector.extract_strided_slice %156 {offsets = [0, 1120], sizes = [2, 128], strides = [1, 1]} : vector<2x2048xbf16> to vector<2x128xbf16>
    %271 = vector.extract_strided_slice %157 {offsets = [384, 0], sizes = [128, 64], strides = [1, 1]} : vector<512x64xbf16> to vector<128x64xbf16>
    %cst_66 = arith.constant dense<0.000000e+00> : vector<2x64xf32>
    %272 = tpu.matmul %270, %271, %cst_66 {dimension_numbers = #tpu.dot_dimension_numbers<[1], [0], [0], [1], [0, 0, 1, 1], [], []>} : vector<2x128xbf16>, vector<128x64xbf16>, vector<2x64xf32> -> vector<2x64xf32>
    %273 = arith.addf %269, %272 : vector<2x64xf32>
    %cst_67 = arith.constant 0.000000e+00 : f32
    %274 = vector.broadcast %cst_67 : f32 to vector<2x64xf32>
    %275 = arith.maximumf %273, %274 : vector<2x64xf32>
    %276 = vector.extract_strided_slice %156 {offsets = [0, 416], sizes = [2, 96], strides = [1, 1]} : vector<2x2048xbf16> to vector<2x96xbf16>
    %277 = vector.extract_strided_slice %157 {offsets = [0, 0], sizes = [96, 64], strides = [1, 1]} : vector<512x64xbf16> to vector<96x64xbf16>
    %cst_68 = arith.constant dense<0.000000e+00> : vector<2x64xf32>
    %278 = tpu.matmul %276, %277, %cst_68 {dimension_numbers = #tpu.dot_dimension_numbers<[1], [0], [0], [1], [0, 0, 1, 1], [], []>} : vector<2x96xbf16>, vector<96x64xbf16>, vector<2x64xf32> -> vector<2x64xf32>
    %279 = vector.broadcast %158 : vector<1x64xf32> to vector<2x64xf32>
    %280 = arith.addf %279, %278 : vector<2x64xf32>
    %281 = vector.extract_strided_slice %156 {offsets = [0, 672], sizes = [2, 96], strides = [1, 1]} : vector<2x2048xbf16> to vector<2x96xbf16>
    %282 = vector.extract_strided_slice %157 {offsets = [128, 0], sizes = [96, 64], strides = [1, 1]} : vector<512x64xbf16> to vector<96x64xbf16>
    %cst_69 = arith.constant dense<0.000000e+00> : vector<2x64xf32>
    %283 = tpu.matmul %281, %282, %cst_69 {dimension_numbers = #tpu.dot_dimension_numbers<[1], [0], [0], [1], [0, 0, 1, 1], [], []>} : vector<2x96xbf16>, vector<96x64xbf16>, vector<2x64xf32> -> vector<2x64xf32>
    %284 = arith.addf %280, %283 : vector<2x64xf32>
    %285 = vector.extract_strided_slice %156 {offsets = [0, 928], sizes = [2, 96], strides = [1, 1]} : vector<2x2048xbf16> to vector<2x96xbf16>
    %286 = vector.extract_strided_slice %157 {offsets = [256, 0], sizes = [96, 64], strides = [1, 1]} : vector<512x64xbf16> to vector<96x64xbf16>
    %cst_70 = arith.constant dense<0.000000e+00> : vector<2x64xf32>
    %287 = tpu.matmul %285, %286, %cst_70 {dimension_numbers = #tpu.dot_dimension_numbers<[1], [0], [0], [1], [0, 0, 1, 1], [], []>} : vector<2x96xbf16>, vector<96x64xbf16>, vector<2x64xf32> -> vector<2x64xf32>
    %288 = arith.addf %284, %287 : vector<2x64xf32>
    %289 = vector.extract_strided_slice %156 {offsets = [0, 1184], sizes = [2, 96], strides = [1, 1]} : vector<2x2048xbf16> to vector<2x96xbf16>
    %290 = vector.extract_strided_slice %157 {offsets = [384, 0], sizes = [96, 64], strides = [1, 1]} : vector<512x64xbf16> to vector<96x64xbf16>
    %cst_71 = arith.constant dense<0.000000e+00> : vector<2x64xf32>
    %291 = tpu.matmul %289, %290, %cst_71 {dimension_numbers = #tpu.dot_dimension_numbers<[1], [0], [0], [1], [0, 0, 1, 1], [], []>} : vector<2x96xbf16>, vector<96x64xbf16>, vector<2x64xf32> -> vector<2x64xf32>
    %292 = arith.addf %288, %291 : vector<2x64xf32>
    %cst_72 = arith.constant 0.000000e+00 : f32
    %293 = vector.broadcast %cst_72 : f32 to vector<2x64xf32>
    %294 = arith.maximumf %292, %293 : vector<2x64xf32>
    %295 = vector.extract_strided_slice %156 {offsets = [0, 768], sizes = [2, 96], strides = [1, 1]} : vector<2x2048xbf16> to vector<2x96xbf16>
    %296 = vector.extract_strided_slice %157 {offsets = [32, 0], sizes = [96, 64], strides = [1, 1]} : vector<512x64xbf16> to vector<96x64xbf16>
    %cst_73 = arith.constant dense<0.000000e+00> : vector<2x64xf32>
    %297 = tpu.matmul %295, %296, %cst_73 {dimension_numbers = #tpu.dot_dimension_numbers<[1], [0], [0], [1], [0, 0, 1, 1], [], []>} : vector<2x96xbf16>, vector<96x64xbf16>, vector<2x64xf32> -> vector<2x64xf32>
    %298 = vector.broadcast %158 : vector<1x64xf32> to vector<2x64xf32>
    %299 = arith.addf %298, %297 : vector<2x64xf32>
    %300 = vector.extract_strided_slice %156 {offsets = [0, 1024], sizes = [2, 96], strides = [1, 1]} : vector<2x2048xbf16> to vector<2x96xbf16>
    %301 = vector.extract_strided_slice %157 {offsets = [160, 0], sizes = [96, 64], strides = [1, 1]} : vector<512x64xbf16> to vector<96x64xbf16>
    %cst_74 = arith.constant dense<0.000000e+00> : vector<2x64xf32>
    %302 = tpu.matmul %300, %301, %cst_74 {dimension_numbers = #tpu.dot_dimension_numbers<[1], [0], [0], [1], [0, 0, 1, 1], [], []>} : vector<2x96xbf16>, vector<96x64xbf16>, vector<2x64xf32> -> vector<2x64xf32>
    %303 = arith.addf %299, %302 : vector<2x64xf32>
    %304 = vector.extract_strided_slice %156 {offsets = [0, 1280], sizes = [2, 96], strides = [1, 1]} : vector<2x2048xbf16> to vector<2x96xbf16>
    %305 = vector.extract_strided_slice %157 {offsets = [288, 0], sizes = [96, 64], strides = [1, 1]} : vector<512x64xbf16> to vector<96x64xbf16>
    %cst_75 = arith.constant dense<0.000000e+00> : vector<2x64xf32>
    %306 = tpu.matmul %304, %305, %cst_75 {dimension_numbers = #tpu.dot_dimension_numbers<[1], [0], [0], [1], [0, 0, 1, 1], [], []>} : vector<2x96xbf16>, vector<96x64xbf16>, vector<2x64xf32> -> vector<2x64xf32>
    %307 = arith.addf %303, %306 : vector<2x64xf32>
    %308 = vector.extract_strided_slice %156 {offsets = [0, 1536], sizes = [2, 96], strides = [1, 1]} : vector<2x2048xbf16> to vector<2x96xbf16>
    %309 = vector.extract_strided_slice %157 {offsets = [416, 0], sizes = [96, 64], strides = [1, 1]} : vector<512x64xbf16> to vector<96x64xbf16>
    %cst_76 = arith.constant dense<0.000000e+00> : vector<2x64xf32>
    %310 = tpu.matmul %308, %309, %cst_76 {dimension_numbers = #tpu.dot_dimension_numbers<[1], [0], [0], [1], [0, 0, 1, 1], [], []>} : vector<2x96xbf16>, vector<96x64xbf16>, vector<2x64xf32> -> vector<2x64xf32>
    %311 = arith.addf %307, %310 : vector<2x64xf32>
    %cst_77 = arith.constant 0.000000e+00 : f32
    %312 = vector.broadcast %cst_77 : f32 to vector<2x64xf32>
    %313 = arith.maximumf %311, %312 : vector<2x64xf32>
    %314 = vector.extract_strided_slice %156 {offsets = [0, 800], sizes = [2, 128], strides = [1, 1]} : vector<2x2048xbf16> to vector<2x128xbf16>
    %315 = vector.extract_strided_slice %157 {offsets = [0, 0], sizes = [128, 64], strides = [1, 1]} : vector<512x64xbf16> to vector<128x64xbf16>
    %cst_78 = arith.constant dense<0.000000e+00> : vector<2x64xf32>
    %316 = tpu.matmul %314, %315, %cst_78 {dimension_numbers = #tpu.dot_dimension_numbers<[1], [0], [0], [1], [0, 0, 1, 1], [], []>} : vector<2x128xbf16>, vector<128x64xbf16>, vector<2x64xf32> -> vector<2x64xf32>
    %317 = vector.broadcast %158 : vector<1x64xf32> to vector<2x64xf32>
    %318 = arith.addf %317, %316 : vector<2x64xf32>
    %319 = vector.extract_strided_slice %156 {offsets = [0, 1056], sizes = [2, 128], strides = [1, 1]} : vector<2x2048xbf16> to vector<2x128xbf16>
    %320 = vector.extract_strided_slice %157 {offsets = [128, 0], sizes = [128, 64], strides = [1, 1]} : vector<512x64xbf16> to vector<128x64xbf16>
    %cst_79 = arith.constant dense<0.000000e+00> : vector<2x64xf32>
    %321 = tpu.matmul %319, %320, %cst_79 {dimension_numbers = #tpu.dot_dimension_numbers<[1], [0], [0], [1], [0, 0, 1, 1], [], []>} : vector<2x128xbf16>, vector<128x64xbf16>, vector<2x64xf32> -> vector<2x64xf32>
    %322 = arith.addf %318, %321 : vector<2x64xf32>
    %323 = vector.extract_strided_slice %156 {offsets = [0, 1312], sizes = [2, 128], strides = [1, 1]} : vector<2x2048xbf16> to vector<2x128xbf16>
    %324 = vector.extract_strided_slice %157 {offsets = [256, 0], sizes = [128, 64], strides = [1, 1]} : vector<512x64xbf16> to vector<128x64xbf16>
    %cst_80 = arith.constant dense<0.000000e+00> : vector<2x64xf32>
    %325 = tpu.matmul %323, %324, %cst_80 {dimension_numbers = #tpu.dot_dimension_numbers<[1], [0], [0], [1], [0, 0, 1, 1], [], []>} : vector<2x128xbf16>, vector<128x64xbf16>, vector<2x64xf32> -> vector<2x64xf32>
    %326 = arith.addf %322, %325 : vector<2x64xf32>
    %327 = vector.extract_strided_slice %156 {offsets = [0, 1568], sizes = [2, 128], strides = [1, 1]} : vector<2x2048xbf16> to vector<2x128xbf16>
    %328 = vector.extract_strided_slice %157 {offsets = [384, 0], sizes = [128, 64], strides = [1, 1]} : vector<512x64xbf16> to vector<128x64xbf16>
    %cst_81 = arith.constant dense<0.000000e+00> : vector<2x64xf32>
    %329 = tpu.matmul %327, %328, %cst_81 {dimension_numbers = #tpu.dot_dimension_numbers<[1], [0], [0], [1], [0, 0, 1, 1], [], []>} : vector<2x128xbf16>, vector<128x64xbf16>, vector<2x64xf32> -> vector<2x64xf32>
    %330 = arith.addf %326, %329 : vector<2x64xf32>
    %cst_82 = arith.constant 0.000000e+00 : f32
    %331 = vector.broadcast %cst_82 : f32 to vector<2x64xf32>
    %332 = arith.maximumf %330, %331 : vector<2x64xf32>
    %333 = vector.extract_strided_slice %156 {offsets = [0, 864], sizes = [2, 128], strides = [1, 1]} : vector<2x2048xbf16> to vector<2x128xbf16>
    %334 = vector.extract_strided_slice %157 {offsets = [0, 0], sizes = [128, 64], strides = [1, 1]} : vector<512x64xbf16> to vector<128x64xbf16>
    %cst_83 = arith.constant dense<0.000000e+00> : vector<2x64xf32>
    %335 = tpu.matmul %333, %334, %cst_83 {dimension_numbers = #tpu.dot_dimension_numbers<[1], [0], [0], [1], [0, 0, 1, 1], [], []>} : vector<2x128xbf16>, vector<128x64xbf16>, vector<2x64xf32> -> vector<2x64xf32>
    %336 = vector.broadcast %158 : vector<1x64xf32> to vector<2x64xf32>
    %337 = arith.addf %336, %335 : vector<2x64xf32>
    %338 = vector.extract_strided_slice %156 {offsets = [0, 1120], sizes = [2, 128], strides = [1, 1]} : vector<2x2048xbf16> to vector<2x128xbf16>
    %339 = vector.extract_strided_slice %157 {offsets = [128, 0], sizes = [128, 64], strides = [1, 1]} : vector<512x64xbf16> to vector<128x64xbf16>
    %cst_84 = arith.constant dense<0.000000e+00> : vector<2x64xf32>
    %340 = tpu.matmul %338, %339, %cst_84 {dimension_numbers = #tpu.dot_dimension_numbers<[1], [0], [0], [1], [0, 0, 1, 1], [], []>} : vector<2x128xbf16>, vector<128x64xbf16>, vector<2x64xf32> -> vector<2x64xf32>
    %341 = arith.addf %337, %340 : vector<2x64xf32>
    %342 = vector.extract_strided_slice %156 {offsets = [0, 1376], sizes = [2, 128], strides = [1, 1]} : vector<2x2048xbf16> to vector<2x128xbf16>
    %343 = vector.extract_strided_slice %157 {offsets = [256, 0], sizes = [128, 64], strides = [1, 1]} : vector<512x64xbf16> to vector<128x64xbf16>
    %cst_85 = arith.constant dense<0.000000e+00> : vector<2x64xf32>
    %344 = tpu.matmul %342, %343, %cst_85 {dimension_numbers = #tpu.dot_dimension_numbers<[1], [0], [0], [1], [0, 0, 1, 1], [], []>} : vector<2x128xbf16>, vector<128x64xbf16>, vector<2x64xf32> -> vector<2x64xf32>
    %345 = arith.addf %341, %344 : vector<2x64xf32>
    %346 = vector.extract_strided_slice %156 {offsets = [0, 1632], sizes = [2, 128], strides = [1, 1]} : vector<2x2048xbf16> to vector<2x128xbf16>
    %347 = vector.extract_strided_slice %157 {offsets = [384, 0], sizes = [128, 64], strides = [1, 1]} : vector<512x64xbf16> to vector<128x64xbf16>
    %cst_86 = arith.constant dense<0.000000e+00> : vector<2x64xf32>
    %348 = tpu.matmul %346, %347, %cst_86 {dimension_numbers = #tpu.dot_dimension_numbers<[1], [0], [0], [1], [0, 0, 1, 1], [], []>} : vector<2x128xbf16>, vector<128x64xbf16>, vector<2x64xf32> -> vector<2x64xf32>
    %349 = arith.addf %345, %348 : vector<2x64xf32>
    %cst_87 = arith.constant 0.000000e+00 : f32
    %350 = vector.broadcast %cst_87 : f32 to vector<2x64xf32>
    %351 = arith.maximumf %349, %350 : vector<2x64xf32>
    %352 = vector.extract_strided_slice %156 {offsets = [0, 928], sizes = [2, 96], strides = [1, 1]} : vector<2x2048xbf16> to vector<2x96xbf16>
    %353 = vector.extract_strided_slice %157 {offsets = [0, 0], sizes = [96, 64], strides = [1, 1]} : vector<512x64xbf16> to vector<96x64xbf16>
    %cst_88 = arith.constant dense<0.000000e+00> : vector<2x64xf32>
    %354 = tpu.matmul %352, %353, %cst_88 {dimension_numbers = #tpu.dot_dimension_numbers<[1], [0], [0], [1], [0, 0, 1, 1], [], []>} : vector<2x96xbf16>, vector<96x64xbf16>, vector<2x64xf32> -> vector<2x64xf32>
    %355 = vector.broadcast %158 : vector<1x64xf32> to vector<2x64xf32>
    %356 = arith.addf %355, %354 : vector<2x64xf32>
    %357 = vector.extract_strided_slice %156 {offsets = [0, 1184], sizes = [2, 96], strides = [1, 1]} : vector<2x2048xbf16> to vector<2x96xbf16>
    %358 = vector.extract_strided_slice %157 {offsets = [128, 0], sizes = [96, 64], strides = [1, 1]} : vector<512x64xbf16> to vector<96x64xbf16>
    %cst_89 = arith.constant dense<0.000000e+00> : vector<2x64xf32>
    %359 = tpu.matmul %357, %358, %cst_89 {dimension_numbers = #tpu.dot_dimension_numbers<[1], [0], [0], [1], [0, 0, 1, 1], [], []>} : vector<2x96xbf16>, vector<96x64xbf16>, vector<2x64xf32> -> vector<2x64xf32>
    %360 = arith.addf %356, %359 : vector<2x64xf32>
    %361 = vector.extract_strided_slice %156 {offsets = [0, 1440], sizes = [2, 96], strides = [1, 1]} : vector<2x2048xbf16> to vector<2x96xbf16>
    %362 = vector.extract_strided_slice %157 {offsets = [256, 0], sizes = [96, 64], strides = [1, 1]} : vector<512x64xbf16> to vector<96x64xbf16>
    %cst_90 = arith.constant dense<0.000000e+00> : vector<2x64xf32>
    %363 = tpu.matmul %361, %362, %cst_90 {dimension_numbers = #tpu.dot_dimension_numbers<[1], [0], [0], [1], [0, 0, 1, 1], [], []>} : vector<2x96xbf16>, vector<96x64xbf16>, vector<2x64xf32> -> vector<2x64xf32>
    %364 = arith.addf %360, %363 : vector<2x64xf32>
    %365 = vector.extract_strided_slice %156 {offsets = [0, 1696], sizes = [2, 96], strides = [1, 1]} : vector<2x2048xbf16> to vector<2x96xbf16>
    %366 = vector.extract_strided_slice %157 {offsets = [384, 0], sizes = [96, 64], strides = [1, 1]} : vector<512x64xbf16> to vector<96x64xbf16>
    %cst_91 = arith.constant dense<0.000000e+00> : vector<2x64xf32>
    %367 = tpu.matmul %365, %366, %cst_91 {dimension_numbers = #tpu.dot_dimension_numbers<[1], [0], [0], [1], [0, 0, 1, 1], [], []>} : vector<2x96xbf16>, vector<96x64xbf16>, vector<2x64xf32> -> vector<2x64xf32>
    %368 = arith.addf %364, %367 : vector<2x64xf32>
    %cst_92 = arith.constant 0.000000e+00 : f32
    %369 = vector.broadcast %cst_92 : f32 to vector<2x64xf32>
    %370 = arith.maximumf %368, %369 : vector<2x64xf32>
    %371 = vector.extract_strided_slice %156 {offsets = [0, 1280], sizes = [2, 96], strides = [1, 1]} : vector<2x2048xbf16> to vector<2x96xbf16>
    %372 = vector.extract_strided_slice %157 {offsets = [32, 0], sizes = [96, 64], strides = [1, 1]} : vector<512x64xbf16> to vector<96x64xbf16>
    %cst_93 = arith.constant dense<0.000000e+00> : vector<2x64xf32>
    %373 = tpu.matmul %371, %372, %cst_93 {dimension_numbers = #tpu.dot_dimension_numbers<[1], [0], [0], [1], [0, 0, 1, 1], [], []>} : vector<2x96xbf16>, vector<96x64xbf16>, vector<2x64xf32> -> vector<2x64xf32>
    %374 = vector.broadcast %158 : vector<1x64xf32> to vector<2x64xf32>
    %375 = arith.addf %374, %373 : vector<2x64xf32>
    %376 = vector.extract_strided_slice %156 {offsets = [0, 1536], sizes = [2, 96], strides = [1, 1]} : vector<2x2048xbf16> to vector<2x96xbf16>
    %377 = vector.extract_strided_slice %157 {offsets = [160, 0], sizes = [96, 64], strides = [1, 1]} : vector<512x64xbf16> to vector<96x64xbf16>
    %cst_94 = arith.constant dense<0.000000e+00> : vector<2x64xf32>
    %378 = tpu.matmul %376, %377, %cst_94 {dimension_numbers = #tpu.dot_dimension_numbers<[1], [0], [0], [1], [0, 0, 1, 1], [], []>} : vector<2x96xbf16>, vector<96x64xbf16>, vector<2x64xf32> -> vector<2x64xf32>
    %379 = arith.addf %375, %378 : vector<2x64xf32>
    %380 = vector.extract_strided_slice %156 {offsets = [0, 1792], sizes = [2, 96], strides = [1, 1]} : vector<2x2048xbf16> to vector<2x96xbf16>
    %381 = vector.extract_strided_slice %157 {offsets = [288, 0], sizes = [96, 64], strides = [1, 1]} : vector<512x64xbf16> to vector<96x64xbf16>
    %cst_95 = arith.constant dense<0.000000e+00> : vector<2x64xf32>
    %382 = tpu.matmul %380, %381, %cst_95 {dimension_numbers = #tpu.dot_dimension_numbers<[1], [0], [0], [1], [0, 0, 1, 1], [], []>} : vector<2x96xbf16>, vector<96x64xbf16>, vector<2x64xf32> -> vector<2x64xf32>
    %383 = arith.addf %379, %382 : vector<2x64xf32>
    %cst_96 = arith.constant 0.000000e+00 : f32
    %384 = vector.broadcast %cst_96 : f32 to vector<2x64xf32>
    %385 = arith.maximumf %383, %384 : vector<2x64xf32>
    %386 = vector.extract_strided_slice %156 {offsets = [0, 1312], sizes = [2, 128], strides = [1, 1]} : vector<2x2048xbf16> to vector<2x128xbf16>
    %387 = vector.extract_strided_slice %157 {offsets = [0, 0], sizes = [128, 64], strides = [1, 1]} : vector<512x64xbf16> to vector<128x64xbf16>
    %cst_97 = arith.constant dense<0.000000e+00> : vector<2x64xf32>
    %388 = tpu.matmul %386, %387, %cst_97 {dimension_numbers = #tpu.dot_dimension_numbers<[1], [0], [0], [1], [0, 0, 1, 1], [], []>} : vector<2x128xbf16>, vector<128x64xbf16>, vector<2x64xf32> -> vector<2x64xf32>
    %389 = vector.broadcast %158 : vector<1x64xf32> to vector<2x64xf32>
    %390 = arith.addf %389, %388 : vector<2x64xf32>
    %391 = vector.extract_strided_slice %156 {offsets = [0, 1568], sizes = [2, 128], strides = [1, 1]} : vector<2x2048xbf16> to vector<2x128xbf16>
    %392 = vector.extract_strided_slice %157 {offsets = [128, 0], sizes = [128, 64], strides = [1, 1]} : vector<512x64xbf16> to vector<128x64xbf16>
    %cst_98 = arith.constant dense<0.000000e+00> : vector<2x64xf32>
    %393 = tpu.matmul %391, %392, %cst_98 {dimension_numbers = #tpu.dot_dimension_numbers<[1], [0], [0], [1], [0, 0, 1, 1], [], []>} : vector<2x128xbf16>, vector<128x64xbf16>, vector<2x64xf32> -> vector<2x64xf32>
    %394 = arith.addf %390, %393 : vector<2x64xf32>
    %395 = vector.extract_strided_slice %156 {offsets = [0, 1824], sizes = [2, 128], strides = [1, 1]} : vector<2x2048xbf16> to vector<2x128xbf16>
    %396 = vector.extract_strided_slice %157 {offsets = [256, 0], sizes = [128, 64], strides = [1, 1]} : vector<512x64xbf16> to vector<128x64xbf16>
    %cst_99 = arith.constant dense<0.000000e+00> : vector<2x64xf32>
    %397 = tpu.matmul %395, %396, %cst_99 {dimension_numbers = #tpu.dot_dimension_numbers<[1], [0], [0], [1], [0, 0, 1, 1], [], []>} : vector<2x128xbf16>, vector<128x64xbf16>, vector<2x64xf32> -> vector<2x64xf32>
    %398 = arith.addf %394, %397 : vector<2x64xf32>
    %cst_100 = arith.constant 0.000000e+00 : f32
    %399 = vector.broadcast %cst_100 : f32 to vector<2x64xf32>
    %400 = arith.maximumf %398, %399 : vector<2x64xf32>
    %401 = vector.extract_strided_slice %156 {offsets = [0, 1376], sizes = [2, 128], strides = [1, 1]} : vector<2x2048xbf16> to vector<2x128xbf16>
    %402 = vector.extract_strided_slice %157 {offsets = [0, 0], sizes = [128, 64], strides = [1, 1]} : vector<512x64xbf16> to vector<128x64xbf16>
    %cst_101 = arith.constant dense<0.000000e+00> : vector<2x64xf32>
    %403 = tpu.matmul %401, %402, %cst_101 {dimension_numbers = #tpu.dot_dimension_numbers<[1], [0], [0], [1], [0, 0, 1, 1], [], []>} : vector<2x128xbf16>, vector<128x64xbf16>, vector<2x64xf32> -> vector<2x64xf32>
    %404 = vector.broadcast %158 : vector<1x64xf32> to vector<2x64xf32>
    %405 = arith.addf %404, %403 : vector<2x64xf32>
    %406 = vector.extract_strided_slice %156 {offsets = [0, 1632], sizes = [2, 128], strides = [1, 1]} : vector<2x2048xbf16> to vector<2x128xbf16>
    %407 = vector.extract_strided_slice %157 {offsets = [128, 0], sizes = [128, 64], strides = [1, 1]} : vector<512x64xbf16> to vector<128x64xbf16>
    %cst_102 = arith.constant dense<0.000000e+00> : vector<2x64xf32>
    %408 = tpu.matmul %406, %407, %cst_102 {dimension_numbers = #tpu.dot_dimension_numbers<[1], [0], [0], [1], [0, 0, 1, 1], [], []>} : vector<2x128xbf16>, vector<128x64xbf16>, vector<2x64xf32> -> vector<2x64xf32>
    %409 = arith.addf %405, %408 : vector<2x64xf32>
    %410 = vector.extract_strided_slice %156 {offsets = [0, 1888], sizes = [2, 128], strides = [1, 1]} : vector<2x2048xbf16> to vector<2x128xbf16>
    %411 = vector.extract_strided_slice %157 {offsets = [256, 0], sizes = [128, 64], strides = [1, 1]} : vector<512x64xbf16> to vector<128x64xbf16>
    %cst_103 = arith.constant dense<0.000000e+00> : vector<2x64xf32>
    %412 = tpu.matmul %410, %411, %cst_103 {dimension_numbers = #tpu.dot_dimension_numbers<[1], [0], [0], [1], [0, 0, 1, 1], [], []>} : vector<2x128xbf16>, vector<128x64xbf16>, vector<2x64xf32> -> vector<2x64xf32>
    %413 = arith.addf %409, %412 : vector<2x64xf32>
    %cst_104 = arith.constant 0.000000e+00 : f32
    %414 = vector.broadcast %cst_104 : f32 to vector<2x64xf32>
    %415 = arith.maximumf %413, %414 : vector<2x64xf32>
    %416 = vector.extract_strided_slice %156 {offsets = [0, 1440], sizes = [2, 96], strides = [1, 1]} : vector<2x2048xbf16> to vector<2x96xbf16>
    %417 = vector.extract_strided_slice %157 {offsets = [0, 0], sizes = [96, 64], strides = [1, 1]} : vector<512x64xbf16> to vector<96x64xbf16>
    %cst_105 = arith.constant dense<0.000000e+00> : vector<2x64xf32>
    %418 = tpu.matmul %416, %417, %cst_105 {dimension_numbers = #tpu.dot_dimension_numbers<[1], [0], [0], [1], [0, 0, 1, 1], [], []>} : vector<2x96xbf16>, vector<96x64xbf16>, vector<2x64xf32> -> vector<2x64xf32>
    %419 = vector.broadcast %158 : vector<1x64xf32> to vector<2x64xf32>
    %420 = arith.addf %419, %418 : vector<2x64xf32>
    %421 = vector.extract_strided_slice %156 {offsets = [0, 1696], sizes = [2, 96], strides = [1, 1]} : vector<2x2048xbf16> to vector<2x96xbf16>
    %422 = vector.extract_strided_slice %157 {offsets = [128, 0], sizes = [96, 64], strides = [1, 1]} : vector<512x64xbf16> to vector<96x64xbf16>
    %cst_106 = arith.constant dense<0.000000e+00> : vector<2x64xf32>
    %423 = tpu.matmul %421, %422, %cst_106 {dimension_numbers = #tpu.dot_dimension_numbers<[1], [0], [0], [1], [0, 0, 1, 1], [], []>} : vector<2x96xbf16>, vector<96x64xbf16>, vector<2x64xf32> -> vector<2x64xf32>
    %424 = arith.addf %420, %423 : vector<2x64xf32>
    %425 = vector.extract_strided_slice %156 {offsets = [0, 1952], sizes = [2, 96], strides = [1, 1]} : vector<2x2048xbf16> to vector<2x96xbf16>
    %426 = vector.extract_strided_slice %157 {offsets = [256, 0], sizes = [96, 64], strides = [1, 1]} : vector<512x64xbf16> to vector<96x64xbf16>
    %cst_107 = arith.constant dense<0.000000e+00> : vector<2x64xf32>
    %427 = tpu.matmul %425, %426, %cst_107 {dimension_numbers = #tpu.dot_dimension_numbers<[1], [0], [0], [1], [0, 0, 1, 1], [], []>} : vector<2x96xbf16>, vector<96x64xbf16>, vector<2x64xf32> -> vector<2x64xf32>
    %428 = arith.addf %424, %427 : vector<2x64xf32>
    %cst_108 = arith.constant 0.000000e+00 : f32
    %429 = vector.broadcast %cst_108 : f32 to vector<2x64xf32>
    %430 = arith.maximumf %428, %429 : vector<2x64xf32>
    %431 = arith.maximumf %173, %188 : vector<2x64xf32>
    %432 = arith.maximumf %431, %203 : vector<2x64xf32>
    %433 = arith.maximumf %432, %237 : vector<2x64xf32>
    %434 = arith.maximumf %433, %256 : vector<2x64xf32>
    %435 = arith.maximumf %434, %275 : vector<2x64xf32>
    %436 = arith.maximumf %435, %313 : vector<2x64xf32>
    %437 = arith.maximumf %436, %332 : vector<2x64xf32>
    %438 = arith.maximumf %437, %351 : vector<2x64xf32>
    %439 = arith.maximumf %188, %203 : vector<2x64xf32>
    %440 = arith.maximumf %439, %218 : vector<2x64xf32>
    %441 = arith.maximumf %440, %256 : vector<2x64xf32>
    %442 = arith.maximumf %441, %275 : vector<2x64xf32>
    %443 = arith.maximumf %442, %294 : vector<2x64xf32>
    %444 = arith.maximumf %443, %332 : vector<2x64xf32>
    %445 = arith.maximumf %444, %351 : vector<2x64xf32>
    %446 = arith.maximumf %445, %370 : vector<2x64xf32>
    %447 = arith.maximumf %237, %256 : vector<2x64xf32>
    %448 = arith.maximumf %447, %275 : vector<2x64xf32>
    %449 = arith.maximumf %448, %313 : vector<2x64xf32>
    %450 = arith.maximumf %449, %332 : vector<2x64xf32>
    %451 = arith.maximumf %450, %351 : vector<2x64xf32>
    %452 = arith.maximumf %451, %385 : vector<2x64xf32>
    %453 = arith.maximumf %452, %400 : vector<2x64xf32>
    %454 = arith.maximumf %453, %415 : vector<2x64xf32>
    %455 = arith.maximumf %256, %275 : vector<2x64xf32>
    %456 = arith.maximumf %455, %294 : vector<2x64xf32>
    %457 = arith.maximumf %456, %332 : vector<2x64xf32>
    %458 = arith.maximumf %457, %351 : vector<2x64xf32>
    %459 = arith.maximumf %458, %370 : vector<2x64xf32>
    %460 = arith.maximumf %459, %400 : vector<2x64xf32>
    %461 = arith.maximumf %460, %415 : vector<2x64xf32>
    %462 = arith.maximumf %461, %430 : vector<2x64xf32>
    %463 = tpu.concatenate %438, %446, %454, %462 in 1 : vector<2x64xf32>, vector<2x64xf32>, vector<2x64xf32>, vector<2x64xf32> -> vector<2x256xf32>
    %c0_109 = arith.constant 0 : index
    %c0_110 = arith.constant 0 : index
    %464 = vector.load %arg10[%c0_109, %c0_110] : memref<256x4xf32, #tpu.memory_space<vmem>>, vector<256x4xf32>
    %cst_111 = arith.constant dense<0.000000e+00> : vector<2x4xf32>
    %465 = tpu.matmul %463, %464, %cst_111 {dimension_numbers = #tpu.dot_dimension_numbers<[1], [0], [0], [1], [0, 0, 1, 1], [], []>} : vector<2x256xf32>, vector<256x4xf32>, vector<2x4xf32> -> vector<2x4xf32>
    %c0_112 = arith.constant 0 : index
    %c0_113 = arith.constant 0 : index
    %466 = vector.load %arg11[%c0_112, %c0_113] : memref<1x4xf32, #tpu.memory_space<vmem>>, vector<1x4xf32>
    %467 = vector.broadcast %466 : vector<1x4xf32> to vector<2x4xf32>
    %468 = arith.addf %465, %467 : vector<2x4xf32>
    %469 = arith.negf %468 : vector<2x4xf32>
    %470 = math.exp %469 : vector<2x4xf32>
    %cst_114 = arith.constant 1.000000e+00 : f32
    %471 = vector.broadcast %cst_114 : f32 to vector<2x4xf32>
    %472 = arith.addf %471, %470 : vector<2x4xf32>
    %473 = arith.divf %471, %472 : vector<2x4xf32>
    %c0_115 = arith.constant 0 : index
    %c0_116 = arith.constant 0 : index
    %474 = vector.load %arg12[%c0_115, %c0_116] : memref<2x4xf32, #tpu.memory_space<vmem>>, vector<2x4xf32>
    tpu.vector_store %arg12[%c0_115, %c0_116], %473 {strides = array<i32>} : memref<2x4xf32, #tpu.memory_space<vmem>>, vector<2x4xf32>,
    return
  }
}

</mosaic_0001>

<bundles_post_ra>
// kernel: cnn_with_lstm_forward.1
= control target key start
LH: loop header
LB: loop body
LE: loop exit
PB: predicated region body
PF: predicated region fallthrough
CT: control target
= control target key end

     0   :  { %17 = vsyncpa [#allocation3], 0  ;;  %s9183_s0 = inlined_call_operand.vmem [shape: f32[2,30,8], index: 0, kind: input, shape index: {}]   ;;  %s9184_s1 = inlined_call_operand.vmem [shape: bf16[8,128], index: 1, kind: input, shape index: {}]   ;;  %s9185_s2 = inlined_call_operand.vmem [shape: bf16[32,128], index: 2, kind: input, shape index: {}]   ;;  %s9186_s3 = inlined_call_operand.vmem [shape: f32[1,128], index: 3, kind: input, shape index: {}]   ;;  %s9187_s4 = inlined_call_operand.hbm [shape: bf16[960,256], index: 4, kind: input, shape index: {}]   ;;  %s9188_s5 = inlined_call_operand.vmem [shape: f32[1,256], index: 5, kind: input, shape index: {}]   ;;  %s9189_s6 = inlined_call_operand.hbm [shape: bf16[256,2048], index: 6, kind: input, shape index: {}]   ;;  %s9190_s7 = inlined_call_operand.vmem [shape: f32[1,2048], index: 7, kind: input, shape index: {}]   ;;  %s9191_s8 = inlined_call_operand.vmem [shape: bf16[512,64], index: 8, kind: input, shape index: {}]   ;;  %s9192_s9 = inlined_call_operand.vmem [shape: f32[1,64], index: 9, kind: input, shape index: {}]   ;;  %s9193_s10 = inlined_call_operand.vmem [shape: f32[256,4], index: 10, kind: input, shape index: {}]   ;;  %s9194_s11 = inlined_call_operand.vmem [shape: f32[1,4], index: 11, kind: input, shape index: {}]   ;;  %s9195_s12 = inlined_call_operand.hbm [shape: f32[2,4], index: 12, kind: output, shape index: {}]  }
   0x1   :  { %18 = vsyncpa [#allocation6], 0 }
   0x2   :  { %19 = vsyncpa [#allocation4], 0  ;;  %s32_s23 = sshll.u32 %s9187_s4, 4  ;;  %s7580_s24 = smov [#allocation2]   ;;  %s33_s23 = int_to_ptr.hbm [resolvable:$true] %s32_s23 }
   0x3   :  { %s34_s25 = sshll.u32 %s7580_s24, 4  ;;  %s47_s28 = sshll.u32 %s9189_s6, 4  ;;  %s35_s25 = int_to_ptr.vmem [resolvable:$true] %s34_s25  ;;  %s48_s28 = int_to_ptr.hbm [resolvable:$true] %s47_s28 }
   0x4   :  { %s7581_s29 = smov 128   ;;  %s7582_s30 = smov 8  }
   0x5   :  { %40 = dma.hbm_to_vmem [thread:$0]  %s33_s23, 15360, %s35_s25, [#allocation3], %s7581_s29, %s7581_s29, %s7582_s30  }
   0x6   :  { %s7583_s13 = smov [#allocation5]   ;;  %s7584_s15 = smov 1024  }
   0x7   :  { %s49_s14 = sshll.u32 %s7583_s13, 4  ;;  %s7585_s16 = smov 64   ;;  %s50_s14 = int_to_ptr.vmem [resolvable:$true] %s49_s14 }
   0x8   :  { %55 = dma.hbm_to_vmem [thread:$0]  %s48_s28, 32768, %s50_s14, [#allocation6], %s7584_s15, %s7584_s15, %s7585_s16  }
   0x9   :  { %7574 = dma.done.wait [#allocation3], 15360  }
   0xa   :  { %7575 = vsyncadd [#allocation3], 4294951936 }
   0xb   :  { %7576 = dma.done.wait [#allocation6], 32768  }
   0xc   :  { %7577 = vsyncadd [#allocation6], 4294934528  ;;  %vm97_vm0 = vcmask 1043456   ;;  %v75_v0 = vld [vmem:[%s9184_s1] sm:$0xf]  ;;  %v6869_v1 = vld [vmem:[%s9185_s2 + $0x8] sm:$0xff] }
   0xd   :  { %v81_v2 = vld [vmem:[%s9183_s0] sm:$0xff]  ;;  %v99_v3 = vsel %vm97_vm0, %v75_v0, 0  ;;  %v82_v4 = vld [vmem:[%s9183_s0 + $0x8] sm:$0xff]  ;;  %174 = vmatpush.bf16.msra.mxu2 %v6869_v1  ;;  %vm90_vm1 = vcmask 64512   ;;  %489 = vmatpush.bf16.msra.mxu3 %v6869_v1  ;;  %v7586_v7 = vmov 0   ;;  %v83_v8 = vld [vmem:[%s9183_s0 + $0x10] sm:$0xff] }
   0xe   :  { %108 = vmatpush.bf16.msra.mxu0 %v99_v3  ;;  %v85_v5 = vpack.c.bf16 %v82_v4, %v81_v2  ;;  %v6868_v6 = vld [vmem:[%s9185_s2] sm:$0xff]  ;;  %140 = vmatpush.bf16.msra.mxu1 %v99_v3  ;;  %v84_v9 = vld [vmem:[%s9183_s0 + $0x18] sm:$0x3f]  ;;  %s5168_s25 = sshll.u32 %s9195_s12, 4  ;;  %s5169_s25 = int_to_ptr.hbm [resolvable:$true] %s5168_s25 }
   0xf   :  { %v86_v10 = vpack.c.bf16 %v84_v9, %v83_v8  ;;  %v7688_v12 = vld [vmem:[%s9186_s3] ss:$0 sm:$0xff]  ;;  %s7587_s3 = smov 32  }
  0x11   :  { %5179 = vmatmul.msk.bf16.vlgmr.msra.gmra.mxu0 %vm90_vm1, %v85_v5  ;;  %175 = vmatpush.bf16.msra.mxu2 %v6868_v6 }
  0x12   :  { %490 = vmatpush.bf16.msra.mxu3 %v6868_v6 }
  0x14   :  { %176 = vmatmul.bf16.vlgmr.msra.gmra.mxu2 %v7586_v7 }
  0x21   :  { %5180 = vmatmul.msk.bf16.gmra.mxu0 %vm90_vm1, %v86_v10 }
  0x24   :  { %181 = vmatmul.bf16.gmra.mxu2 %v7586_v7 }
  0x8e   :  { %v110_v11 = vpop.f32.mrf.mxu0 }
  0x8f   :  { %v111_v13 = vadd.f32 %v7688_v12, %v110_v11 }
  0x96   :  { %v112_v16 = vpop.f32.mrf.mxu0 }
  0x97   :  { %v177_v14 = vpop.f32.mrf.mxu2  ;;  %v113_v17 = vadd.f32 %v7688_v12, %v112_v16 }
  0x98   :  { %v187_v15 = vadd.f32 %v177_v14, %v111_v13 }
  0x9a   :  { %7411 = vtanh.f32 %v187_v15  ;;  %v5195_v32 = vmul.f32 -1.442695, %v187_v15 }
  0x9e   :  { %v115_v21 = vpop.f32.mrf.mxu0 }
  0x9f   :  { %v179_v18 = vpop.f32.mrf.mxu2  ;;  %v116_v22 = vadd.f32 %v7688_v12, %v115_v21 }
  0xa0   :  { %v7412_v19 = vpop.eup %7411  ;;  %v188_v20 = vadd.f32 %v179_v18, %v113_v17 }
  0xa1   :  { %279 = vrot.lane.b32.xlu0 %v7412_v19, %s7585_s16 }
  0xa2   :  { %7413 = vtanh.f32 %v188_v20  ;;  %v5196_v33 = vmul.f32 -1.442695, %v188_v20 }
  0xa6   :  { %v117_v26 = vpop.f32.mrf.mxu0 }
  0xa7   :  { %v182_v23 = vpop.f32.mrf.mxu2  ;;  %v118_v27 = vadd.f32 %v7688_v12, %v117_v26 }
  0xa8   :  { %v7414_v24 = vpop.eup %7413  ;;  %v189_v25 = vadd.f32 %v182_v23, %v116_v22 }
  0xa9   :  { %281 = vrot.lane.b32.xlu0 %v7414_v24, %s7585_s16 }
  0xaa   :  { %7415 = vtanh.f32 %v189_v25  ;;  %v5197_v36 = vmul.f32 -1.442695, %v189_v25 }
  0xaf   :  { %v184_v28 = vpop.f32.mrf.mxu2 }
  0xb0   :  { %v7416_v29 = vpop.eup %7415  ;;  %v190_v30 = vadd.f32 %v184_v28, %v118_v27 }
  0xb1   :  { %283 = vrot.lane.b32.xlu1 %v7416_v29, %s7585_s16 }
  0xb2   :  { %7417 = vtanh.f32 %v190_v30  ;;  %v5198_v40 = vmul.f32 -1.442695, %v190_v30 }
  0xb3   :  { %7419 = vpow2.f32 %v5195_v32 }
  0xb4   :  { %7421 = vpow2.f32 %v5196_v33 }
  0xb8   :  { %v7418_v31 = vpop.eup %7417 }
  0xb9   :  { %285 = vrot.lane.b32.xlu1 %v7418_v31, %s7585_s16  ;;  %v7420_v34 = vpop.eup %7419 }
  0xba   :  { %v203_v35 = vadd.f32 1.0, %v7420_v34  ;;  %v7422_v37 = vpop.eup %7421 }
  0xbb   :  { %v204_v38 = vadd.f32 1.0, %v7422_v37 }
  0xbc   :  { %7423 = vrcp.f32 %v203_v35  ;;  %v218_v53 = vand.u32 2147483648, %v203_v35  ;;  %vm212_vm3 = vweird.f32 %v203_v35  ;;  %v216_v54 = vand.u32 2147483647, %v203_v35 }
  0xbd   :  { %7425 = vpow2.f32 %v5197_v36  ;;  %v233_v1 = vand.u32 2147483648, %v204_v38  ;;  %vm227_vm7 = vweird.f32 %v204_v38  ;;  %v231_v2 = vand.u32 2147483647, %v204_v38 }
  0xbe   :  { %7427 = vrcp.f32 %v204_v38  ;;  %v219_v58 = vor.u32 1.1754944e-38, %v218_v53  ;;  %vm217_vm5 = vcmp.eq.f32.partialorder %v216_v54, 8.507059e+37 }
  0xbf   :  { %7429 = vpow2.f32 %v5198_v40  ;;  %v234_v6 = vor.u32 1.1754944e-38, %v233_v1  ;;  %vm232_vm9 = vcmp.eq.f32.partialorder %v231_v2, 8.507059e+37 }
  0xc2   :  { %v7424_v39 = vpop.eup %7423 }
  0xc3   :  { %v7426_v41 = vpop.eup %7425  ;;  %v208_v42 = vmul.f32 %v7424_v39, %v203_v35  ;;  %vm213_vm2 = vweird.f32 %v7424_v39 }
  0xc4   :  { %v205_v43 = vadd.f32 1.0, %v7426_v41  ;;  %v7428_v45 = vpop.eup %7427  ;;  %vm214_vm4 = vmor %vm212_vm3, %vm213_vm2  ;;  %vm164_vm3 = vcmask 261120  }
  0xc5   :  { %v209_v44 = vsub.f32 1.0, %v208_v42  ;;  %v7430_v46 = vpop.eup %7429  ;;  %v223_v48 = vmul.f32 %v7428_v45, %v204_v38  ;;  %vm228_vm6 = vweird.f32 %v7428_v45 }
  0xc6   :  { %7431 = vrcp.f32 %v205_v43  ;;  %v206_v49 = vadd.f32 1.0, %v7430_v46  ;;  %vm229_vm8 = vmor %vm227_vm7, %vm228_vm6  ;;  %v248_v13 = vand.u32 2147483648, %v205_v43  ;;  %vm242_vm11 = vweird.f32 %v205_v43 }
  0xc7   :  { %v210_v47 = vmul.f32 %v7424_v39, %v209_v44  ;;  %v224_v51 = vsub.f32 1.0, %v223_v48  ;;  %v246_v14 = vand.u32 2147483647, %v205_v43 }
  0xc8   :  { %7433 = vrcp.f32 %v206_v49  ;;  %v249_v17 = vor.u32 1.1754944e-38, %v248_v13  ;;  %v263_v22 = vand.u32 2147483648, %v206_v49  ;;  %vm257_vm15 = vweird.f32 %v206_v49 }
  0xc9   :  { %v211_v50 = vadd.f32 %v7424_v39, %v210_v47  ;;  %v225_v56 = vmul.f32 %v7428_v45, %v224_v51  ;;  %vm247_vm13 = vcmp.eq.f32.partialorder %v246_v14, 8.507059e+37  ;;  %v261_v23 = vand.u32 2147483647, %v206_v49  ;;  %v5182_v51 = vld [vmem:[%s9183_s0 + $0x28] sm:$0xff] }
  0xca   :  { %v264_v25 = vor.u32 1.1754944e-38, %v263_v22 }
  0xcb   :  { %v215_v55 = vsel %vm214_vm4, %v7424_v39, %v211_v50  ;;  %v226_v62 = vadd.f32 %v7428_v45, %v225_v56  ;;  %vm262_vm2 = vcmp.eq.f32.partialorder %v261_v23, 8.507059e+37  ;;  %v5181_v50 = vld [vmem:[%s9183_s0 + $0x20] sm:$0xff] }
  0xcc   :  { %v7432_v52 = vpop.eup %7431  ;;  %v7698_v60 = vsel %vm217_vm5, %v219_v58, %v215_v55  ;;  %v5183_v58 = vld [vmem:[%s9183_s0 + $0x30] sm:$0xff] }
  0xcd   :  { %v238_v57 = vmul.f32 %v7432_v52, %v205_v43  ;;  %v230_v3 = vsel %vm229_vm8, %v7428_v45, %v226_v62  ;;  %vm243_vm10 = vweird.f32 %v7432_v52  ;;  %v271_v29 = vmul.f32 0.0, %v7698_v60 }
  0xce   :  { %v7434_v0 = vpop.eup %7433  ;;  %v235_v7 = vsel %vm232_vm9, %v234_v6, %v230_v3  ;;  %vm244_vm12 = vmor %vm242_vm11, %vm243_vm10 }
  0xcf   :  { %v239_v63 = vsub.f32 1.0, %v238_v57  ;;  %v253_v5 = vmul.f32 %v7434_v0, %v206_v49  ;;  %vm258_vm14 = vweird.f32 %v7434_v0  ;;  %v272_v32 = vmul.f32 0.0, %v235_v7 }
  0xd0   :  { %vm259_vm0 = vmor %vm257_vm15, %vm258_vm14 }
  0xd1   :  { %v240_v4 = vmul.f32 %v7432_v52, %v239_v63  ;;  %v254_v11 = vsub.f32 1.0, %v253_v5 }
  0xd3   :  { %v241_v10 = vadd.f32 %v7432_v52, %v240_v4  ;;  %v255_v16 = vmul.f32 %v7434_v0, %v254_v11 }
  0xd5   :  { %v245_v15 = vsel %vm244_vm12, %v7432_v52, %v241_v10  ;;  %v256_v21 = vadd.f32 %v7434_v0, %v255_v16  ;;  %v125_v52 = vpack.c.bf16 %v5182_v51, %v5181_v50 }
  0xd6   :  { %v250_v19 = vsel %vm247_vm13, %v249_v17, %v245_v15 }
  0xd7   :  { %v260_v24 = vsel %vm259_vm0, %v7434_v0, %v256_v21  ;;  %v273_v37 = vmul.f32 0.0, %v250_v19  ;;  %5185 = vmatmul.msk.bf16.vlgmr.msra.gmra.mxu1 %vm90_vm1, %v125_v52 }
  0xd8   :  { %v265_v26 = vsel %vm262_vm2, %v264_v25, %v260_v24 }
  0xd9   :  { %v274_v40 = vmul.f32 0.0, %v265_v26 }
 0x113   :  { %v280_v59 = vpop.permute.xlu0 %279 }
 0x114   :  { %v291_v61 = vmul.f32 %v280_v59, %v7698_v60  ;;  %v5184_v59 = vld [vmem:[%s9183_s0 + $0x38] sm:$0x3f]  ;;  %s7588_s0 = smov 96  }
 0x116   :  { %299 = vrot.lane.b32.xlu2 %v291_v61, %s7587_s3 }
 0x11b   :  { %v282_v8 = vpop.permute.xlu0 %281 }
 0x11c   :  { %v292_v9 = vmul.f32 %v282_v8, %v235_v7 }
 0x11e   :  { %301 = vrot.lane.b32.xlu2 %v292_v9, %s7587_s3 }
 0x123   :  { %v284_v18 = vpop.permute.xlu1 %283 }
 0x124   :  { %v293_v20 = vmul.f32 %v284_v18, %v250_v19 }
 0x126   :  { %303 = vrot.lane.b32.xlu0 %v293_v20, %s7587_s3 }
 0x12b   :  { %v286_v27 = vpop.permute.xlu1 %285 }
 0x12c   :  { %v294_v28 = vmul.f32 %v286_v27, %v265_v26 }
 0x12e   :  { %305 = vrot.lane.b32.xlu1 %v294_v28, %s7587_s3 }
 0x154   :  { %v142_v63 = vpop.f32.mrf.mxu1 }
 0x155   :  { %v143_v0 = vadd.f32 %v7688_v12, %v142_v63 }
 0x15c   :  { %v144_v3 = vpop.f32.mrf.mxu1 }
 0x15d   :  { %v145_v4 = vadd.f32 %v7688_v12, %v144_v3 }
 0x170   :  { %v300_v30 = vpop.permute.xlu2 %299 }
 0x171   :  { %v7706_v31 = vadd.f32 %v300_v30, %v271_v29 }
 0x173   :  { %7435 = vtanh.f32 %v7706_v31 }
 0x178   :  { %v302_v33 = vpop.permute.xlu2 %301 }
 0x179   :  { %v7436_v34 = vpop.eup %7435  ;;  %v7709_v35 = vadd.f32 %v302_v33, %v272_v32 }
 0x17a   :  { %323 = vrot.lane.b32.xlu2 %v7436_v34, %s7585_s16 }
 0x17b   :  { %7437 = vtanh.f32 %v7709_v35 }
 0x181   :  { %v7438_v36 = vpop.eup %7437 }
 0x182   :  { %325 = vrot.lane.b32.xlu0 %v7438_v36, %s7585_s16 }
 0x198   :  { %v304_v38 = vpop.permute.xlu0 %303 }
 0x199   :  { %v7714_v39 = vadd.f32 %v304_v38, %v273_v37 }
 0x19b   :  { %7439 = vtanh.f32 %v7714_v39 }
 0x1a0   :  { %v306_v41 = vpop.permute.xlu1 %305 }
 0x1a1   :  { %v7440_v42 = vpop.eup %7439  ;;  %v7717_v43 = vadd.f32 %v306_v41, %v274_v40 }
 0x1a2   :  { %327 = vrot.lane.b32.xlu1 %v7440_v42, %s7585_s16 }
 0x1a3   :  { %7441 = vtanh.f32 %v7717_v43 }
 0x1a9   :  { %v7442_v44 = vpop.eup %7441 }
 0x1aa   :  { %329 = vrot.lane.b32.xlu2 %v7442_v44, %s7585_s16 }
 0x1d4   :  { %v324_v45 = vpop.permute.xlu2 %323 }
 0x1d5   :  { %v7723_v47 = vmul.f32 %v324_v45, %v7698_v60  ;;  %v126_v60 = vpack.c.bf16 %v5184_v59, %v5183_v58 }
 0x1d7   :  { %5186 = vmatmul.msk.bf16.gmra.mxu1 %vm90_vm1, %v126_v60 }
 0x1f4   :  { %v326_v46 = vpop.permute.xlu0 %325 }
 0x1f5   :  { %v7725_v48 = vmul.f32 %v326_v46, %v235_v7 }
 0x1f7   :  { %v469_v49 = vpack.c.bf16 %v7725_v48, %v7723_v47 }
 0x1f9   :  { %473 = vrot.lane.b32.xlu0 %v469_v49, %s7587_s3 }
 0x204   :  { %v330_v53 = vpop.permute.xlu2 %329 }
 0x205   :  { %v7737_v55 = vmul.f32 %v330_v53, %v265_v26 }
 0x214   :  { %v328_v54 = vpop.permute.xlu1 %327 }
 0x215   :  { %v7739_v56 = vmul.f32 %v328_v54, %v250_v19 }
 0x217   :  { %v470_v57 = vpack.c.bf16 %v7737_v55, %v7739_v56 }
 0x219   :  { %475 = vrot.lane.b32.xlu1 %v470_v57, %s7587_s3 }
 0x254   :  { %v147_v9 = vpop.f32.mrf.mxu1 }
 0x255   :  { %v148_v10 = vadd.f32 %v7688_v12, %v147_v9 }
 0x25c   :  { %v149_v14 = vpop.f32.mrf.mxu1 }
 0x25d   :  { %v150_v15 = vadd.f32 %v7688_v12, %v149_v14 }
 0x26b   :  { %v474_v61 = vpop.permute.xlu0 %473 }
 0x26c   :  { %5199 = vmatmul.msk.bf16.vlgmr.msra.gmra.mxu3 %vm164_vm3, %v474_v61 }
 0x28b   :  { %v476_v62 = vpop.permute.xlu1 %475 }
 0x28c   :  { %5200 = vmatmul.msk.bf16.gmra.mxu3 %vm164_vm3, %v476_v62 }
 0x2ef   :  { %v492_v1 = vpop.f32.mrf.mxu3 }
 0x2f0   :  { %v502_v2 = vadd.f32 %v492_v1, %v143_v0 }
 0x2f2   :  { %7443 = vtanh.f32 %v502_v2  ;;  %v5201_v20 = vmul.f32 -1.442695, %v502_v2 }
 0x2f7   :  { %v494_v5 = vpop.f32.mrf.mxu3 }
 0x2f8   :  { %v7444_v6 = vpop.eup %7443  ;;  %v503_v7 = vadd.f32 %v494_v5, %v145_v4 }
 0x2f9   :  { %594 = vrot.lane.b32.xlu2 %v7444_v6, %s7585_s16 }
 0x2fa   :  { %7445 = vtanh.f32 %v503_v7  ;;  %v5202_v26 = vmul.f32 -1.442695, %v503_v7 }
 0x300   :  { %v7446_v8 = vpop.eup %7445 }
 0x301   :  { %596 = vrot.lane.b32.xlu0 %v7446_v8, %s7585_s16 }
 0x30f   :  { %v497_v11 = vpop.f32.mrf.mxu3 }
 0x310   :  { %v504_v13 = vadd.f32 %v497_v11, %v148_v10 }
 0x312   :  { %7447 = vtanh.f32 %v504_v13  ;;  %v5203_v45 = vmul.f32 -1.442695, %v504_v13 }
 0x317   :  { %v499_v16 = vpop.f32.mrf.mxu3 }
 0x318   :  { %v7448_v17 = vpop.eup %7447  ;;  %v505_v18 = vadd.f32 %v499_v16, %v150_v15 }
 0x319   :  { %598 = vrot.lane.b32.xlu1 %v7448_v17, %s7585_s16 }
 0x31a   :  { %7449 = vtanh.f32 %v505_v18  ;;  %v5204_v29 = vmul.f32 -1.442695, %v505_v18 }
 0x31b   :  { %7451 = vpow2.f32 %v5201_v20 }
 0x320   :  { %v7450_v19 = vpop.eup %7449 }
 0x321   :  { %600 = vrot.lane.b32.xlu2 %v7450_v19, %s7585_s16  ;;  %v7452_v21 = vpop.eup %7451 }
 0x322   :  { %v518_v22 = vadd.f32 1.0, %v7452_v21 }
 0x324   :  { %7453 = vrcp.f32 %v518_v22  ;;  %v533_v28 = vand.u32 2147483648, %v518_v22  ;;  %vm527_vm4 = vweird.f32 %v518_v22  ;;  %v531_v30 = vand.u32 2147483647, %v518_v22 }
 0x325   :  { %7455 = vpow2.f32 %v5202_v26 }
 0x326   :  { %v534_v34 = vor.u32 1.1754944e-38, %v533_v28  ;;  %7457 = vpow2.f32 %v5204_v29  ;;  %vm532_vm6 = vcmp.eq.f32.partialorder %v531_v30, 8.507059e+37 }
 0x32a   :  { %v7454_v23 = vpop.eup %7453 }
 0x32b   :  { %v523_v24 = vmul.f32 %v7454_v23, %v518_v22  ;;  %vm528_vm1 = vweird.f32 %v7454_v23  ;;  %v7456_v32 = vpop.eup %7455 }
 0x32c   :  { %vm529_vm5 = vmor %vm527_vm4, %vm528_vm1  ;;  %v519_v36 = vadd.f32 1.0, %v7456_v32  ;;  %v7458_v41 = vpop.eup %7457  ;;  %vm396_vm4 = vcmask 523264  }
 0x32d   :  { %v524_v25 = vsub.f32 1.0, %v523_v24  ;;  %v521_v42 = vadd.f32 1.0, %v7458_v41 }
 0x32e   :  { %7459 = vrcp.f32 %v519_v36  ;;  %v548_v59 = vand.u32 2147483648, %v519_v36  ;;  %vm542_vm8 = vweird.f32 %v519_v36  ;;  %v546_v60 = vand.u32 2147483647, %v519_v36 }
 0x32f   :  { %v525_v27 = vmul.f32 %v7454_v23, %v524_v25  ;;  %7461 = vrcp.f32 %v521_v42  ;;  %v578_v5 = vand.u32 2147483648, %v521_v42  ;;  %vm572_vm12 = vweird.f32 %v521_v42 }
 0x330   :  { %7463 = vpow2.f32 %v5203_v45  ;;  %v549_v63 = vor.u32 1.1754944e-38, %v548_v59  ;;  %vm547_vm10 = vcmp.eq.f32.partialorder %v546_v60, 8.507059e+37  ;;  %v576_v6 = vand.u32 2147483647, %v521_v42 }
 0x331   :  { %v526_v12 = vadd.f32 %v7454_v23, %v525_v27  ;;  %v579_v9 = vor.u32 1.1754944e-38, %v578_v5  ;;  %v343_v45 = vrot.slane %v7723_v47, 1  ;;  %v357_v59 = vrot.slane %v7723_v47, 5 }
 0x332   :  { %vm577_vm14 = vcmp.eq.f32.partialorder %v576_v6, 8.507059e+37 }
 0x333   :  { %v530_v33 = vsel %vm529_vm5, %v7454_v23, %v526_v12  ;;  %vm398_vm5 = vcmask 785408  }
 0x334   :  { %v7761_v37 = vsel %vm532_vm6, %v534_v34, %v530_v33  ;;  %v7460_v44 = vpop.eup %7459  ;;  %vm806_vm6 = vcmask 1040384  }
 0x335   :  { %v538_v46 = vmul.f32 %v7460_v44, %v519_v36  ;;  %v7462_v50 = vpop.eup %7461  ;;  %vm543_vm7 = vweird.f32 %v7460_v44  ;;  %v586_v24 = vmul.f32 %v7761_v37, %v7706_v31 }
 0x336   :  { %v7464_v51 = vpop.eup %7463  ;;  %v568_v53 = vmul.f32 %v7462_v50, %v521_v42  ;;  %vm544_vm9 = vmor %vm542_vm8, %vm543_vm7  ;;  %vm573_vm11 = vweird.f32 %v7462_v50  ;;  %v347_v42 = vrot.slane %v7723_v47, 2 }
 0x337   :  { %v539_v49 = vsub.f32 1.0, %v538_v46  ;;  %v520_v54 = vadd.f32 1.0, %v7464_v51  ;;  %vm574_vm13 = vmor %vm572_vm12, %vm573_vm11  ;;  %v353_v51 = vrot.slane %v7723_v47, 4 }
 0x338   :  { %v569_v58 = vsub.f32 1.0, %v568_v53 }
 0x339   :  { %v540_v52 = vmul.f32 %v7460_v44, %v539_v49  ;;  %7465 = vrcp.f32 %v520_v54  ;;  %v563_v17 = vand.u32 2147483648, %v520_v54  ;;  %vm557_vm0 = vweird.f32 %v520_v54 }
 0x33a   :  { %v570_v62 = vmul.f32 %v7462_v50, %v569_v58  ;;  %v561_v18 = vand.u32 2147483647, %v520_v54  ;;  %v361_v58 = vrot.slane %v7723_v47, 6 }
 0x33b   :  { %v541_v57 = vadd.f32 %v7460_v44, %v540_v52  ;;  %v564_v20 = vor.u32 1.1754944e-38, %v563_v17 }
 0x33c   :  { %v571_v3 = vadd.f32 %v7462_v50, %v570_v62  ;;  %vm562_vm1 = vcmp.eq.f32.partialorder %v561_v18, 8.507059e+37 }
 0x33d   :  { %v545_v61 = vsel %vm544_vm9, %v7460_v44, %v541_v57  ;;  %vm5159_vm9 = vcmask 25600  }
 0x33e   :  { %v7765_v1 = vsel %vm547_vm10, %v549_v63, %v545_v61  ;;  %v575_v7 = vsel %vm574_vm13, %v7462_v50, %v571_v3  ;;  %v389_v3 = vrot.slane %v7725_v48, 6 }
 0x33f   :  { %v7466_v4 = vpop.eup %7465  ;;  %v7769_v10 = vsel %vm577_vm14, %v579_v9, %v575_v7  ;;  %v587_v12 = vmul.f32 %v7765_v1, %v7709_v35  ;;  %v381_v7 = vrot.slane %v7725_v48, 4 }
 0x340   :  { %v553_v8 = vmul.f32 %v7466_v4, %v520_v54  ;;  %vm558_vm15 = vweird.f32 %v7466_v4  ;;  %v589_v31 = vmul.f32 %v7769_v10, %v7717_v43 }
 0x341   :  { %vm559_vm2 = vmor %vm557_vm0, %vm558_vm15 }
 0x342   :  { %v554_v14 = vsub.f32 1.0, %v553_v8 }
 0x344   :  { %v555_v15 = vmul.f32 %v7466_v4, %v554_v14  ;;  %v5263_v14 = vld [vmem:[#allocation2 + $0x70] sm:$0xf] }
 0x346   :  { %v556_v16 = vadd.f32 %v7466_v4, %v555_v15  ;;  %v6885_v15 = vld [vmem:[#allocation2 + $0x74] sm:$0xf0] }
 0x347   :  { %v5264_v18 = vor.u32 %v6885_v15, %v5263_v14  ;;  %v6899_v14 = vld [vmem:[#allocation2 + $0xe4] sm:$0xf0]  ;;  %v5215_v15 = vld [vmem:[#allocation2 + $0x10] sm:$0xf] }
 0x348   :  { %v560_v19 = vsel %vm559_vm2, %v7466_v4, %v556_v16  ;;  %v5255_v16 = vld [vmem:[#allocation2 + $0x60] sm:$0xf] }
 0x349   :  { %v7773_v22 = vsel %vm562_vm1, %v564_v20, %v560_v19  ;;  %v6883_v19 = vld [vmem:[#allocation2 + $0x64] sm:$0xf0]  ;;  %1552 = vmatpush.bf16.msrb.mxu0 %v5264_v18  ;;  %v5311_v18 = vld [vmem:[#allocation2 + $0xd0] sm:$0xf] }
 0x34a   :  { %v588_v28 = vmul.f32 %v7773_v22, %v7714_v39 }
 0x353   :  { %v595_v38 = vpop.permute.xlu2 %594 }
 0x354   :  { %v606_v40 = vmul.f32 %v595_v38, %v7761_v37 }
 0x356   :  { %614 = vrot.lane.b32.xlu0 %v606_v40, %s7587_s3 }
 0x373   :  { %v597_v0 = vpop.permute.xlu0 %596 }
 0x374   :  { %v607_v2 = vmul.f32 %v597_v0, %v7765_v1 }
 0x376   :  { %616 = vrot.lane.b32.xlu1 %v607_v2, %s7587_s3 }
 0x37b   :  { %v601_v11 = vpop.permute.xlu2 %600 }
 0x37c   :  { %v609_v13 = vmul.f32 %v601_v11, %v7769_v10  ;;  %v371_v11 = vrot.slane %v7725_v48, 1 }
 0x37e   :  { %620 = vrot.lane.b32.xlu0 %v609_v13, %s7587_s3 }
 0x38b   :  { %v599_v21 = vpop.permute.xlu1 %598 }
 0x38c   :  { %v608_v23 = vmul.f32 %v599_v21, %v7773_v22  ;;  %v417_v21 = vrot.slane %v7739_v56, 2 }
 0x38e   :  { %618 = vrot.lane.b32.xlu2 %v608_v23, %s7587_s3  ;;  %v413_v23 = vrot.slane %v7739_v56, 1 }
 0x3c8   :  { %v615_v25 = vpop.permute.xlu0 %614 }
 0x3c9   :  { %v626_v26 = vadd.f32 %v615_v25, %v586_v24  ;;  %v5256_v24 = vor.u32 %v6883_v19, %v5255_v16  ;;  %v5327_v25 = vld [vmem:[#allocation2 + $0xf0] sm:$0xf]  ;;  %v6873_v16 = vld [vmem:[#allocation2 + $0x14] sm:$0xf0] }
 0x3ca   :  { %v6897_v19 = vld [vmem:[#allocation2 + $0xd4] sm:$0xf0] }
 0x3cb   :  { %7467 = vtanh.f32 %v626_v26  ;;  %v6901_v26 = vld [vmem:[#allocation2 + $0xf4] sm:$0xf0]  ;;  %1553 = vmatpush.bf16.msrb.mxu0 %v5256_v24  ;;  %v5207_v24 = vld [vmem:[#allocation2] sm:$0xf] }
 0x3d1   :  { %v7468_v27 = vpop.eup %7467 }
 0x3d2   :  { %638 = vrot.lane.b32.xlu1 %v7468_v27, %s7585_s16 }
 0x3e8   :  { %v617_v29 = vpop.permute.xlu1 %616  ;;  %v619_v30 = vpop.permute.xlu2 %618 }
 0x3e9   :  { %v627_v32 = vadd.f32 %v617_v29, %v587_v12  ;;  %v628_v33 = vadd.f32 %v619_v30, %v588_v28  ;;  %v5247_v29 = vld [vmem:[#allocation2 + $0x50] sm:$0xf]  ;;  %v6881_v30 = vld [vmem:[#allocation2 + $0x54] sm:$0xf0] }
 0x3eb   :  { %7469 = vtanh.f32 %v627_v32  ;;  %v5328_v32 = vor.u32 %v6901_v26, %v5327_v25  ;;  %v6871_v25 = vld [vmem:[#allocation2 + $0x4] sm:$0xf0]  ;;  %v5303_v26 = vld [vmem:[#allocation2 + $0xc0] sm:$0xf] }
 0x3ec   :  { %7471 = vtanh.f32 %v628_v33 }
 0x3ed   :  { %1565 = vmatpush.bf16.msrb.mxu1 %v5328_v32 }
 0x3f0   :  { %v621_v34 = vpop.permute.xlu0 %620 }
 0x3f1   :  { %v7470_v36 = vpop.eup %7469  ;;  %v629_v38 = vadd.f32 %v621_v34, %v589_v31  ;;  %v5248_v31 = vor.u32 %v6881_v30, %v5247_v29  ;;  %v6933_v29 = vld [vmem:[#allocation2 + $0x1f4] sm:$0xf0] }
 0x3f2   :  { %v7472_v40 = vpop.eup %7471  ;;  %640 = vrot.lane.b32.xlu2 %v7470_v36, %s7585_s16  ;;  %v5239_v36 = vld [vmem:[#allocation2 + $0x40] sm:$0xf] }
 0x3f3   :  { %7473 = vtanh.f32 %v629_v38  ;;  %642 = vrot.lane.b32.xlu0 %v7472_v40, %s7585_s16  ;;  %v6879_v38 = vld [vmem:[#allocation2 + $0x44] sm:$0xf0]  ;;  %1554 = vmatpush.bf16.msrb.mxu0 %v5248_v31  ;;  %v5295_v31 = vld [vmem:[#allocation2 + $0xb0] sm:$0xf] }
 0x3f9   :  { %v7474_v35 = vpop.eup %7473 }
 0x3fa   :  { %644 = vrot.lane.b32.xlu1 %v7474_v35, %s7585_s16  ;;  %v451_v35 = vrot.slane %v7737_v55, 4 }
 0x444   :  { %v639_v39 = vpop.permute.xlu1 %638 }
 0x445   :  { %v7790_v41 = vmul.f32 %v639_v39, %v7761_v37 }
 0x447   :  { %v7288_v43 = vpack.i.bf16 %v7723_v47, %v7790_v41  ;;  %v662_v44 = vrot.slane %v7790_v41, 2  ;;  %v658_v46 = vrot.slane %v7790_v41, 1  ;;  %v668_v37 = vrot.slane %v7790_v41, 4 }
 0x448   :  { %v676_v52 = vrot.slane %v7790_v41, 6  ;;  %v672_v53 = vrot.slane %v7790_v41, 5 }
 0x449   :  { %7289 = vrot.lane.b32.xlu2 %v7288_v43, %s7587_s3  ;;  %v7298_v49 = vpack.i.bf16 %v347_v42, %v662_v44  ;;  %v7293_v50 = vpack.i.bf16 %v343_v45, %v658_v46  ;;  %v7303_v57 = vpack.i.bf16 %v353_v51, %v668_v37  ;;  %v455_v43 = vrot.slane %v7737_v55, 5 }
 0x44a   :  { %v7313_v61 = vpack.i.bf16 %v361_v58, %v676_v52  ;;  %v7308_v62 = vpack.i.bf16 %v357_v59, %v672_v53  ;;  %v5240_v45 = vor.u32 %v6879_v38, %v5239_v36  ;;  %v375_v46 = vrot.slane %v7725_v48, 2  ;;  %v6893_v36 = vld [vmem:[#allocation2 + $0xb4] sm:$0xf0]  ;;  %v5447_v38 = vld [vmem:[#allocation2 + $0x1e0] sm:$0xf] }
 0x44b   :  { %7299 = vrot.lane.b32.xlu1 %v7298_v49, %s7588_s0  ;;  %7294 = vrot.lane.b32.xlu0 %v7293_v50, %s7585_s16  ;;  %v5231_v49 = vld [vmem:[#allocation2 + $0x30] sm:$0xf]  ;;  %v6877_v50 = vld [vmem:[#allocation2 + $0x34] sm:$0xf0]  ;;  %v427_v58 = vrot.slane %v7739_v56, 5  ;;  %v423_v59 = vrot.slane %v7739_v56, 4 }
 0x44c   :  { %v641_v54 = vpop.permute.xlu2 %640  ;;  %1555 = vmatpush.bf16.msrb.mxu0 %v5240_v45  ;;  %v5232_v52 = vor.u32 %v6877_v50, %v5231_v49  ;;  %v6891_v49 = vld [vmem:[#allocation2 + $0xa4] sm:$0xf0]  ;;  %v5439_v50 = vld [vmem:[#allocation2 + $0x1d0] sm:$0xf] }
 0x44d   :  { %v7808_v60 = vmul.f32 %v641_v54, %v7765_v1  ;;  %v385_v1 = vrot.slane %v7725_v48, 5 }
 0x44f   :  { %v704_v63 = vrot.slane %v7808_v60, 6  ;;  %v700_v0 = vrot.slane %v7808_v60, 5  ;;  %v7318_v2 = vpack.i.bf16 %v7725_v48, %v7808_v60  ;;  %v696_v6 = vrot.slane %v7808_v60, 4 }
 0x450   :  { %v686_v8 = vrot.slane %v7808_v60, 1  ;;  %v690_v39 = vrot.slane %v7808_v60, 2  ;;  %1556 = vmatpush.bf16.msrb.mxu0 %v5232_v52  ;;  %v6917_v52 = vld [vmem:[#allocation2 + $0x174] sm:$0xf0] }
 0x451   :  { %7304 = vrot.lane.b32.xlu2 %v7303_v57, %s7587_s3  ;;  %v7333_v4 = vpack.i.bf16 %v389_v3, %v704_v63  ;;  %v7328_v5 = vpack.i.bf16 %v385_v1, %v700_v0  ;;  %v7323_v9 = vpack.i.bf16 %v381_v7, %v696_v6  ;;  %v441_v1 = vrot.slane %v7737_v55, 1 }
 0x452   :  { %v7338_v13 = vpack.i.bf16 %v371_v11, %v686_v8  ;;  %v5223_v8 = vld [vmem:[#allocation2 + $0x20] sm:$0xf] }
 0x453   :  { %7314 = vrot.lane.b32.xlu1 %v7313_v61, %s7588_s0  ;;  %7309 = vrot.lane.b32.xlu0 %v7308_v62, %s7585_s16  ;;  %v431_v61 = vrot.slane %v7739_v56, 6  ;;  %v5319_v11 = vld [vmem:[#allocation2 + $0xe0] sm:$0xf] }
 0x459   :  { %7319 = vrot.lane.b32.xlu2 %v7318_v2, %s7587_s3 }
 0x45b   :  { %7334 = vrot.lane.b32.xlu1 %v7333_v4, %s7588_s0  ;;  %7329 = vrot.lane.b32.xlu0 %v7328_v5, %s7585_s16  ;;  %v445_v4 = vrot.slane %v7737_v55, 2 }
 0x461   :  { %7324 = vrot.lane.b32.xlu2 %v7323_v9, %s7587_s3  ;;  %v6875_v9 = vld [vmem:[#allocation2 + $0x24] sm:$0xf0] }
 0x463   :  { %7339 = vrot.lane.b32.xlu0 %v7338_v13, %s7585_s16  ;;  %v5224_v13 = vor.u32 %v6875_v9, %v5223_v8  ;;  %v5271_v9 = vld [vmem:[#allocation2 + $0x80] sm:$0xf] }
 0x465   :  { %v643_v17 = vpop.permute.xlu0 %642  ;;  %1557 = vmatpush.bf16.msrb.mxu0 %v5224_v13  ;;  %v5423_v13 = vld [vmem:[#allocation2 + $0x1b0] sm:$0xf] }
 0x466   :  { %v7829_v20 = vmul.f32 %v643_v17, %v7773_v22  ;;  %v5320_v17 = vor.u32 %v6899_v14, %v5319_v11  ;;  %v6887_v11 = vld [vmem:[#allocation2 + $0x84] sm:$0xf0] }
 0x467   :  { %v5272_v14 = vor.u32 %v6887_v11, %v5271_v9  ;;  %v6905_v9 = vld [vmem:[#allocation2 + $0x114] sm:$0xf0]  ;;  %v5551_v11 = vld [vmem:[#allocation2 + $0x2b0] sm:$0xf] }
 0x468   :  { %v7343_v27 = vpack.i.bf16 %v7739_v56, %v7829_v20  ;;  %v730_v12 = vrot.slane %v7829_v20, 2  ;;  %v726_v28 = vrot.slane %v7829_v20, 1  ;;  %v740_v53 = vrot.slane %v7829_v20, 5  ;;  %1566 = vmatpush.bf16.msrb.mxu1 %v5320_v17 }
 0x469   :  { %v736_v54 = vrot.slane %v7829_v20, 4  ;;  %v744_v57 = vrot.slane %v7829_v20, 6 }
 0x46a   :  { %7344 = vrot.lane.b32.xlu2 %v7343_v27, %s7587_s3  ;;  %v7353_v22 = vpack.i.bf16 %v417_v21, %v730_v12  ;;  %v7348_v33 = vpack.i.bf16 %v413_v23, %v726_v28  ;;  %v7373_v62 = vpack.i.bf16 %v427_v58, %v740_v53  ;;  %v5216_v21 = vor.u32 %v6873_v16, %v5215_v15  ;;  %v6895_v12 = vld [vmem:[#allocation2 + $0xc4] sm:$0xf0]  ;;  %v5455_v28 = vld [vmem:[#allocation2 + $0x1f0] sm:$0xf]  ;;  %v6945_v58 = vld [vmem:[#allocation2 + $0x254] sm:$0xf0] }
 0x46b   :  { %v7363_v63 = vpack.i.bf16 %v423_v59, %v736_v54  ;;  %v7383_v0 = vpack.i.bf16 %v431_v61, %v744_v57  ;;  %v5312_v23 = vor.u32 %v6897_v19, %v5311_v18  ;;  %v5208_v27 = vor.u32 %v6871_v25, %v5207_v24  ;;  %v5503_v57 = vld [vmem:[#allocation2 + $0x250] sm:$0xf]  ;;  %v6925_v15 = vld [vmem:[#allocation2 + $0x1b4] sm:$0xf0] }
 0x46c   :  { %7354 = vrot.lane.b32.xlu1 %v7353_v22, %s7588_s0  ;;  %7349 = vrot.lane.b32.xlu0 %v7348_v33, %s7585_s16  ;;  %v645_v34 = vpop.permute.xlu1 %644  ;;  %v5304_v30 = vor.u32 %v6895_v12, %v5303_v26  ;;  %v5456_v32 = vor.u32 %v6933_v29, %v5455_v28  ;;  %v5519_v22 = vld [vmem:[#allocation2 + $0x270] sm:$0xf]  ;;  %v6949_v33 = vld [vmem:[#allocation2 + $0x274] sm:$0xf0]  ;;  %v5504_v61 = vor.u32 %v6945_v58, %v5503_v57  ;;  %v5415_v12 = vld [vmem:[#allocation2 + $0x1a0] sm:$0xf] }
 0x46d   :  { %v7841_v40 = vmul.f32 %v645_v34, %v7769_v10  ;;  %v7358_v10 = vpack.i.bf16 %v375_v46, %v690_v39  ;;  %1558 = vmatpush.bf16.msrb.mxu0 %v5216_v21  ;;  %1567 = vmatpush.bf16.msrb.mxu1 %v5312_v23  ;;  %v5520_v34 = vor.u32 %v6949_v33, %v5519_v22  ;;  %v5287_v46 = vld [vmem:[#allocation2 + $0xa0] sm:$0xf]  ;;  %v5279_v59 = vld [vmem:[#allocation2 + $0x90] sm:$0xf]  ;;  %v6913_v18 = vld [vmem:[#allocation2 + $0x154] sm:$0xf0] }
 0x46e   :  { %1591 = vmatpush.bf16.msrb.mxu3 %v5456_v32  ;;  %v5296_v39 = vor.u32 %v6893_v36, %v5295_v31  ;;  %v5375_v16 = vld [vmem:[#allocation2 + $0x150] sm:$0xf]  ;;  %v5424_v17 = vor.u32 %v6925_v15, %v5423_v13  ;;  %v6941_v21 = vld [vmem:[#allocation2 + $0x234] sm:$0xf0]  ;;  %v6923_v28 = vld [vmem:[#allocation2 + $0x1a4] sm:$0xf0] }
 0x46f   :  { %v764_v42 = vrot.slane %v7841_v40, 4  ;;  %v768_v44 = vrot.slane %v7841_v40, 5  ;;  %v754_v2 = vrot.slane %v7841_v40, 1  ;;  %v758_v3 = vrot.slane %v7841_v40, 2  ;;  %v5487_v19 = vld [vmem:[#allocation2 + $0x230] sm:$0xf] }
 0x470   :  { %v7388_v6 = vpack.i.bf16 %v7737_v55, %v7841_v40  ;;  %v5376_v23 = vor.u32 %v6913_v18, %v5375_v16  ;;  %v5488_v24 = vor.u32 %v6941_v21, %v5487_v19  ;;  %v5583_v25 = vld [vmem:[#allocation2 + $0x2f0] sm:$0xf]  ;;  %v6965_v26 = vld [vmem:[#allocation2 + $0x2f4] sm:$0xf0]  ;;  %v5367_v29 = vld [vmem:[#allocation2 + $0x140] sm:$0xf] }
 0x471   :  { %v7368_v37 = vpack.i.bf16 %v451_v35, %v764_v42  ;;  %v7378_v51 = vpack.i.bf16 %v455_v43, %v768_v44  ;;  %v7393_v5 = vpack.i.bf16 %v441_v1, %v754_v2  ;;  %v7398_v7 = vpack.i.bf16 %v445_v4, %v758_v3  ;;  %1559 = vmatpush.bf16.msrb.mxu0 %v5208_v27  ;;  %v6931_v35 = vld [vmem:[#allocation2 + $0x1e4] sm:$0xf0]  ;;  %v5511_v43 = vld [vmem:[#allocation2 + $0x260] sm:$0xf] }
 0x472   :  { %1568 = vmatpush.bf16.msrb.mxu1 %v5304_v30  ;;  %v5448_v42 = vor.u32 %v6931_v35, %v5447_v38  ;;  %v6947_v44 = vld [vmem:[#allocation2 + $0x264] sm:$0xf0]  ;;  %v5383_v1 = vld [vmem:[#allocation2 + $0x160] sm:$0xf]  ;;  %v5584_v27 = vor.u32 %v6965_v26, %v5583_v25  ;;  %v5416_v30 = vor.u32 %v6923_v28, %v5415_v12  ;;  %v5663_v26 = vld [vmem:[#allocation2 + $0x390] sm:$0xf] }
 0x473   :  { %7369 = vrot.lane.b32.xlu2 %v7368_v37, %s7587_s3  ;;  %v5512_v45 = vor.u32 %v6947_v44, %v5511_v43  ;;  %v5288_v37 = vor.u32 %v6891_v49, %v5287_v46  ;;  %v6915_v4 = vld [vmem:[#allocation2 + $0x164] sm:$0xf0]  ;;  %v5479_v22 = vld [vmem:[#allocation2 + $0x220] sm:$0xf]  ;;  %v5359_v44 = vld [vmem:[#allocation2 + $0x130] sm:$0xf] }
 0x474   :  { %7359 = vrot.lane.b32.xlu1 %v7358_v10, %s7588_s0  ;;  %7379 = vrot.lane.b32.xlu0 %v7378_v51, %s7585_s16  ;;  %v6929_v51 = vld [vmem:[#allocation2 + $0x1d4] sm:$0xf0]  ;;  %v5391_v10 = vld [vmem:[#allocation2 + $0x170] sm:$0xf]  ;;  %v6911_v32 = vld [vmem:[#allocation2 + $0x144] sm:$0xf0] }
 0x475   :  { %1604 = vmatpush.bf16.msra.mxu0 %v5520_v34  ;;  %1592 = vmatpush.bf16.msrb.mxu3 %v5448_v42  ;;  %v5440_v53 = vor.u32 %v6929_v51, %v5439_v50  ;;  %v5392_v54 = vor.u32 %v6917_v52, %v5391_v10  ;;  %v6939_v33 = vld [vmem:[#allocation2 + $0x224] sm:$0xf0]  ;;  %v5368_v31 = vor.u32 %v6911_v32, %v5367_v29  ;;  %v5575_v36 = vld [vmem:[#allocation2 + $0x2e0] sm:$0xf]  ;;  %v6921_v42 = vld [vmem:[#allocation2 + $0x194] sm:$0xf0] }
 0x476   :  { %1569 = vmatpush.bf16.msrb.mxu1 %v5296_v39  ;;  %v5480_v34 = vor.u32 %v6939_v33, %v5479_v22  ;;  %v6963_v38 = vld [vmem:[#allocation2 + $0x2e4] sm:$0xf0]  ;;  %v5407_v39 = vld [vmem:[#allocation2 + $0x190] sm:$0xf]  ;;  %v6937_v50 = vld [vmem:[#allocation2 + $0x214] sm:$0xf0] }
 0x477   :  { %1578 = vmatpush.bf16.msrb.mxu2 %v5392_v54  ;;  %v5576_v35 = vor.u32 %v6963_v38, %v5575_v36  ;;  %v5408_v43 = vor.u32 %v6921_v42, %v5407_v39  ;;  %v5471_v46 = vld [vmem:[#allocation2 + $0x210] sm:$0xf]  ;;  %v6961_v51 = vld [vmem:[#allocation2 + $0x2d4] sm:$0xf0]  ;;  %v6919_v54 = vld [vmem:[#allocation2 + $0x184] sm:$0xf0] }
 0x478   :  { %v5472_v10 = vor.u32 %v6937_v50, %v5471_v46  ;;  %v5351_v57 = vld [vmem:[#allocation2 + $0x120] sm:$0xf]  ;;  %v6987_v16 = vld [vmem:[#allocation2 + $0x3a4] sm:$0xf0]  ;;  %v5647_v29 = vld [vmem:[#allocation2 + $0x370] sm:$0xf] }
 0x479   :  { %1605 = vmatpush.bf16.msra.mxu0 %v5512_v45  ;;  %1593 = vmatpush.bf16.msrb.mxu3 %v5440_v53  ;;  %v6909_v45 = vld [vmem:[#allocation2 + $0x134] sm:$0xf0]  ;;  %v5399_v53 = vld [vmem:[#allocation2 + $0x180] sm:$0xf]  ;;  %v6903_v21 = vld [vmem:[#allocation2 + $0x104] sm:$0xf0] }
 0x47a   :  { %1570 = vmatpush.bf16.msrb.mxu1 %v5288_v37  ;;  %v5360_v49 = vor.u32 %v6909_v45, %v5359_v44  ;;  %v5567_v37 = vld [vmem:[#allocation2 + $0x2d0] sm:$0xf]  ;;  %v5400_v58 = vor.u32 %v6919_v54, %v5399_v53  ;;  %v5671_v15 = vld [vmem:[#allocation2 + $0x3a0] sm:$0xf]  ;;  %v6955_v25 = vld [vmem:[#allocation2 + $0x2a4] sm:$0xf0] }
 0x47b   :  { %7374 = vrot.lane.b32.xlu2 %v7373_v62, %s7585_s16  ;;  %v6889_v62 = vld [vmem:[#allocation2 + $0x94] sm:$0xf0]  ;;  %v5568_v52 = vor.u32 %v6961_v51, %v5567_v37  ;;  %v5672_v18 = vor.u32 %v6987_v16, %v5671_v15  ;;  %v5335_v19 = vld [vmem:[#allocation2 + $0x100] sm:$0xf]  ;;  %v5535_v33 = vld [vmem:[#allocation2 + $0x290] sm:$0xf] }
 0x47c   :  { %7364 = vrot.lane.b32.xlu1 %v7363_v63, %s7587_s3  ;;  %7384 = vrot.lane.b32.xlu0 %v7383_v0, %s7588_s0  ;;  %v5431_v63 = vld [vmem:[#allocation2 + $0x1c0] sm:$0xf]  ;;  %v6927_v0 = vld [vmem:[#allocation2 + $0x1c4] sm:$0xf0]  ;;  %v5280_v2 = vor.u32 %v6889_v62, %v5279_v59  ;;  %v5631_v46 = vld [vmem:[#allocation2 + $0x350] sm:$0xf] }
 0x47d   :  { %v5432_v3 = vor.u32 %v6927_v0, %v5431_v63  ;;  %1606 = vmatpush.bf16.msra.mxu0 %v5504_v61  ;;  %v6907_v59 = vld [vmem:[#allocation2 + $0x124] sm:$0xf0]  ;;  %v5463_v61 = vld [vmem:[#allocation2 + $0x200] sm:$0xf]  ;;  %v5615_v15 = vld [vmem:[#allocation2 + $0x330] sm:$0xf] }
 0x47e   :  { %1571 = vmatpush.bf16.msrb.mxu1 %v5280_v2  ;;  %v6935_v62 = vld [vmem:[#allocation2 + $0x204] sm:$0xf0]  ;;  %v5352_v0 = vor.u32 %v6907_v59, %v5351_v57  ;;  %v5527_v44 = vld [vmem:[#allocation2 + $0x280] sm:$0xf]  ;;  %v6973_v16 = vld [vmem:[#allocation2 + $0x334] sm:$0xf0] }
 0x47f   :  { %1594 = vmatpush.bf16.msrb.mxu3 %v5432_v3  ;;  %v5464_v2 = vor.u32 %v6935_v62, %v5463_v61  ;;  %v5559_v3 = vld [vmem:[#allocation2 + $0x2c0] sm:$0xf]  ;;  %v6983_v38 = vld [vmem:[#allocation2 + $0x384] sm:$0xf0] }
 0x480   :  { %v6979_v39 = vld [vmem:[#allocation2 + $0x364] sm:$0xf0] }
 0x481   :  { %v6951_v45 = vld [vmem:[#allocation2 + $0x284] sm:$0xf0] }
 0x482   :  { %1572 = vmatpush.bf16.msrb.mxu1 %v5272_v14  ;;  %v6957_v14 = vld [vmem:[#allocation2 + $0x2b4] sm:$0xf0]  ;;  %v5528_v50 = vor.u32 %v6951_v45, %v5527_v44  ;;  %v365_v44 = vrot.slane %v7723_v47, 7 }
 0x483   :  { %7394 = vrot.lane.b32.xlu2 %v7393_v5, %s7585_s16  ;;  %v5495_v5 = vld [vmem:[#allocation2 + $0x240] sm:$0xf]  ;;  %1595 = vmatpush.bf16.msrb.mxu3 %v5424_v17  ;;  %v5552_v17 = vor.u32 %v6957_v14, %v5551_v11 }
 0x484   :  { %7389 = vrot.lane.b32.xlu1 %v7388_v6, %s7587_s3  ;;  %7399 = vrot.lane.b32.xlu0 %v7398_v7, %s7588_s0  ;;  %v5384_v6 = vor.u32 %v6915_v4, %v5383_v1  ;;  %v6943_v7 = vld [vmem:[#allocation2 + $0x244] sm:$0xf0]  ;;  %v5679_v4 = vld [vmem:[#allocation2 + $0x3b0] sm:$0xf] }
 0x485   :  { %v5496_v8 = vor.u32 %v6943_v7, %v5495_v5  ;;  %v6959_v1 = vld [vmem:[#allocation2 + $0x2c4] sm:$0xf0] }
 0x486   :  { %1579 = vmatpush.bf16.msrb.mxu2 %v5384_v6  ;;  %1617 = vmatpush.bf16.msra.mxu1 %v5584_v27  ;;  %v5560_v5 = vor.u32 %v6959_v1, %v5559_v3  ;;  %v6989_v6 = vld [vmem:[#allocation2 + $0x3b4] sm:$0xf0]  ;;  %v5623_v3 = vld [vmem:[#allocation2 + $0x340] sm:$0xf] }
 0x487   :  { %1607 = vmatpush.bf16.msra.mxu0 %v5496_v8  ;;  %1596 = vmatpush.bf16.msrb.mxu3 %v5416_v30  ;;  %v5680_v7 = vor.u32 %v6989_v6, %v5679_v4  ;;  %v5343_v8 = vld [vmem:[#allocation2 + $0x110] sm:$0xf]  ;;  %v6985_v27 = vld [vmem:[#allocation2 + $0x394] sm:$0xf0]  ;;  %v351_v6 = vrot.slane %v7723_v47, 3 }
 0x488   :  { %v5344_v13 = vor.u32 %v6905_v9, %v5343_v8  ;;  %v5664_v28 = vor.u32 %v6985_v27, %v5663_v26  ;;  %v6981_v30 = vld [vmem:[#allocation2 + $0x374] sm:$0xf0]  ;;  %v6900_v8 = vld [vmem:[#allocation2 + $0xf4] sm:$0xf]  ;;  %v5329_v9 = vld [vmem:[#allocation2 + $0xf8] sm:$0xf0] }
 0x489   :  { %v5648_v32 = vor.u32 %v6981_v30, %v5647_v29  ;;  %v6898_v29 = vld [vmem:[#allocation2 + $0xe4] sm:$0xf]  ;;  %v5321_v30 = vld [vmem:[#allocation2 + $0xe8] sm:$0xf0] }
 0x48a   :  { %1580 = vmatpush.bf16.msrb.mxu2 %v5376_v23  ;;  %1618 = vmatpush.bf16.msra.mxu1 %v5576_v35  ;;  %v5543_v23 = vld [vmem:[#allocation2 + $0x2a0] sm:$0xf] }
 0x48b   :  { %1608 = vmatpush.bf16.msra.mxu0 %v5488_v24  ;;  %1597 = vmatpush.bf16.msrb.mxu3 %v5408_v43  ;;  %v5336_v24 = vor.u32 %v6903_v21, %v5335_v19  ;;  %v5544_v12 = vor.u32 %v6955_v25, %v5543_v23  ;;  %v5639_v35 = vld [vmem:[#allocation2 + $0x360] sm:$0xf]  ;;  %v5332_v23 = vor.u32 %v6900_v8, %v5329_v9 }
 0x48c   :  { %v5640_v43 = vor.u32 %v6979_v39, %v5639_v35  ;;  %v6896_v39 = vld [vmem:[#allocation2 + $0xd4] sm:$0xf] }
 0x48e   :  { %1581 = vmatpush.bf16.msrb.mxu2 %v5368_v31  ;;  %1619 = vmatpush.bf16.msra.mxu1 %v5568_v52  ;;  %v6953_v31 = vld [vmem:[#allocation2 + $0x294] sm:$0xf0] }
 0x48f   :  { %1609 = vmatpush.bf16.msra.mxu0 %v5480_v34  ;;  %1598 = vmatpush.bf16.msrb.mxu3 %v5400_v58  ;;  %v5655_v34 = vld [vmem:[#allocation2 + $0x380] sm:$0xf]  ;;  %v5536_v36 = vor.u32 %v6953_v31, %v5535_v33 }
 0x490   :  { %v5656_v42 = vor.u32 %v6983_v38, %v5655_v34  ;;  %v5607_v31 = vld [vmem:[#allocation2 + $0x320] sm:$0xf]  ;;  %v6971_v34 = vld [vmem:[#allocation2 + $0x324] sm:$0xf0] }
 0x492   :  { %1582 = vmatpush.bf16.msrb.mxu2 %v5360_v49  ;;  %1620 = vmatpush.bf16.msra.mxu1 %v5560_v5  ;;  %v6977_v49 = vld [vmem:[#allocation2 + $0x354] sm:$0xf0] }
 0x493   :  { %1610 = vmatpush.bf16.msra.mxu0 %v5472_v10  ;;  %1647 = vmatpush.bf16.msra.mxu3 %v5680_v7  ;;  %v5632_v37 = vor.u32 %v6977_v49, %v5631_v46  ;;  %v5324_v46 = vor.u32 %v6898_v29, %v5321_v30  ;;  %v5393_v49 = vld [vmem:[#allocation2 + $0x178] sm:$0xf0]  ;;  %v6912_v29 = vld [vmem:[#allocation2 + $0x154] sm:$0xf] }
 0x494   :  { %v5377_v30 = vld [vmem:[#allocation2 + $0x158] sm:$0xf0] }
 0x496   :  { %1583 = vmatpush.bf16.msrb.mxu2 %v5352_v0  ;;  %1621 = vmatpush.bf16.msra.mxu1 %v5552_v17 }
 0x497   :  { %1611 = vmatpush.bf16.msra.mxu0 %v5464_v2  ;;  %1648 = vmatpush.bf16.msra.mxu3 %v5672_v18  ;;  %v666_v2 = vrot.slane %v7790_v41, 3 }
 0x49a   :  { %1584 = vmatpush.bf16.msrb.mxu2 %v5344_v13  ;;  %1622 = vmatpush.bf16.msra.mxu1 %v5544_v12 }
 0x49b   :  { %1649 = vmatpush.bf16.msra.mxu3 %v5664_v28 }
 0x49e   :  { %1585 = vmatpush.bf16.msrb.mxu2 %v5336_v24  ;;  %1623 = vmatpush.bf16.msra.mxu1 %v5536_v36  ;;  %v5616_v24 = vor.u32 %v6973_v16, %v5615_v15  ;;  %v6884_v16 = vld [vmem:[#allocation2 + $0x74] sm:$0xf] }
 0x49f   :  { %1650 = vmatpush.bf16.msra.mxu3 %v5656_v42  ;;  %v5313_v42 = vld [vmem:[#allocation2 + $0xd8] sm:$0xf0] }
 0x4a2   :  { %1630 = vmatpush.bf16.msra.mxu2 %v5648_v32  ;;  %1624 = vmatpush.bf16.msra.mxu1 %v5528_v50 }
 0x4a3   :  { %v7870_v63 = vpop.permute.xlu2 %7289 }
 0x4a4   :  { %v7292_v51 = vunpack.i.h.bf16 %v7870_v63  ;;  %v7291_v10 = vunpack.i.l.bf16 %v7870_v63  ;;  %v6975_v63 = vld [vmem:[#allocation2 + $0x344] sm:$0xf0] }
 0x4a5   :  { %v5624_v5 = vor.u32 %v6975_v63, %v5623_v3 }
 0x4a6   :  { %1631 = vmatpush.bf16.msra.mxu2 %v5640_v43  ;;  %v5608_v43 = vor.u32 %v6971_v34, %v5607_v31 }
 0x4aa   :  { %1632 = vmatpush.bf16.msra.mxu2 %v5632_v37 }
 0x4ab   :  { %v7872_v22 = vpop.permute.xlu2 %7304 }
 0x4ac   :  { %v7307_v13 = vunpack.i.h.bf16 %v7872_v22  ;;  %v7306_v17 = vunpack.i.l.bf16 %v7872_v22  ;;  %v680_v22 = vrot.slane %v7790_v41, 7  ;;  %v6916_v41 = vld [vmem:[#allocation2 + $0x174] sm:$0xf] }
 0x4ae   :  { %1633 = vmatpush.bf16.msra.mxu2 %v5624_v5 }
 0x4b2   :  { %1634 = vmatpush.bf16.msra.mxu2 %v5616_v24  ;;  %v6892_v24 = vld [vmem:[#allocation2 + $0xb4] sm:$0xf] }
 0x4b3   :  { %v7876_v61 = vpop.permute.xlu2 %7319 }
 0x4b6   :  { %1635 = vmatpush.bf16.msra.mxu2 %v5608_v43 }
 0x4bb   :  { %v7325_v36 = vpop.permute.xlu2 %7324 }
 0x4bc   :  { %v7327_v37 = vunpack.i.h.bf16 %v7325_v36 }
 0x4bd   :  { %v7300_v52 = vpop.permute.xlu1 %7299  ;;  %v7295_v53 = vpop.permute.xlu0 %7294 }
 0x4be   :  { %v7302_v54 = vunpack.i.h.bf16 %v7300_v52  ;;  %v7301_v57 = vunpack.i.l.bf16 %v7300_v52  ;;  %v7297_v58 = vunpack.i.h.bf16 %v7295_v53  ;;  %v7296_v59 = vunpack.i.l.bf16 %v7295_v53  ;;  %v5599_v52 = vld [vmem:[#allocation2 + $0x310] sm:$0xf]  ;;  %v6969_v53 = vld [vmem:[#allocation2 + $0x314] sm:$0xf0] }
 0x4bf   :  { %v5600_v47 = vor.u32 %v6969_v53, %v5599_v52  ;;  %v5281_v52 = vld [vmem:[#allocation2 + $0x98] sm:$0xf0]  ;;  %v6908_v53 = vld [vmem:[#allocation2 + $0x134] sm:$0xf] }
 0x4c0   :  { %v395_v62 = vsel %vm164_vm3, %v7292_v51, %v7297_v58  ;;  %v710_v0 = vsel %vm164_vm3, %v7291_v10, %v7296_v59  ;;  %v5316_v10 = vor.u32 %v6896_v39, %v5313_v42  ;;  %v6890_v39 = vld [vmem:[#allocation2 + $0xa4] sm:$0xf]  ;;  %v5380_v42 = vor.u32 %v6912_v29, %v5377_v30  ;;  %v5585_v30 = vld [vmem:[#allocation2 + $0x2f8] sm:$0xf0] }
 0x4c1   :  { %v397_v1 = vsel %vm396_vm4, %v395_v62, %v7302_v54  ;;  %v711_v4 = vsel %vm396_vm4, %v710_v0, %v7301_v57  ;;  %v7326_v54 = vunpack.i.l.bf16 %v7325_v36  ;;  %v5396_v62 = vor.u32 %v6916_v41, %v5393_v49  ;;  %1636 = vmatpush.bf16.msra.mxu2 %v5600_v47  ;;  %v6882_v36 = vld [vmem:[#allocation2 + $0x64] sm:$0xf]  ;;  %v6880_v49 = vld [vmem:[#allocation2 + $0x54] sm:$0xf] }
 0x4c2   :  { %v712_v7 = vsel %vm398_vm5, %v711_v4, %v666_v2  ;;  %v399_v14 = vsel %vm398_vm5, %v397_v1, %v351_v6  ;;  %v6894_v1 = vld [vmem:[#allocation2 + $0xc4] sm:$0xf]  ;;  %v5305_v4 = vld [vmem:[#allocation2 + $0xc8] sm:$0xf0] }
 0x4c3   :  { %v790_v11 = vrot.slane %v712_v7, 7  ;;  %v6914_v6 = vld [vmem:[#allocation2 + $0x164] sm:$0xf]  ;;  %v5385_v7 = vld [vmem:[#allocation2 + $0x168] sm:$0xf0] }
 0x4c4   :  { %v7345_v43 = vpop.permute.xlu2 %7344 }
 0x4c5   :  { %v7315_v18 = vpop.permute.xlu1 %7314  ;;  %v7310_v19 = vpop.permute.xlu0 %7309  ;;  %v807_v21 = vsel %vm806_vm6, %v399_v14, %v790_v11  ;;  %v393_v11 = vrot.slane %v7725_v48, 7 }
 0x4c6   :  { %v7317_v25 = vunpack.i.h.bf16 %v7315_v18  ;;  %v7316_v26 = vunpack.i.l.bf16 %v7315_v18  ;;  %v7312_v27 = vunpack.i.h.bf16 %v7310_v19  ;;  %v7311_v12 = vunpack.i.l.bf16 %v7310_v19  ;;  %v5591_v18 = vld [vmem:[#allocation2 + $0x300] sm:$0xf]  ;;  %v6967_v19 = vld [vmem:[#allocation2 + $0x304] sm:$0xf0] }
 0x4c7   :  { %v7889_v28 = vpack.c.bf16 %v807_v21, %v807_v21 }
 0x4c8   :  { %v400_v32 = vsel %vm164_vm3, %v7307_v13, %v7312_v27  ;;  %v713_v33 = vsel %vm164_vm3, %v7306_v17, %v7311_v12  ;;  %v708_v13 = vrot.slane %v7808_v60, 7  ;;  %v5308_v17 = vor.u32 %v6894_v1, %v5305_v4  ;;  %v5273_v1 = vld [vmem:[#allocation2 + $0x88] sm:$0xf0] }
 0x4c9   :  { %v401_v38 = vsel %vm396_vm4, %v400_v32, %v7317_v25  ;;  %v714_v35 = vsel %vm396_vm4, %v713_v33, %v7316_v26  ;;  %1560 = vmatmul.bf16.vlgmr.msrb.gmra.mxu0 %v7889_v28  ;;  %v5297_v25 = vld [vmem:[#allocation2 + $0xb8] sm:$0xf0]  ;;  %v5388_v26 = vor.u32 %v6914_v6, %v5385_v7  ;;  %v5592_v27 = vor.u32 %v6967_v19, %v5591_v18 }
 0x4ca   :  { %1669 = vmatpush.bf16.msrb.mxu0 %v5332_v23  ;;  %v715_v45 = vsel %vm398_vm5, %v714_v35, %v680_v22  ;;  %v402_v51 = vsel %vm398_vm5, %v401_v38, %v365_v44  ;;  %v5265_v23 = vld [vmem:[#allocation2 + $0x78] sm:$0xf0]  ;;  %v5257_v38 = vld [vmem:[#allocation2 + $0x68] sm:$0xf0]  ;;  %v5300_v35 = vor.u32 %v6892_v24, %v5297_v25  ;;  %v6876_v25 = vld [vmem:[#allocation2 + $0x34] sm:$0xf] }
 0x4cb   :  { %v791_v50 = vrot.slane %v715_v45, 7  ;;  %1637 = vmatpush.bf16.msra.mxu2 %v5592_v27  ;;  %v5268_v31 = vor.u32 %v6884_v16, %v5265_v23  ;;  %v5289_v44 = vld [vmem:[#allocation2 + $0xa8] sm:$0xf0]  ;;  %v6910_v45 = vld [vmem:[#allocation2 + $0x144] sm:$0xf]  ;;  %v5260_v41 = vor.u32 %v6882_v36, %v5257_v38  ;;  %v421_v16 = vrot.slane %v7739_v56, 3 }
 0x4cc   :  { %v6964_v27 = vld [vmem:[#allocation2 + $0x2f4] sm:$0xf] }
 0x4cd   :  { %v7335_v57 = vpop.permute.xlu1 %7334  ;;  %v7330_v58 = vpop.permute.xlu0 %7329  ;;  %v808_v59 = vsel %vm806_vm6, %v402_v51, %v791_v50  ;;  %v5249_v50 = vld [vmem:[#allocation2 + $0x58] sm:$0xf0]  ;;  %v6888_v51 = vld [vmem:[#allocation2 + $0x94] sm:$0xf] }
 0x4ce   :  { %v7337_v0 = vunpack.i.h.bf16 %v7335_v57  ;;  %v7336_v2 = vunpack.i.l.bf16 %v7335_v57  ;;  %v7332_v3 = vunpack.i.h.bf16 %v7330_v58  ;;  %v7331_v63 = vunpack.i.l.bf16 %v7330_v58  ;;  %1670 = vmatpush.bf16.msrb.mxu0 %v5324_v46  ;;  %v5369_v46 = vld [vmem:[#allocation2 + $0x148] sm:$0xf0]  ;;  %v6878_v58 = vld [vmem:[#allocation2 + $0x44] sm:$0xf]  ;;  %v7918_v6 = vpop.permute.xlu2 %7369 }
 0x4cf   :  { %v7901_v5 = vpack.c.bf16 %v808_v59, %v808_v59  ;;  %v5252_v57 = vor.u32 %v6880_v49, %v5249_v50  ;;  %v7347_v59 = vunpack.i.h.bf16 %v7345_v43  ;;  %v5588_v50 = vor.u32 %v6964_v27, %v5585_v30 }
 0x4d0   :  { %v406_v8 = vsel %vm164_vm3, %v7327_v37, %v7332_v3  ;;  %v719_v9 = vsel %vm164_vm3, %v7326_v54, %v7331_v63  ;;  %v5292_v37 = vor.u32 %v6890_v39, %v5289_v44  ;;  %v5361_v54 = vld [vmem:[#allocation2 + $0x138] sm:$0xf0]  ;;  %v5284_v3 = vor.u32 %v6888_v51, %v5281_v52  ;;  %v6886_v63 = vld [vmem:[#allocation2 + $0x84] sm:$0xf] }
 0x4d1   :  { %v407_v14 = vsel %vm396_vm4, %v406_v8, %v7337_v0  ;;  %v720_v15 = vsel %vm396_vm4, %v719_v9, %v7336_v2  ;;  %1573 = vmatmul.bf16.vlgmr.msrb.gmra.mxu1 %v7901_v5  ;;  %v5241_v2 = vld [vmem:[#allocation2 + $0x48] sm:$0xf0]  ;;  %v5364_v4 = vor.u32 %v6908_v53, %v5361_v54  ;;  %v7322_v39 = vunpack.i.h.bf16 %v7876_v61  ;;  %v6902_v53 = vld [vmem:[#allocation2 + $0x104] sm:$0xf] }
 0x4d2   :  { %1671 = vmatpush.bf16.msrb.mxu0 %v5316_v10  ;;  %v721_v21 = vsel %vm398_vm5, %v720_v15, %v708_v13  ;;  %1682 = vmatpush.bf16.msrb.mxu1 %v5396_v62  ;;  %v408_v32 = vsel %vm398_vm5, %v407_v14, %v393_v11  ;;  %v5372_v10 = vor.u32 %v6910_v45, %v5369_v46  ;;  %v7346_v62 = vunpack.i.l.bf16 %v7345_v43  ;;  %v6906_v13 = vld [vmem:[#allocation2 + $0x124] sm:$0xf]  ;;  %v5353_v14 = vld [vmem:[#allocation2 + $0x128] sm:$0xf0] }
 0x4d3   :  { %v793_v12 = vrot.slane %v721_v21, 7  ;;  %v734_v15 = vrot.slane %v7829_v20, 3  ;;  %v5244_v19 = vor.u32 %v6878_v58, %v5241_v2  ;;  %v5276_v21 = vor.u32 %v6886_v63, %v5273_v1  ;;  %v5337_v54 = vld [vmem:[#allocation2 + $0x108] sm:$0xf0] }
 0x4d4   :  { %v7371_v45 = vunpack.i.l.bf16 %v7918_v6 }
 0x4d5   :  { %v7912_v33 = vpop.permute.xlu0 %7339  ;;  %v810_v22 = vsel %vm806_vm6, %v408_v32, %v793_v12  ;;  %v5356_v12 = vor.u32 %v6906_v13, %v5353_v14  ;;  %v6904_v32 = vld [vmem:[#allocation2 + $0x114] sm:$0xf]  ;;  %v5457_v14 = vld [vmem:[#allocation2 + $0x1f8] sm:$0xf0] }
 0x4d6   :  { %v7915_v34 = vpack.c.bf16 %v810_v22, %v810_v22  ;;  %1672 = vmatpush.bf16.msrb.mxu0 %v5308_v17  ;;  %1683 = vmatpush.bf16.msrb.mxu1 %v5388_v26  ;;  %v5233_v26 = vld [vmem:[#allocation2 + $0x38] sm:$0xf0]  ;;  %v7341_v36 = vunpack.i.l.bf16 %v7912_v33  ;;  %v7375_v2 = vpop.permute.xlu2 %7374  ;;  %v6932_v13 = vld [vmem:[#allocation2 + $0x1f4] sm:$0xf] }
 0x4d7   :  { %v5345_v22 = vld [vmem:[#allocation2 + $0x118] sm:$0xf0]  ;;  %v5236_v44 = vor.u32 %v6876_v25, %v5233_v26  ;;  %v5460_v27 = vor.u32 %v6932_v13, %v5457_v14  ;;  %v7377_v30 = vunpack.i.h.bf16 %v7375_v2 }
 0x4d8   :  { %1599 = vmatmul.bf16.vlgmr.msrb.gmra.mxu3 %v7915_v34 }
 0x4d9   :  { %1656 = vmatpush.bf16.msrb.mxu3 %v5268_v31  ;;  %v7342_v31 = vunpack.i.h.bf16 %v7912_v33  ;;  %v6874_v33 = vld [vmem:[#allocation2 + $0x24] sm:$0xf] }
 0x4da   :  { %1673 = vmatpush.bf16.msrb.mxu0 %v5300_v35  ;;  %1684 = vmatpush.bf16.msrb.mxu1 %v5380_v42  ;;  %v694_v35 = vrot.slane %v7808_v60, 3  ;;  %v7321_v42 = vunpack.i.l.bf16 %v7876_v61  ;;  %v5348_v60 = vor.u32 %v6904_v32, %v5345_v22  ;;  %v7376_v32 = vunpack.i.l.bf16 %v7375_v2 }
 0x4db   :  { %v403_v58 = vsel %vm164_vm3, %v7322_v39, %v7342_v31  ;;  %v5449_v39 = vld [vmem:[#allocation2 + $0x1e8] sm:$0xf0] }
 0x4dd   :  { %1657 = vmatpush.bf16.msrb.mxu3 %v5260_v41 }
 0x4de   :  { %v7355_v47 = vpop.permute.xlu1 %7354  ;;  %v7350_v0 = vpop.permute.xlu0 %7349  ;;  %1674 = vmatpush.bf16.msrb.mxu0 %v5292_v37  ;;  %1685 = vmatpush.bf16.msrb.mxu1 %v5372_v10  ;;  %v5225_v37 = vld [vmem:[#allocation2 + $0x28] sm:$0xf0] }
 0x4df   :  { %v7357_v7 = vunpack.i.h.bf16 %v7355_v47  ;;  %v7356_v8 = vunpack.i.l.bf16 %v7355_v47  ;;  %v7352_v9 = vunpack.i.h.bf16 %v7350_v0  ;;  %v7351_v11 = vunpack.i.l.bf16 %v7350_v0  ;;  %v6962_v47 = vld [vmem:[#allocation2 + $0x2e4] sm:$0xf]  ;;  %v5577_v0 = vld [vmem:[#allocation2 + $0x2e8] sm:$0xf0] }
 0x4e1   :  { %v459_v17 = vsel %vm164_vm3, %v7347_v59, %v7352_v9  ;;  %v772_v18 = vsel %vm164_vm3, %v7346_v62, %v7351_v11  ;;  %1658 = vmatpush.bf16.msrb.mxu3 %v5252_v57  ;;  %v7372_v57 = vunpack.i.h.bf16 %v7918_v6  ;;  %v716_v59 = vsel %vm164_vm3, %v7321_v42, %v7341_v36 }
 0x4e2   :  { %v460_v23 = vsel %vm396_vm4, %v459_v17, %v7357_v7  ;;  %v773_v24 = vsel %vm396_vm4, %v772_v18, %v7356_v8  ;;  %1675 = vmatpush.bf16.msrb.mxu0 %v5284_v3  ;;  %1686 = vmatpush.bf16.msrb.mxu1 %v5364_v4  ;;  %v5228_v4 = vor.u32 %v6874_v33, %v5225_v37  ;;  %v6872_v7 = vld [vmem:[#allocation2 + $0x14] sm:$0xf]  ;;  %v5217_v8 = vld [vmem:[#allocation2 + $0x18] sm:$0xf0]  ;;  %v379_v11 = vrot.slane %v7725_v48, 3 }
 0x4e3   :  { %v774_v29 = vsel %vm398_vm5, %v773_v24, %v734_v15  ;;  %v461_v43 = vsel %vm398_vm5, %v460_v23, %v421_v16  ;;  %v5340_v15 = vor.u32 %v6902_v53, %v5337_v54  ;;  %v5580_v17 = vor.u32 %v6962_v47, %v5577_v0  ;;  %v5561_v33 = vld [vmem:[#allocation2 + $0x2c8] sm:$0xf0]  ;;  %v7395_v47 = vpop.permute.xlu2 %7394 }
 0x4e4   :  { %v794_v38 = vrot.slane %v774_v29, 7  ;;  %v5220_v26 = vor.u32 %v6872_v7, %v5217_v8  ;;  %v5209_v29 = vld [vmem:[#allocation2 + $0x8] sm:$0xf0]  ;;  %v435_v0 = vrot.slane %v7739_v56, 7  ;;  %v7396_v13 = vunpack.i.l.bf16 %v7395_v47 }
 0x4e5   :  { %1659 = vmatpush.bf16.msrb.mxu3 %v5244_v19  ;;  %v6960_v19 = vld [vmem:[#allocation2 + $0x2d4] sm:$0xf] }
 0x4e6   :  { %v7360_v46 = vpop.permute.xlu1 %7359  ;;  %v7380_v41 = vpop.permute.xlu0 %7379  ;;  %v811_v49 = vsel %vm806_vm6, %v461_v43, %v794_v38  ;;  %1676 = vmatpush.bf16.msrb.mxu0 %v5276_v21  ;;  %1687 = vmatpush.bf16.msrb.mxu1 %v5356_v12  ;;  %v5569_v21 = vld [vmem:[#allocation2 + $0x2d8] sm:$0xf0]  ;;  %v6870_v12 = vld [vmem:[#allocation2 + $0x4] sm:$0xf] }
 0x4e7   :  { %v7362_v51 = vunpack.i.h.bf16 %v7360_v46  ;;  %v7361_v10 = vunpack.i.l.bf16 %v7360_v46  ;;  %v7382_v52 = vunpack.i.h.bf16 %v7380_v41  ;;  %v7381_v61 = vunpack.i.l.bf16 %v7380_v41  ;;  %v6948_v46 = vld [vmem:[#allocation2 + $0x274] sm:$0xf]  ;;  %v5521_v41 = vld [vmem:[#allocation2 + $0x278] sm:$0xf0] }
 0x4e8   :  { %v7938_v62 = vpack.c.bf16 %v811_v49, %v811_v49  ;;  %v5572_v38 = vor.u32 %v6960_v19, %v5569_v21  ;;  %v5212_v49 = vor.u32 %v6870_v12, %v5209_v29  ;;  %v5524_v54 = vor.u32 %v6948_v46, %v5521_v41  ;;  %v5505_v12 = vld [vmem:[#allocation2 + $0x258] sm:$0xf0]  ;;  %v6954_v29 = vld [vmem:[#allocation2 + $0x2a4] sm:$0xf] }
 0x4e9   :  { %v404_v3 = vsel %vm396_vm4, %v403_v58, %v7362_v51  ;;  %v717_v63 = vsel %vm396_vm4, %v716_v59, %v7361_v10  ;;  %v781_v1 = vsel %vm164_vm3, %v7371_v45, %v7381_v61  ;;  %1660 = vmatpush.bf16.msrb.mxu3 %v5236_v44  ;;  %v468_v16 = vsel %vm164_vm3, %v7372_v57, %v7382_v52  ;;  %v6928_v52 = vld [vmem:[#allocation2 + $0x1d4] sm:$0xf]  ;;  %v5441_v57 = vld [vmem:[#allocation2 + $0x1d8] sm:$0xf0]  ;;  %v6946_v58 = vld [vmem:[#allocation2 + $0x264] sm:$0xf] }
 0x4ea   :  { %v718_v6 = vsel %vm398_vm5, %v717_v63, %v694_v35  ;;  %v797_v9 = vrot.slane %v781_v1, 7  ;;  %1612 = vmatmul.bf16.vlgmr.msra.gmra.mxu0 %v7938_v62  ;;  %1688 = vmatpush.bf16.msrb.mxu1 %v5348_v60  ;;  %v405_v24 = vsel %vm398_vm5, %v404_v3, %v379_v11  ;;  %v6930_v35 = vld [vmem:[#allocation2 + $0x1e4] sm:$0xf]  ;;  %v748_v51 = vrot.slane %v7829_v20, 7  ;;  %v5513_v59 = vld [vmem:[#allocation2 + $0x268] sm:$0xf0] }
 0x4eb   :  { %1721 = vmatpush.bf16.msra.mxu0 %v5588_v50  ;;  %v792_v18 = vrot.slane %v718_v6, 7  ;;  %v6958_v50 = vld [vmem:[#allocation2 + $0x2c4] sm:$0xf]  ;;  %v5452_v10 = vor.u32 %v6930_v35, %v5449_v39  ;;  %v6956_v20 = vld [vmem:[#allocation2 + $0x2b4] sm:$0xf]  ;;  %v5444_v7 = vor.u32 %v6928_v52, %v5441_v57  ;;  %v5516_v8 = vor.u32 %v6946_v58, %v5513_v59 }
 0x4ec   :  { %v814_v23 = vsel %vm806_vm6, %v468_v16, %v797_v9  ;;  %v5564_v3 = vor.u32 %v6958_v50, %v5561_v33  ;;  %v5553_v63 = vld [vmem:[#allocation2 + $0x2b8] sm:$0xf0]  ;;  %v6980_v6 = vld [vmem:[#allocation2 + $0x374] sm:$0xf]  ;;  %v7397_v11 = vunpack.i.h.bf16 %v7395_v47  ;;  %v6978_v35 = vld [vmem:[#allocation2 + $0x364] sm:$0xf] }
 0x4ed   :  { %v7949_v25 = vpack.c.bf16 %v814_v23, %v814_v23  ;;  %1661 = vmatpush.bf16.msrb.mxu3 %v5228_v4  ;;  %v809_v48 = vsel %vm806_vm6, %v405_v24, %v792_v18  ;;  %v5649_v9 = vld [vmem:[#allocation2 + $0x378] sm:$0xf0]  ;;  %v5556_v16 = vor.u32 %v6956_v20, %v5553_v63  ;;  %v5433_v18 = vld [vmem:[#allocation2 + $0x1c8] sm:$0xf0]  ;;  %v6942_v50 = vld [vmem:[#allocation2 + $0x244] sm:$0xf] }
 0x4ee   :  { %v7365_v22 = vpop.permute.xlu1 %7364  ;;  %v7385_v31 = vpop.permute.xlu0 %7384  ;;  %v7952_v36 = vpack.c.bf16 %v809_v48, %v809_v48  ;;  %1689 = vmatpush.bf16.msrb.mxu1 %v5340_v15  ;;  %v6944_v48 = vld [vmem:[#allocation2 + $0x254] sm:$0xf]  ;;  %v5641_v39 = vld [vmem:[#allocation2 + $0x368] sm:$0xf0]  ;;  %v6950_v20 = vld [vmem:[#allocation2 + $0x284] sm:$0xf] }
 0x4ef   :  { %v7367_v42 = vunpack.i.h.bf16 %v7365_v22  ;;  %v7366_v43 = vunpack.i.l.bf16 %v7365_v22  ;;  %v7387_v44 = vunpack.i.h.bf16 %v7385_v31  ;;  %v7386_v45 = vunpack.i.l.bf16 %v7385_v31  ;;  %1722 = vmatpush.bf16.msra.mxu0 %v5580_v17  ;;  %5685 = vmatmul.msk.bf16.vlgmr.msra.gmra.mxu3 %vm396_vm4, %v7949_v25  ;;  %v6926_v17 = vld [vmem:[#allocation2 + $0x1c4] sm:$0xf]  ;;  %v5497_v33 = vld [vmem:[#allocation2 + $0x248] sm:$0xf0]  ;;  %v6976_v52 = vld [vmem:[#allocation2 + $0x354] sm:$0xf] }
 0x4f0   :  { %1586 = vmatmul.bf16.vlgmr.msrb.gmra.mxu2 %v7952_v36  ;;  %v762_v31 = vrot.slane %v7841_v40, 3  ;;  %v5508_v40 = vor.u32 %v6944_v48, %v5505_v12  ;;  %v5500_v58 = vor.u32 %v6942_v50, %v5497_v33  ;;  %v5417_v47 = vld [vmem:[#allocation2 + $0x1a8] sm:$0xf0]  ;;  %v6918_v48 = vld [vmem:[#allocation2 + $0x184] sm:$0xf] }
 0x4f1   :  { %v462_v37 = vsel %vm164_vm3, %v7367_v42, %v7377_v30  ;;  %v775_v60 = vsel %vm164_vm3, %v7366_v43, %v7376_v32  ;;  %1662 = vmatpush.bf16.msrb.mxu3 %v5220_v26  ;;  %1695 = vmatpush.bf16.msrb.mxu2 %v5460_v27  ;;  %v5652_v27 = vor.u32 %v6980_v6, %v5649_v9  ;;  %v5545_v30 = vld [vmem:[#allocation2 + $0x2a8] sm:$0xf0]  ;;  %v449_v42 = vrot.slane %v7737_v55, 3 }
 0x4f2   :  { %v463_v61 = vsel %vm396_vm4, %v462_v37, %v7387_v44  ;;  %v776_v53 = vsel %vm396_vm4, %v775_v60, %v7386_v45  ;;  %v6924_v45 = vld [vmem:[#allocation2 + $0x1b4] sm:$0xf]  ;;  %v5548_v41 = vor.u32 %v6954_v29, %v5545_v30  ;;  %v5644_v55 = vor.u32 %v6978_v35, %v5641_v39  ;;  %v5529_v63 = vld [vmem:[#allocation2 + $0x288] sm:$0xf0]  ;;  %v5473_v30 = vld [vmem:[#allocation2 + $0x218] sm:$0xf0] }
 0x4f3   :  { %v777_v2 = vsel %vm398_vm5, %v776_v53, %v748_v51  ;;  %1723 = vmatpush.bf16.msra.mxu0 %v5572_v38  ;;  %v464_v4 = vsel %vm398_vm5, %v463_v61, %v435_v0  ;;  %v5436_v38 = vor.u32 %v6926_v17, %v5433_v18  ;;  %v6952_v60 = vld [vmem:[#allocation2 + $0x294] sm:$0xf]  ;;  %v5537_v51 = vld [vmem:[#allocation2 + $0x298] sm:$0xf0]  ;;  %v5657_v50 = vld [vmem:[#allocation2 + $0x388] sm:$0xf0] }
 0x4f4   :  { %v795_v1 = vrot.slane %v777_v2, 7  ;;  %v5540_v59 = vor.u32 %v6952_v60, %v5537_v51  ;;  %v6940_v0 = vld [vmem:[#allocation2 + $0x234] sm:$0xf]  ;;  %v5489_v2 = vld [vmem:[#allocation2 + $0x238] sm:$0xf0] }
 0x4f5   :  { %1663 = vmatpush.bf16.msrb.mxu3 %v5212_v49  ;;  %1696 = vmatpush.bf16.msrb.mxu2 %v5452_v10  ;;  %v5425_v49 = vld [vmem:[#allocation2 + $0x1b8] sm:$0xf0]  ;;  %v5492_v9 = vor.u32 %v6940_v0, %v5489_v2  ;;  %v6936_v29 = vld [vmem:[#allocation2 + $0x214] sm:$0xf]  ;;  %v6137_v51 = vld [vmem:[#allocation5 + $0x380] sm:$0xf] }
 0x4f6   :  { %v7390_v14 = vpop.permute.xlu1 %7389  ;;  %v7400_v15 = vpop.permute.xlu0 %7399  ;;  %v812_v56 = vsel %vm806_vm6, %v464_v4, %v795_v1  ;;  %v5428_v53 = vor.u32 %v6924_v45, %v5425_v49  ;;  %v6974_v1 = vld [vmem:[#allocation2 + $0x344] sm:$0xf]  ;;  %v5625_v4 = vld [vmem:[#allocation2 + $0x348] sm:$0xf0]  ;;  %v5617_v18 = vld [vmem:[#allocation2 + $0x338] sm:$0xf0] }
 0x4f7   :  { %v7392_v19 = vunpack.i.h.bf16 %v7390_v14  ;;  %v7391_v21 = vunpack.i.l.bf16 %v7390_v14  ;;  %v7402_v23 = vunpack.i.h.bf16 %v7400_v15  ;;  %v7401_v24 = vunpack.i.l.bf16 %v7400_v15  ;;  %1724 = vmatpush.bf16.msra.mxu0 %v5564_v3  ;;  %v5409_v14 = vld [vmem:[#allocation2 + $0x198] sm:$0xf0]  ;;  %v5465_v45 = vld [vmem:[#allocation2 + $0x208] sm:$0xf0]  ;;  %v6982_v49 = vld [vmem:[#allocation2 + $0x384] sm:$0xf] }
 0x4f8   :  { %v7966_v26 = vpack.c.bf16 %v812_v56, %v812_v56  ;;  %v5628_v15 = vor.u32 %v6974_v1, %v5625_v4  ;;  %v5481_v56 = vld [vmem:[#allocation2 + $0x228] sm:$0xf0]  ;;  %v5665_v35 = vld [vmem:[#allocation2 + $0x398] sm:$0xf0]  ;;  %v7078_v0 = vld [vmem:[#allocation5 + $0x2bc] sm:$0xf0] }
 0x4f9   :  { %1708 = vmatpush.bf16.msra.mxu3 %v5524_v54  ;;  %v465_v32 = vsel %vm164_vm3, %v7392_v19, %v7397_v11  ;;  %v778_v22 = vsel %vm164_vm3, %v7391_v21, %v7396_v13  ;;  %1697 = vmatpush.bf16.msrb.mxu2 %v5444_v7  ;;  %v6922_v54 = vld [vmem:[#allocation2 + $0x1a4] sm:$0xf]  ;;  %v6988_v7 = vld [vmem:[#allocation2 + $0x3b4] sm:$0xf]  ;;  %v5532_v11 = vor.u32 %v6950_v20, %v5529_v63  ;;  %v5673_v21 = vld [vmem:[#allocation2 + $0x3a8] sm:$0xf0] }
 0x4fa   :  { %v466_v43 = vsel %vm396_vm4, %v465_v32, %v7402_v23  ;;  %v779_v44 = vsel %vm396_vm4, %v778_v22, %v7401_v24  ;;  %1625 = vmatmul.bf16.vlgmr.msra.gmra.mxu1 %v7966_v26  ;;  %1677 = vmatmul.bf16.vlgmr.msrb.gmra.mxu0 %v7901_v5  ;;  %v5633_v5 = vld [vmem:[#allocation2 + $0x358] sm:$0xf0]  ;;  %v5420_v6 = vor.u32 %v6922_v54, %v5417_v47  ;;  %v6920_v13 = vld [vmem:[#allocation2 + $0x194] sm:$0xf]  ;;  %v6986_v19 = vld [vmem:[#allocation2 + $0x3a4] sm:$0xf] }
 0x4fb   :  { %v780_v46 = vsel %vm398_vm5, %v779_v44, %v762_v31  ;;  %1725 = vmatpush.bf16.msra.mxu0 %v5556_v16  ;;  %1734 = vmatpush.bf16.msra.mxu1 %v5652_v27  ;;  %v467_v10 = vsel %vm398_vm5, %v466_v43, %v449_v42  ;;  %v5636_v3 = vor.u32 %v6976_v52, %v5633_v5  ;;  %v6972_v16 = vld [vmem:[#allocation2 + $0x334] sm:$0xf]  ;;  %v5401_v27 = vld [vmem:[#allocation2 + $0x188] sm:$0xf0]  ;;  %v6970_v32 = vld [vmem:[#allocation2 + $0x324] sm:$0xf] }
 0x4fc   :  { %v796_v37 = vrot.slane %v780_v46, 7  ;;  %v5412_v23 = vor.u32 %v6920_v13, %v5409_v14  ;;  %v5620_v12 = vor.u32 %v6972_v16, %v5617_v18  ;;  %v5676_v22 = vor.u32 %v6986_v19, %v5673_v21  ;;  %v5609_v31 = vld [vmem:[#allocation2 + $0x328] sm:$0xf0]  ;;  %v6934_v44 = vld [vmem:[#allocation2 + $0x204] sm:$0xf] }
 0x4fd   :  { %1709 = vmatpush.bf16.msra.mxu3 %v5516_v8  ;;  %1698 = vmatpush.bf16.msrb.mxu2 %v5436_v38  ;;  %v5681_v8 = vld [vmem:[#allocation2 + $0x3b8] sm:$0xf0]  ;;  %v6984_v38 = vld [vmem:[#allocation2 + $0x394] sm:$0xf]  ;;  %v5404_v39 = vor.u32 %v6918_v48, %v5401_v27  ;;  %v5476_v42 = vor.u32 %v6936_v29, %v5473_v30  ;;  %v5612_v43 = vor.u32 %v6970_v32, %v5609_v31  ;;  %v7102_v52 = vld [vmem:[#allocation5 + $0x384] sm:$0xf] }
 0x4fe   :  { %v813_v61 = vsel %vm806_vm6, %v467_v10, %v796_v37  ;;  %v5684_v17 = vor.u32 %v6988_v7, %v5681_v8  ;;  %v6968_v46 = vld [vmem:[#allocation2 + $0x314] sm:$0xf]  ;;  %v5468_v33 = vor.u32 %v6934_v44, %v5465_v45  ;;  %v6966_v37 = vld [vmem:[#allocation2 + $0x304] sm:$0xf]  ;;  %v7110_v10 = vld [vmem:[#allocation5 + $0x3bc] sm:$0xf0] }
 0x4ff   :  { %1726 = vmatpush.bf16.msra.mxu0 %v5548_v41  ;;  %v7979_v57 = vpack.c.bf16 %v813_v61, %v813_v61  ;;  %1735 = vmatpush.bf16.msra.mxu1 %v5644_v55  ;;  %v5601_v41 = vld [vmem:[#allocation2 + $0x318] sm:$0xf0]  ;;  %v5593_v55 = vld [vmem:[#allocation2 + $0x308] sm:$0xf0]  ;;  %v6138_v5 = vor.u32 %v7110_v10, %v6137_v51  ;;  %v6139_v61 = vld [vmem:[#allocation5 + $0x3c0] sm:$0xf0] }
 0x500   :  { %1664 = vmatmul.bf16.vlgmr.msrb.gmra.mxu3 %v7889_v28  ;;  %v6938_v28 = vld [vmem:[#allocation2 + $0x224] sm:$0xf]  ;;  %v5596_v60 = vor.u32 %v6966_v37, %v5593_v55  ;;  %v7094_v54 = vld [vmem:[#allocation5 + $0x33c] sm:$0xf0]  ;;  %v6145_v55 = vld [vmem:[#allocation5 + $0x388] sm:$0xf] }
 0x501   :  { %1710 = vmatpush.bf16.msra.mxu3 %v5508_v40  ;;  %1638 = vmatmul.bf16.vlgmr.msra.gmra.mxu2 %v7979_v57  ;;  %v5484_v24 = vor.u32 %v6938_v28, %v5481_v56  ;;  %v5668_v40 = vor.u32 %v6984_v38, %v5665_v35  ;;  %v6075_v47 = vld [vmem:[#allocation5 + $0x340] sm:$0xf0]  ;;  %v5945_v63 = vld [vmem:[#allocation5 + $0x200] sm:$0xf]  ;;  %v7111_v51 = vld [vmem:[#allocation5 + $0x3c4] sm:$0xf0] }
 0x502   :  { %1699 = vmatpush.bf16.msrb.mxu2 %v5428_v53  ;;  %v6142_v53 = vor.u32 %v7102_v52, %v6139_v61  ;;  %v7062_v1 = vld [vmem:[#allocation5 + $0x23c] sm:$0xf0]  ;;  %v7054_v4 = vld [vmem:[#allocation5 + $0x204] sm:$0xf]  ;;  %v7103_v10 = vld [vmem:[#allocation5 + $0x38c] sm:$0xf] }
 0x503   :  { %1727 = vmatpush.bf16.msra.mxu0 %v5540_v59  ;;  %1736 = vmatpush.bf16.msra.mxu1 %v5636_v3  ;;  %v7070_v3 = vld [vmem:[#allocation5 + $0x284] sm:$0xf]  ;;  %v5946_v8 = vor.u32 %v7062_v1, %v5945_v63  ;;  %v5817_v16 = vld [vmem:[#allocation5 + $0x100] sm:$0xf]  ;;  %v6147_v52 = vld [vmem:[#allocation5 + $0x3c8] sm:$0xf0] }
 0x504   :  { %v5947_v7 = vld [vmem:[#allocation5 + $0x240] sm:$0xf0]  ;;  %v6649_v27 = vld [vmem:[#allocation5 + $0x780] sm:$0xf]  ;;  %v6150_v61 = vor.u32 %v7103_v10, %v6147_v52 }
 0x505   :  { %1711 = vmatpush.bf16.msra.mxu3 %v5500_v58  ;;  %v7086_v58 = vld [vmem:[#allocation5 + $0x304] sm:$0xf]  ;;  %v5689_v44 = vld [vmem:[#allocation5] sm:$0xf] }
 0x506   :  { %1700 = vmatpush.bf16.msrb.mxu2 %v5420_v6  ;;  %v6078_v2 = vor.u32 %v7086_v58, %v6075_v47  ;;  %v5950_v6 = vor.u32 %v7054_v4, %v5947_v7  ;;  %v7038_v13 = vld [vmem:[#allocation5 + $0x184] sm:$0xf]  ;;  %v6998_v45 = vld [vmem:[#allocation5 + $0x3c] sm:$0xf0]  ;;  %v6081_v47 = vld [vmem:[#allocation5 + $0x308] sm:$0xf] }
 0x507   :  { %1728 = vmatpush.bf16.msra.mxu0 %v5532_v11  ;;  %1737 = vmatpush.bf16.msra.mxu1 %v5628_v15  ;;  %v7046_v11 = vld [vmem:[#allocation5 + $0x1bc] sm:$0xf0]  ;;  %v5883_v14 = vld [vmem:[#allocation5 + $0x1c0] sm:$0xf0] }
 0x508   :  { %v5886_v28 = vor.u32 %v7038_v13, %v5883_v14  ;;  %v7022_v18 = vld [vmem:[#allocation5 + $0x104] sm:$0xf]  ;;  %v6457_v63 = vld [vmem:[#allocation5 + $0x600] sm:$0xf]  ;;  %v7071_v14 = vld [vmem:[#allocation5 + $0x28c] sm:$0xf] }
 0x509   :  { %1712 = vmatpush.bf16.msra.mxu3 %v5492_v9  ;;  %v5881_v9 = vld [vmem:[#allocation5 + $0x180] sm:$0xf]  ;;  %v5819_v21 = vld [vmem:[#allocation5 + $0x140] sm:$0xf0] }
 0x50a   :  { %1690 = vmatmul.bf16.vlgmr.msrb.gmra.mxu1 %v7952_v36  ;;  %1729 = vmatmul.bf16.vlgmr.msra.gmra.mxu0 %v7966_v26  ;;  %v5604_v36 = vor.u32 %v6968_v46, %v5601_v41  ;;  %v5660_v26 = vor.u32 %v6982_v49, %v5657_v50  ;;  %v5882_v15 = vor.u32 %v7046_v11, %v5881_v9  ;;  %v7006_v29 = vld [vmem:[#allocation5 + $0x84] sm:$0xf]  ;;  %v6585_v46 = vld [vmem:[#allocation5 + $0x700] sm:$0xf]  ;;  %v7079_v9 = vld [vmem:[#allocation5 + $0x2c4] sm:$0xf0] }
 0x50b   :  { %1751 = vmatpush.bf16.msrb.mxu0 %v5684_v17  ;;  %1701 = vmatpush.bf16.msrb.mxu2 %v5412_v23  ;;  %v7030_v17 = vld [vmem:[#allocation5 + $0x13c] sm:$0xf0]  ;;  %v5822_v48 = vor.u32 %v7022_v18, %v5819_v21  ;;  %v7230_v31 = vld [vmem:[#allocation5 + $0x784] sm:$0xf] }
 0x50c   :  { %1738 = vmatpush.bf16.msra.mxu1 %v5620_v12  ;;  %v5818_v19 = vor.u32 %v7030_v17, %v5817_v16  ;;  %v5753_v23 = vld [vmem:[#allocation5 + $0x80] sm:$0xf]  ;;  %v6651_v38 = vld [vmem:[#allocation5 + $0x7c0] sm:$0xf0] }
 0x50d   :  { %1713 = vmatpush.bf16.msra.mxu3 %v5484_v24  ;;  %v7014_v24 = vld [vmem:[#allocation5 + $0xbc] sm:$0xf0]  ;;  %v6990_v49 = vld [vmem:[#allocation5 + $0x4] sm:$0xf] }
 0x50e   :  { %v7238_v12 = vld [vmem:[#allocation5 + $0x7bc] sm:$0xf0]  ;;  %v5754_v30 = vor.u32 %v7014_v24, %v5753_v23  ;;  %v5691_v50 = vld [vmem:[#allocation5 + $0x40] sm:$0xf0]  ;;  %v5953_v24 = vld [vmem:[#allocation5 + $0x208] sm:$0xf] }
 0x50f   :  { %1752 = vmatpush.bf16.msrb.mxu0 %v5676_v22  ;;  %1702 = vmatpush.bf16.msrb.mxu2 %v5404_v39  ;;  %v6650_v32 = vor.u32 %v7238_v12, %v6649_v27  ;;  %v5755_v22 = vld [vmem:[#allocation5 + $0xc0] sm:$0xf0]  ;;  %v6654_v39 = vor.u32 %v7230_v31, %v6651_v38  ;;  %v7222_v41 = vld [vmem:[#allocation5 + $0x73c] sm:$0xf0] }
 0x510   :  { %1739 = vmatpush.bf16.msra.mxu1 %v5612_v43  ;;  %v5758_v35 = vor.u32 %v7006_v29, %v5755_v22  ;;  %v6587_v37 = vld [vmem:[#allocation5 + $0x740] sm:$0xf0]  ;;  %v7190_v1 = vld [vmem:[#allocation5 + $0x63c] sm:$0xf0]  ;;  %v7055_v29 = vld [vmem:[#allocation5 + $0x20c] sm:$0xf] }
 0x511   :  { %1714 = vmatpush.bf16.msra.mxu3 %v5476_v42  ;;  %v7182_v4 = vld [vmem:[#allocation5 + $0x604] sm:$0xf]  ;;  %v6458_v7 = vor.u32 %v7190_v1, %v6457_v63  ;;  %v6393_v17 = vld [vmem:[#allocation5 + $0x580] sm:$0xf]  ;;  %v7007_v63 = vld [vmem:[#allocation5 + $0x8c] sm:$0xf] }
 0x512   :  { %1703 = vmatmul.bf16.vlgmr.msrb.gmra.mxu2 %v7915_v34  ;;  %v6073_v34 = vld [vmem:[#allocation5 + $0x300] sm:$0xf]  ;;  %v6395_v23 = vld [vmem:[#allocation5 + $0x5c0] sm:$0xf0] }
 0x513   :  { %1753 = vmatpush.bf16.msrb.mxu0 %v5668_v40  ;;  %3336 = vmatpush.bf16.msra.mxu2 %v6138_v5  ;;  %v6074_v59 = vor.u32 %v7094_v54, %v6073_v34  ;;  %v5690_v40 = vor.u32 %v6998_v45, %v5689_v44  ;;  %v6146_v5 = vor.u32 %v7111_v51, %v6145_v55  ;;  %v7206_v34 = vld [vmem:[#allocation5 + $0x6bc] sm:$0xf0]  ;;  %v7198_v54 = vld [vmem:[#allocation5 + $0x684] sm:$0xf]  ;;  %v7047_v44 = vld [vmem:[#allocation5 + $0x1c4] sm:$0xf0] }
 0x514   :  { %1740 = vmatpush.bf16.msra.mxu1 %v5604_v36  ;;  %v5694_v36 = vor.u32 %v6990_v49, %v5691_v50  ;;  %v7174_v18 = vld [vmem:[#allocation5 + $0x5bc] sm:$0xf0]  ;;  %v7150_v38 = vld [vmem:[#allocation5 + $0x504] sm:$0xf]  ;;  %v7031_v51 = vld [vmem:[#allocation5 + $0x144] sm:$0xf0] }
 0x515   :  { %1715 = vmatpush.bf16.msra.mxu3 %v5468_v33  ;;  %v6586_v33 = vor.u32 %v7222_v41, %v6585_v46  ;;  %v6394_v21 = vor.u32 %v7174_v18, %v6393_v17  ;;  %v6329_v22 = vld [vmem:[#allocation5 + $0x500] sm:$0xf]  ;;  %v5891_v41 = vld [vmem:[#allocation5 + $0x1c8] sm:$0xf0]  ;;  %v6267_v55 = vld [vmem:[#allocation5 + $0x4c0] sm:$0xf0] }
 0x516   :  { %v7158_v31 = vld [vmem:[#allocation5 + $0x53c] sm:$0xf0]  ;;  %v7223_v17 = vld [vmem:[#allocation5 + $0x744] sm:$0xf0]  ;;  %v6991_v18 = vld [vmem:[#allocation5 + $0xc] sm:$0xf] }
 0x517   :  { %1754 = vmatpush.bf16.msrb.mxu0 %v5660_v26  ;;  %3337 = vmatpush.bf16.msra.mxu2 %v6074_v59  ;;  %v7214_v26 = vld [vmem:[#allocation5 + $0x704] sm:$0xf] }
 0x518   :  { %1716 = vmatmul.bf16.vlgmr.msra.gmra.mxu3 %v7938_v62  ;;  %1741 = vmatpush.bf16.msra.mxu1 %v5596_v60  ;;  %v6009_v62 = vld [vmem:[#allocation5 + $0x280] sm:$0xf]  ;;  %v6590_v60 = vor.u32 %v7214_v26, %v6587_v37  ;;  %v6523_v59 = vld [vmem:[#allocation5 + $0x6c0] sm:$0xf0] }
 0x519   :  { %3349 = vmatpush.bf16.msrb.mxu3 %v6650_v32  ;;  %v7134_v26 = vld [vmem:[#allocation5 + $0x484] sm:$0xf] }
 0x51a   :  { %5686 = vmatmul.msk.bf16.vlgmr.msrb.gmra.mxu0 %vm396_vm4, %v7949_v25  ;;  %v6011_v25 = vld [vmem:[#allocation5 + $0x2c0] sm:$0xf0]  ;;  %v6270_v10 = vor.u32 %v7134_v26, %v6267_v55  ;;  %v6401_v55 = vld [vmem:[#allocation5 + $0x588] sm:$0xf] }
 0x51b   :  { %1742 = vmatmul.bf16.vlgmr.msra.gmra.mxu1 %v7979_v57  ;;  %3362 = vmatpush.bf16.msra.mxu0 %v6142_v53  ;;  %v6010_v57 = vor.u32 %v7078_v0, %v6009_v62  ;;  %v6014_v20 = vor.u32 %v7070_v3, %v6011_v25  ;;  %v6521_v53 = vld [vmem:[#allocation5 + $0x680] sm:$0xf]  ;;  %v7095_v62 = vld [vmem:[#allocation5 + $0x344] sm:$0xf0]  ;;  %v6526_v0 = vor.u32 %v7198_v54, %v6523_v59  ;;  %v7087_v3 = vld [vmem:[#allocation5 + $0x30c] sm:$0xf] }
 0x51c   :  { %3375 = vmatpush.bf16.msrb.mxu1 %v6654_v39  ;;  %v6522_v58 = vor.u32 %v7206_v34, %v6521_v53  ;;  %v6083_v25 = vld [vmem:[#allocation5 + $0x348] sm:$0xf0]  ;;  %v6331_v39 = vld [vmem:[#allocation5 + $0x540] sm:$0xf0]  ;;  %v6201_v54 = vld [vmem:[#allocation5 + $0x400] sm:$0xf] }
 0x51d   :  { %3338 = vmatpush.bf16.msra.mxu2 %v6010_v57  ;;  %3350 = vmatpush.bf16.msrb.mxu3 %v6586_v33  ;;  %v6334_v45 = vor.u32 %v7150_v38, %v6331_v39  ;;  %v6265_v33 = vld [vmem:[#allocation5 + $0x480] sm:$0xf]  ;;  %v7118_v59 = vld [vmem:[#allocation5 + $0x404] sm:$0xf]  ;;  %v6531_v38 = vld [vmem:[#allocation5 + $0x6c8] sm:$0xf0] }
 0x51f   :  { %3363 = vmatpush.bf16.msra.mxu0 %v6078_v2  ;;  %v6082_v2 = vor.u32 %v7095_v62, %v6081_v47  ;;  %v6203_v62 = vld [vmem:[#allocation5 + $0x440] sm:$0xf0] }
 0x520   :  { %3376 = vmatpush.bf16.msrb.mxu1 %v6590_v60  ;;  %v5825_v60 = vld [vmem:[#allocation5 + $0x108] sm:$0xf] }
 0x521   :  { %3339 = vmatpush.bf16.msra.mxu2 %v5946_v8  ;;  %3351 = vmatpush.bf16.msrb.mxu3 %v6522_v58  ;;  %v6459_v8 = vld [vmem:[#allocation5 + $0x640] sm:$0xf0]  ;;  %v5826_v52 = vor.u32 %v7031_v51, %v5825_v60  ;;  %v7126_v58 = vld [vmem:[#allocation5 + $0x43c] sm:$0xf0]  ;;  %v7175_v60 = vld [vmem:[#allocation5 + $0x5c4] sm:$0xf0] }
 0x522   :  { %v6462_v11 = vor.u32 %v7182_v4, %v6459_v8  ;;  %v6202_v47 = vor.u32 %v7126_v58, %v6201_v54  ;;  %v5763_v4 = vld [vmem:[#allocation5 + $0xc8] sm:$0xf0]  ;;  %v7159_v54 = vld [vmem:[#allocation5 + $0x544] sm:$0xf0] }
 0x523   :  { %3364 = vmatpush.bf16.msra.mxu0 %v6014_v20  ;;  %v6086_v20 = vor.u32 %v7087_v3, %v6083_v25  ;;  %v6206_v3 = vor.u32 %v7118_v59, %v6203_v62  ;;  %v6659_v8 = vld [vmem:[#allocation5 + $0x7c8] sm:$0xf0] }
 0x524   :  { %3377 = vmatpush.bf16.msrb.mxu1 %v6526_v0  ;;  %v5761_v0 = vld [vmem:[#allocation5 + $0x88] sm:$0xf]  ;;  %v7167_v51 = vld [vmem:[#allocation5 + $0x58c] sm:$0xf] }
 0x525   :  { %3340 = vmatpush.bf16.msra.mxu2 %v5882_v15  ;;  %v6019_v15 = vld [vmem:[#allocation5 + $0x2c8] sm:$0xf0]  ;;  %3352 = vmatpush.bf16.msrb.mxu3 %v6458_v7 }
 0x526   :  { %v7231_v7 = vld [vmem:[#allocation5 + $0x78c] sm:$0xf] }
 0x527   :  { %3365 = vmatpush.bf16.msra.mxu0 %v5950_v6  ;;  %v6017_v6 = vld [vmem:[#allocation5 + $0x288] sm:$0xf]  ;;  %v7151_v58 = vld [vmem:[#allocation5 + $0x50c] sm:$0xf] }
 0x528   :  { %v6018_v13 = vor.u32 %v7079_v9, %v6017_v6  ;;  %3378 = vmatpush.bf16.msrb.mxu1 %v6462_v11  ;;  %v8001_v6 = vld [vmem:[%s9188_s5] sm:$0x3]  ;;  %v5766_v9 = vor.u32 %v7007_v63, %v5763_v4  ;;  %v6662_v11 = vor.u32 %v7231_v7, %v6659_v8 }
 0x529   :  { %3341 = vmatpush.bf16.msra.mxu2 %v5818_v19  ;;  %v7166_v19 = vld [vmem:[#allocation5 + $0x584] sm:$0xf]  ;;  %3353 = vmatpush.bf16.msrb.mxu3 %v6394_v21 }
 0x52a   :  { %v6398_v27 = vor.u32 %v7166_v19, %v6395_v23  ;;  %v5699_v19 = vld [vmem:[#allocation5 + $0x48] sm:$0xf0] }
 0x52b   :  { %3366 = vmatpush.bf16.msra.mxu0 %v5886_v28  ;;  %v6022_v28 = vor.u32 %v7071_v14, %v6019_v15  ;;  %v6999_v14 = vld [vmem:[#allocation5 + $0x44] sm:$0xf0]  ;;  %v5702_v23 = vor.u32 %v6991_v18, %v5699_v19 }
 0x52c   :  { %3379 = vmatpush.bf16.msrb.mxu1 %v6398_v27  ;;  %v6593_v15 = vld [vmem:[#allocation5 + $0x708] sm:$0xf]  ;;  %v945_v27 = vperm.slane %v8001_v6, 0 }
 0x52d   :  { %3342 = vmatpush.bf16.msra.mxu2 %v5754_v30  ;;  %v5955_v30 = vld [vmem:[#allocation5 + $0x248] sm:$0xf0]  ;;  %v6594_v21 = vor.u32 %v7223_v17, %v6593_v15 }
 0x52e   :  { %v5958_v32 = vor.u32 %v7055_v29, %v5955_v30  ;;  %v6529_v30 = vld [vmem:[#allocation5 + $0x688] sm:$0xf] }
 0x52f   :  { %3367 = vmatpush.bf16.msra.mxu0 %v5822_v48  ;;  %v7063_v48 = vld [vmem:[#allocation5 + $0x244] sm:$0xf0] }
 0x530   :  { %v5954_v12 = vor.u32 %v7063_v48, %v5953_v24  ;;  %3380 = vmatpush.bf16.msrb.mxu1 %v6334_v45  ;;  %v7215_v24 = vld [vmem:[#allocation5 + $0x70c] sm:$0xf]  ;;  %v6465_v45 = vld [vmem:[#allocation5 + $0x608] sm:$0xf] }
 0x531   :  { %3343 = vmatpush.bf16.msra.mxu2 %v5690_v40  ;;  %v7039_v40 = vld [vmem:[#allocation5 + $0x18c] sm:$0xf] }
 0x532   :  { %v5894_v49 = vor.u32 %v7039_v40, %v5891_v41  ;;  %v6595_v48 = vld [vmem:[#allocation5 + $0x748] sm:$0xf0] }
 0x533   :  { %3368 = vmatpush.bf16.msra.mxu0 %v5758_v35  ;;  %v6330_v35 = vor.u32 %v7158_v31, %v6329_v22  ;;  %v6598_v29 = vor.u32 %v7215_v24, %v6595_v48  ;;  %v7199_v22 = vld [vmem:[#allocation5 + $0x68c] sm:$0xf]  ;;  %v7104_v24 = vld [vmem:[#allocation5 + $0x394] sm:$0xf] }
 0x534   :  { %3381 = vmatpush.bf16.msrb.mxu1 %v6270_v10  ;;  %v6534_v39 = vor.u32 %v7199_v22, %v6531_v38  ;;  %v7183_v40 = vld [vmem:[#allocation5 + $0x60c] sm:$0xf]  ;;  %v6155_v48 = vld [vmem:[#allocation5 + $0x3d0] sm:$0xf0]  ;;  %v7096_v38 = vld [vmem:[#allocation5 + $0x34c] sm:$0xf0] }
 0x535   :  { %3388 = vmatpush.bf16.msrb.mxu2 %v6146_v5  ;;  %3354 = vmatpush.bf16.msrb.mxu3 %v6330_v35  ;;  %v7023_v5 = vld [vmem:[#allocation5 + $0x10c] sm:$0xf] }
 0x536   :  { %v6403_v10 = vld [vmem:[#allocation5 + $0x5c8] sm:$0xf0] }
 0x537   :  { %3369 = vmatpush.bf16.msra.mxu0 %v5694_v36  ;;  %v7142_v36 = vld [vmem:[#allocation5 + $0x4bc] sm:$0xf0] }
 0x538   :  { %v6266_v37 = vor.u32 %v7142_v36, %v6265_v33  ;;  %3382 = vmatpush.bf16.msrb.mxu1 %v6206_v3 }
 0x539   :  { %3389 = vmatpush.bf16.msrb.mxu2 %v6082_v2  ;;  %v7015_v2 = vld [vmem:[#allocation5 + $0xc4] sm:$0xf0] }
 0x53a   :  { %3355 = vmatpush.bf16.msrb.mxu3 %v6266_v37  ;;  %v5762_v25 = vor.u32 %v7015_v2, %v5761_v0 }
 0x53b   :  { %3414 = vmatpush.bf16.msrb.mxu0 %v6150_v61  ;;  %v5827_v61 = vld [vmem:[#allocation5 + $0x148] sm:$0xf0] }
 0x53c   :  { %v5830_v53 = vor.u32 %v7023_v5, %v5827_v61  ;;  %3427 = vmatpush.bf16.msra.mxu1 %v6662_v11  ;;  %v6406_v5 = vor.u32 %v7167_v51, %v6403_v10  ;;  %v7127_v11 = vld [vmem:[#allocation5 + $0x444] sm:$0xf0]  ;;  %v7064_v51 = vld [vmem:[#allocation5 + $0x24c] sm:$0xf0]  ;;  %v5963_v10 = vld [vmem:[#allocation5 + $0x250] sm:$0xf0] }
 0x53d   :  { %3390 = vmatpush.bf16.msrb.mxu2 %v6018_v13  ;;  %v5697_v13 = vld [vmem:[#allocation5 + $0x8] sm:$0xf] }
 0x53e   :  { %3356 = vmatpush.bf16.msrb.mxu3 %v6202_v47  ;;  %v6339_v47 = vld [vmem:[#allocation5 + $0x548] sm:$0xf0] }
 0x53f   :  { %3415 = vmatpush.bf16.msrb.mxu0 %v6086_v20  ;;  %v7239_v20 = vld [vmem:[#allocation5 + $0x7c4] sm:$0xf0]  ;;  %v6342_v62 = vor.u32 %v7151_v58, %v6339_v47  ;;  %v7048_v58 = vld [vmem:[#allocation5 + $0x1cc] sm:$0xf0]  ;;  %v5899_v47 = vld [vmem:[#allocation5 + $0x1d0] sm:$0xf0] }
 0x540   :  { %3428 = vmatpush.bf16.msra.mxu1 %v6598_v29 }
 0x541   :  { %3391 = vmatpush.bf16.msrb.mxu2 %v5954_v12 }
 0x543   :  { %3416 = vmatpush.bf16.msrb.mxu0 %v6022_v28  ;;  %v5698_v28 = vor.u32 %v6999_v14, %v5697_v13  ;;  %v7119_v13 = vld [vmem:[#allocation5 + $0x40c] sm:$0xf] }
 0x544   :  { %3429 = vmatpush.bf16.msra.mxu1 %v6534_v39  ;;  %v7088_v39 = vld [vmem:[#allocation5 + $0x314] sm:$0xf] }
 0x546   :  { %v7990_v56 = vpop.f32.mrf.mxu0 }
 0x547   :  { %3417 = vmatpush.bf16.msrb.mxu0 %v5958_v32  ;;  %v7207_v32 = vld [vmem:[#allocation5 + $0x6c4] sm:$0xf0] }
 0x548   :  { %v6530_v31 = vor.u32 %v7207_v32, %v6529_v30  ;;  %v6158_v30 = vor.u32 %v7104_v24, %v6155_v48  ;;  %v6089_v32 = vld [vmem:[#allocation5 + $0x310] sm:$0xf]  ;;  %v6667_v24 = vld [vmem:[#allocation5 + $0x7d0] sm:$0xf0] }
 0x54b   :  { %3418 = vmatpush.bf16.msrb.mxu0 %v5894_v49 }
 0x54e   :  { %v1563_v42 = vpop.f32.mrf.mxu0  ;;  %v7992_v43 = vpop.f32.mrf.mxu1 }
 0x54f   :  { %v5889_v42 = vld [vmem:[#allocation5 + $0x188] sm:$0xf]  ;;  %3419 = vmatpush.bf16.msrb.mxu0 %v5830_v53 }
 0x550   :  { %v5890_v46 = vor.u32 %v7047_v44, %v5889_v42  ;;  %v1562_v42 = vadd.f32 %v7990_v56, %v945_v27  ;;  %v6402_v56 = vor.u32 %v7175_v60, %v6401_v55  ;;  %v6337_v53 = vld [vmem:[#allocation5 + $0x508] sm:$0xf]  ;;  %v5961_v60 = vld [vmem:[#allocation5 + $0x210] sm:$0xf] }
 0x551   :  { %v6338_v59 = vor.u32 %v7159_v54, %v6337_v53  ;;  %v5897_v53 = vld [vmem:[#allocation5 + $0x190] sm:$0xf] }
 0x552   :  { %3392 = vmatpush.bf16.msrb.mxu2 %v5890_v46  ;;  %v7191_v46 = vld [vmem:[#allocation5 + $0x644] sm:$0xf0]  ;;  %v1575_v41 = vadd.f32 %v7992_v43, %v1562_v42  ;;  %v6091_v42 = vld [vmem:[#allocation5 + $0x350] sm:$0xf0] }
 0x553   :  { %3420 = vmatpush.bf16.msrb.mxu0 %v5766_v9  ;;  %v6466_v49 = vor.u32 %v7191_v46, %v6465_v45  ;;  %v6209_v9 = vld [vmem:[#allocation5 + $0x408] sm:$0xf]  ;;  %v6090_v45 = vor.u32 %v7096_v38, %v6089_v32  ;;  %v6025_v46 = vld [vmem:[#allocation5 + $0x290] sm:$0xf] }
 0x554   :  { %v6210_v15 = vor.u32 %v7127_v11, %v6209_v9  ;;  %v6601_v32 = vld [vmem:[#allocation5 + $0x710] sm:$0xf] }
 0x556   :  { %v1576_v57 = vpop.f32.mrf.mxu1  ;;  %3393 = vmatpush.bf16.msrb.mxu2 %v5826_v52 }
 0x557   :  { %v6657_v57 = vld [vmem:[#allocation5 + $0x788] sm:$0xf]  ;;  %3421 = vmatpush.bf16.msrb.mxu0 %v5702_v23  ;;  %v7112_v23 = vld [vmem:[#allocation5 + $0x3cc] sm:$0xf0] }
 0x558   :  { %v6658_v1 = vor.u32 %v7239_v20, %v6657_v57  ;;  %v7143_v57 = vld [vmem:[#allocation5 + $0x4c4] sm:$0xf0]  ;;  %v7135_v20 = vld [vmem:[#allocation5 + $0x48c] sm:$0xf] }
 0x55a   :  { %3401 = vmatpush.bf16.msra.mxu3 %v6658_v1  ;;  %3394 = vmatpush.bf16.msrb.mxu2 %v5762_v25  ;;  %v6273_v25 = vld [vmem:[#allocation5 + $0x488] sm:$0xf]  ;;  %v6275_v1 = vld [vmem:[#allocation5 + $0x4c8] sm:$0xf0] }
 0x55b   :  { %v7994_v16 = vpop.f32.mrf.mxu3  ;;  %v6274_v63 = vor.u32 %v7143_v57, %v6273_v25  ;;  %v5833_v57 = vld [vmem:[#allocation5 + $0x110] sm:$0xf] }
 0x55e   :  { %3402 = vmatpush.bf16.msra.mxu3 %v6594_v21  ;;  %3395 = vmatpush.bf16.msrb.mxu2 %v5698_v28  ;;  %v6153_v28 = vld [vmem:[#allocation5 + $0x390] sm:$0xf] }
 0x55f   :  { %v6154_v29 = vor.u32 %v7112_v23, %v6153_v28  ;;  %v6665_v28 = vld [vmem:[#allocation5 + $0x790] sm:$0xf]  ;;  %v7232_v23 = vld [vmem:[#allocation5 + $0x794] sm:$0xf] }
 0x562   :  { %3403 = vmatpush.bf16.msra.mxu3 %v6530_v31 }
 0x563   :  { %v1602_v50 = vpop.f32.mrf.mxu3 }
 0x564   :  { %v6467_v50 = vld [vmem:[#allocation5 + $0x648] sm:$0xf0] }
 0x565   :  { %v6470_v33 = vor.u32 %v7183_v40, %v6467_v50  ;;  %v7072_v50 = vld [vmem:[#allocation5 + $0x294] sm:$0xf] }
 0x566   :  { %3404 = vmatpush.bf16.msra.mxu3 %v6466_v49  ;;  %v7080_v49 = vld [vmem:[#allocation5 + $0x2cc] sm:$0xf0] }
 0x567   :  { %v7996_v34 = vpop.f32.mrf.mxu0  ;;  %3430 = vmatpush.bf16.msra.mxu1 %v6470_v33  ;;  %v6027_v33 = vld [vmem:[#allocation5 + $0x2d0] sm:$0xf0] }
 0x568   :  { %v6030_v55 = vor.u32 %v7072_v50, %v6027_v33 }
 0x56a   :  { %3405 = vmatpush.bf16.msra.mxu3 %v6402_v56  ;;  %v7056_v56 = vld [vmem:[#allocation5 + $0x214] sm:$0xf] }
 0x56b   :  { %3431 = vmatpush.bf16.msra.mxu1 %v6406_v5 }
 0x56e   :  { %3406 = vmatpush.bf16.msra.mxu3 %v6338_v59  ;;  %v7040_v59 = vld [vmem:[#allocation5 + $0x194] sm:$0xf] }
 0x56f   :  { %v1615_v12 = vpop.f32.mrf.mxu0  ;;  %3432 = vmatpush.bf16.msra.mxu1 %v6342_v62  ;;  %v5902_v25 = vor.u32 %v7040_v59, %v5899_v47  ;;  %v6473_v59 = vld [vmem:[#allocation5 + $0x610] sm:$0xf] }
 0x570   :  { %v946_v12 = vperm.slane %v8001_v6, 1  ;;  %v6094_v6 = vor.u32 %v7088_v39, %v6091_v42  ;;  %v6670_v39 = vor.u32 %v7232_v23, %v6667_v24  ;;  %v7224_v42 = vld [vmem:[#allocation5 + $0x74c] sm:$0xf0]  ;;  %v7152_v24 = vld [vmem:[#allocation5 + $0x514] sm:$0xf] }
 0x571   :  { %v6602_v33 = vor.u32 %v7224_v42, %v6601_v32  ;;  %v7192_v47 = vld [vmem:[#allocation5 + $0x64c] sm:$0xf0] }
 0x572   :  { %v1652_v35 = vpop.f32.mrf.mxu3  ;;  %3407 = vmatpush.bf16.msra.mxu3 %v6274_v63  ;;  %v7024_v63 = vld [vmem:[#allocation5 + $0x114] sm:$0xf]  ;;  %v7144_v42 = vld [vmem:[#allocation5 + $0x4cc] sm:$0xf0] }
 0x573   :  { %v1587_v44 = vpop.f32.mrf.mxu2 }
 0x574   :  { %v1588_v36 = vadd.f32 %v1587_v44, %v1575_v41 }
 0x576   :  { %v1601_v61 = vadd.f32 %v7994_v16, %v1588_v36  ;;  %v6278_v16 = vor.u32 %v7135_v20, %v6275_v1  ;;  %3408 = vmatpush.bf16.msra.mxu3 %v6210_v15  ;;  %v7032_v20 = vld [vmem:[#allocation5 + $0x14c] sm:$0xf0]  ;;  %v5835_v1 = vld [vmem:[#allocation5 + $0x150] sm:$0xf0] }
 0x577   :  { %v1626_v26 = vpop.f32.mrf.mxu1  ;;  %v8006_v37 = vpop.f32.mrf.mxu0  ;;  %v5838_v9 = vor.u32 %v7024_v63, %v5835_v1  ;;  %v6474_v63 = vor.u32 %v7192_v47, %v6473_v59  ;;  %v6675_v59 = vld [vmem:[#allocation5 + $0x7d8] sm:$0xf0] }
 0x578   :  { %v1614_v0 = vadd.f32 %v7996_v34, %v1601_v61  ;;  %v6211_v34 = vld [vmem:[#allocation5 + $0x448] sm:$0xf0]  ;;  %3433 = vmatpush.bf16.msra.mxu1 %v6278_v16  ;;  %v5962_v61 = vor.u32 %v7064_v51, %v5961_v60  ;;  %v7208_v60 = vld [vmem:[#allocation5 + $0x6cc] sm:$0xf0] }
 0x579   :  { %v6214_v17 = vor.u32 %v7119_v13, %v6211_v34  ;;  %v5769_v13 = vld [vmem:[#allocation5 + $0x90] sm:$0xf] }
 0x57a   :  { %v1654_v52 = vpop.f32.mrf.mxu3  ;;  %v1627_v4 = vadd.f32 %v1626_v26, %v1614_v0  ;;  %v6026_v26 = vor.u32 %v7080_v49, %v6025_v46  ;;  %v6161_v46 = vld [vmem:[#allocation5 + $0x398] sm:$0xf]  ;;  %v6163_v49 = vld [vmem:[#allocation5 + $0x3d8] sm:$0xf0] }
 0x57b   :  { %v1589_v43 = vpop.f32.mrf.mxu2 }
 0x57c   :  { %3434 = vmatpush.bf16.msra.mxu1 %v6214_v17  ;;  %v5966_v43 = vor.u32 %v7056_v56, %v5963_v10  ;;  %v7240_v17 = vld [vmem:[#allocation5 + $0x7cc] sm:$0xf0]  ;;  %v7200_v10 = vld [vmem:[#allocation5 + $0x694] sm:$0xf] }
 0x57f   :  { %v1628_v2 = vpop.f32.mrf.mxu1  ;;  %v1680_v3 = vpop.f32.mrf.mxu0 }
 0x580   :  { %v5898_v3 = vor.u32 %v7048_v58, %v5897_v53  ;;  %v6099_v53 = vld [vmem:[#allocation5 + $0x358] sm:$0xf0] }
 0x583   :  { %v1665_v7 = vpop.f32.mrf.mxu3 }
 0x584   :  { %v1639_v8 = vpop.f32.mrf.mxu2  ;;  %v1666_v44 = vadd.f32 %v1665_v7, %v946_v12  ;;  %v6666_v12 = vor.u32 %v7240_v17, %v6665_v28 }
 0x585   :  { %v1640_v14 = vadd.f32 %v1639_v8, %v1627_v4  ;;  %v5834_v8 = vor.u32 %v7032_v20, %v5833_v57  ;;  %v7073_v57 = vld [vmem:[#allocation5 + $0x29c] sm:$0xf] }
 0x586   :  { %v1679_v36 = vadd.f32 %v8006_v37, %v1666_v44  ;;  %v5707_v44 = vld [vmem:[#allocation5 + $0x50] sm:$0xf0]  ;;  %v6035_v20 = vld [vmem:[#allocation5 + $0x2d8] sm:$0xf0] }
 0x587   :  { %v1653_v18 = vadd.f32 %v1652_v35, %v1640_v14  ;;  %v1691_v19 = vpop.f32.mrf.mxu1  ;;  %v1730_v21 = vpop.f32.mrf.mxu0  ;;  %v7016_v14 = vld [vmem:[#allocation5 + $0xcc] sm:$0xf0] }
 0x588   :  { %v1692_v5 = vadd.f32 %v1691_v19, %v1679_v36 }
 0x589   :  { %v1760_v27 = vmax.f32 %v1653_v18, 0.0  ;;  %v7008_v18 = vld [vmem:[#allocation5 + $0x94] sm:$0xf] }
 0x58b   :  { %v8011_v22 = vpack.c.bf16 %v1760_v27, %v1760_v27  ;;  %v1667_v31 = vpop.f32.mrf.mxu3  ;;  %v5770_v27 = vor.u32 %v7016_v14, %v5769_v13  ;;  %v5969_v13 = vld [vmem:[#allocation5 + $0x218] sm:$0xf] }
 0x58c   :  { %v1641_v35 = vpop.f32.mrf.mxu2  ;;  %v7065_v14 = vld [vmem:[#allocation5 + $0x254] sm:$0xf0] }
 0x58d   :  { %3344 = vmatmul.bf16.vlgmr.msra.gmra.mxu2 %v8011_v22  ;;  %3370 = vmatmul.bf16.vlgmr.msra.gmra.mxu0 %v8011_v22  ;;  %v6992_v35 = vld [vmem:[#allocation5 + $0x14] sm:$0xf] }
 0x58e   :  { %3440 = vmatpush.bf16.msra.mxu2 %v6154_v29  ;;  %3466 = vmatpush.bf16.msra.mxu0 %v6158_v30  ;;  %v5705_v29 = vld [vmem:[#allocation5 + $0x10] sm:$0xf]  ;;  %v5710_v36 = vor.u32 %v6992_v35, %v5707_v44 }
 0x58f   :  { %v1693_v40 = vpop.f32.mrf.mxu1  ;;  %v1732_v41 = vpop.f32.mrf.mxu0  ;;  %v7000_v30 = vld [vmem:[#allocation5 + $0x4c] sm:$0xf0] }
 0x590   :  { %v7113_v40 = vld [vmem:[#allocation5 + $0x3d4] sm:$0xf0]  ;;  %v7105_v41 = vld [vmem:[#allocation5 + $0x39c] sm:$0xf]  ;;  %v5706_v50 = vor.u32 %v7000_v30, %v5705_v29 }
 0x591   :  { %v6162_v51 = vor.u32 %v7113_v40, %v6161_v46  ;;  %v6166_v56 = vor.u32 %v7105_v41, %v6163_v49  ;;  %v7041_v29 = vld [vmem:[#allocation5 + $0x19c] sm:$0xf]  ;;  %v5841_v46 = vld [vmem:[#allocation5 + $0x118] sm:$0xf] }
 0x592   :  { %3441 = vmatpush.bf16.msra.mxu2 %v6090_v45  ;;  %3467 = vmatpush.bf16.msra.mxu0 %v6094_v6  ;;  %v7216_v45 = vld [vmem:[#allocation5 + $0x714] sm:$0xf]  ;;  %v5907_v30 = vld [vmem:[#allocation5 + $0x1d8] sm:$0xf0]  ;;  %v7033_v40 = vld [vmem:[#allocation5 + $0x154] sm:$0xf0] }
 0x593   :  { %v6603_v6 = vld [vmem:[#allocation5 + $0x750] sm:$0xf0]  ;;  %v5910_v44 = vor.u32 %v7041_v29, %v5907_v30  ;;  %v7025_v41 = vld [vmem:[#allocation5 + $0x11c] sm:$0xf] }
 0x594   :  { %v5843_v49 = vld [vmem:[#allocation5 + $0x158] sm:$0xf0] }
 0x595   :  { %v1704_v52 = vpop.f32.mrf.mxu2 }
 0x596   :  { %3442 = vmatpush.bf16.msra.mxu2 %v6026_v26  ;;  %3468 = vmatpush.bf16.msra.mxu0 %v6030_v55  ;;  %v1705_v37 = vadd.f32 %v1704_v52, %v1692_v5  ;;  %v6606_v26 = vor.u32 %v7216_v45, %v6603_v6  ;;  %v6537_v55 = vld [vmem:[#allocation5 + $0x690] sm:$0xf]  ;;  %v6539_v52 = vld [vmem:[#allocation5 + $0x6d0] sm:$0xf0]  ;;  %v6097_v5 = vld [vmem:[#allocation5 + $0x318] sm:$0xf] }
 0x597   :  { %v1756_v54 = vpop.f32.mrf.mxu0  ;;  %v6542_v58 = vor.u32 %v7200_v10, %v6539_v52  ;;  %v7136_v45 = vld [vmem:[#allocation5 + $0x494] sm:$0xf]  ;;  %v5777_v10 = vld [vmem:[#allocation5 + $0x98] sm:$0xf] }
 0x598   :  { %v1743_v62 = vpop.f32.mrf.mxu1  ;;  %v6283_v6 = vld [vmem:[#allocation5 + $0x4d0] sm:$0xf0]  ;;  %v6673_v52 = vld [vmem:[#allocation5 + $0x798] sm:$0xf] }
 0x59a   :  { %3443 = vmatpush.bf16.msra.mxu2 %v5962_v61  ;;  %3469 = vmatpush.bf16.msra.mxu0 %v5966_v43  ;;  %v7097_v61 = vld [vmem:[#allocation5 + $0x354] sm:$0xf0]  ;;  %v7089_v43 = vld [vmem:[#allocation5 + $0x31c] sm:$0xf] }
 0x59b   :  { %v1717_v0 = vpop.f32.mrf.mxu3 }
 0x59c   :  { %v1718_v2 = vadd.f32 %v1717_v0, %v1705_v37  ;;  %v6098_v37 = vor.u32 %v7097_v61, %v6097_v5  ;;  %v7184_v0 = vld [vmem:[#allocation5 + $0x614] sm:$0xf]  ;;  %v7241_v5 = vld [vmem:[#allocation5 + $0x7d4] sm:$0xf0] }
 0x59d   :  { %v1706_v4 = vpop.f32.mrf.mxu2  ;;  %3396 = vmatmul.bf16.vlgmr.msrb.gmra.mxu2 %v8011_v22  ;;  %3422 = vmatmul.bf16.vlgmr.msrb.gmra.mxu0 %v8011_v22  ;;  %v7017_v61 = vld [vmem:[#allocation5 + $0xd4] sm:$0xf0] }
 0x59e   :  { %v1731_v16 = vadd.f32 %v1730_v21, %v1718_v2  ;;  %3444 = vmatpush.bf16.msra.mxu2 %v5898_v3  ;;  %3470 = vmatpush.bf16.msra.mxu0 %v5902_v25  ;;  %v5771_v21 = vld [vmem:[#allocation5 + $0xd0] sm:$0xf0]  ;;  %v6033_v3 = vld [vmem:[#allocation5 + $0x298] sm:$0xf]  ;;  %v7176_v4 = vld [vmem:[#allocation5 + $0x5cc] sm:$0xf0] }
 0x59f   :  { %v1758_v11 = vpop.f32.mrf.mxu0  ;;  %v5774_v38 = vor.u32 %v7008_v18, %v5771_v21  ;;  %v6475_v2 = vld [vmem:[#allocation5 + $0x650] sm:$0xf0]  ;;  %v7081_v25 = vld [vmem:[#allocation5 + $0x2d4] sm:$0xf0]  ;;  %v6345_v18 = vld [vmem:[#allocation5 + $0x510] sm:$0xf]  ;;  %v5970_v21 = vor.u32 %v7065_v14, %v5969_v13 }
 0x5a0   :  { %v1744_v7 = vadd.f32 %v1743_v62, %v1731_v16  ;;  %v1745_v34 = vpop.f32.mrf.mxu1  ;;  %v6102_v62 = vor.u32 %v7089_v43, %v6099_v53  ;;  %v6478_v1 = vor.u32 %v7184_v0, %v6475_v2  ;;  %v6409_v16 = vld [vmem:[#allocation5 + $0x590] sm:$0xf]  ;;  %v6411_v11 = vld [vmem:[#allocation5 + $0x5d0] sm:$0xf0]  ;;  %v7009_v43 = vld [vmem:[#allocation5 + $0x9c] sm:$0xf]  ;;  %v5778_v0 = vor.u32 %v7017_v61, %v5777_v10 }
 0x5a1   :  { %v5971_v34 = vld [vmem:[#allocation5 + $0x258] sm:$0xf0]  ;;  %v6410_v28 = vor.u32 %v7176_v4, %v6409_v16  ;;  %v6171_v13 = vld [vmem:[#allocation5 + $0x3e0] sm:$0xf0] }
 0x5a2   :  { %v1757_v15 = vadd.f32 %v1756_v54, %v1744_v7  ;;  %3445 = vmatpush.bf16.msra.mxu2 %v5834_v8  ;;  %3471 = vmatpush.bf16.msra.mxu0 %v5838_v9  ;;  %v6538_v54 = vor.u32 %v7208_v60, %v6537_v55  ;;  %v6034_v7 = vor.u32 %v7081_v25, %v6033_v3  ;;  %v7168_v9 = vld [vmem:[#allocation5 + $0x594] sm:$0xf]  ;;  %v5779_v53 = vld [vmem:[#allocation5 + $0xd8] sm:$0xf0]  ;;  %v7001_v3 = vld [vmem:[#allocation5 + $0x54] sm:$0xf0] }
 0x5a3   :  { %v1719_v19 = vpop.f32.mrf.mxu3  ;;  %v6038_v8 = vor.u32 %v7073_v57, %v6035_v20  ;;  %v6414_v17 = vor.u32 %v7168_v9, %v6411_v11  ;;  %v7120_v55 = vld [vmem:[#allocation5 + $0x414] sm:$0xf]  ;;  %v5782_v2 = vor.u32 %v7009_v43, %v5779_v53  ;;  %v6609_v25 = vld [vmem:[#allocation5 + $0x718] sm:$0xf]  ;;  %v7217_v16 = vld [vmem:[#allocation5 + $0x71c] sm:$0xf] }
 0x5a4   :  { %v1761_v48 = vmax.f32 %v1757_v15, 0.0  ;;  %v7057_v15 = vld [vmem:[#allocation5 + $0x21c] sm:$0xf]  ;;  %v7160_v19 = vld [vmem:[#allocation5 + $0x54c] sm:$0xf0] }
 0x5a5   :  { %v5974_v23 = vor.u32 %v7057_v15, %v5971_v34  ;;  %v6346_v32 = vor.u32 %v7160_v19, %v6345_v18  ;;  %v6219_v60 = vld [vmem:[#allocation5 + $0x450] sm:$0xf0]  ;;  %v7225_v57 = vld [vmem:[#allocation5 + $0x754] sm:$0xf0]  ;;  %v6611_v4 = vld [vmem:[#allocation5 + $0x758] sm:$0xf0] }
 0x5a6   :  { %v8018_v31 = vpack.c.bf16 %v1761_v48, %v1761_v48  ;;  %3446 = vmatpush.bf16.msra.mxu2 %v5770_v27  ;;  %3472 = vmatpush.bf16.msra.mxu0 %v5774_v38  ;;  %v6347_v48 = vld [vmem:[#allocation5 + $0x550] sm:$0xf0]  ;;  %v5905_v27 = vld [vmem:[#allocation5 + $0x198] sm:$0xf]  ;;  %v6222_v47 = vor.u32 %v7120_v55, %v6219_v60  ;;  %v6610_v9 = vor.u32 %v7225_v57, %v6609_v25  ;;  %v7106_v11 = vld [vmem:[#allocation5 + $0x3a4] sm:$0xf] }
 0x5a7   :  { %v6350_v38 = vor.u32 %v7152_v24, %v6347_v48  ;;  %v6614_v34 = vor.u32 %v7217_v16, %v6611_v4  ;;  %v7209_v18 = vld [vmem:[#allocation5 + $0x6d4] sm:$0xf0]  ;;  %v7201_v19 = vld [vmem:[#allocation5 + $0x69c] sm:$0xf]  ;;  %v6105_v24 = vld [vmem:[#allocation5 + $0x320] sm:$0xf] }
 0x5a8   :  { %3357 = vmatmul.bf16.vlgmr.msrb.gmra.mxu3 %v8018_v31  ;;  %3383 = vmatmul.bf16.vlgmr.msrb.gmra.mxu1 %v8018_v31  ;;  %v7098_v48 = vld [vmem:[#allocation5 + $0x35c] sm:$0xf0]  ;;  %v6419_v60 = vld [vmem:[#allocation5 + $0x5d8] sm:$0xf0]  ;;  %v7058_v10 = vld [vmem:[#allocation5 + $0x224] sm:$0xf] }
 0x5a9   :  { %3453 = vmatpush.bf16.msrb.mxu3 %v6666_v12  ;;  %3479 = vmatpush.bf16.msrb.mxu1 %v6670_v39  ;;  %v7049_v12 = vld [vmem:[#allocation5 + $0x1d4] sm:$0xf0]  ;;  %v6281_v39 = vld [vmem:[#allocation5 + $0x490] sm:$0xf]  ;;  %v6291_v4 = vld [vmem:[#allocation5 + $0x4d8] sm:$0xf0] }
 0x5aa   :  { %3447 = vmatpush.bf16.msra.mxu2 %v5706_v50  ;;  %3473 = vmatpush.bf16.msra.mxu0 %v5710_v36  ;;  %v5906_v35 = vor.u32 %v7049_v12, %v5905_v27  ;;  %v6282_v50 = vor.u32 %v7144_v42, %v6281_v39  ;;  %v6286_v36 = vor.u32 %v7136_v45, %v6283_v6  ;;  %v7090_v27 = vld [vmem:[#allocation5 + $0x324] sm:$0xf]  ;;  %v7193_v39 = vld [vmem:[#allocation5 + $0x654] sm:$0xf0]  ;;  %v7185_v42 = vld [vmem:[#allocation5 + $0x61c] sm:$0xf] }
 0x5ab   :  { %v6107_v12 = vld [vmem:[#allocation5 + $0x360] sm:$0xf0]  ;;  %v6041_v45 = vld [vmem:[#allocation5 + $0x2a0] sm:$0xf]  ;;  %v6353_v53 = vld [vmem:[#allocation5 + $0x518] sm:$0xf] }
 0x5ac   :  { %v7082_v6 = vld [vmem:[#allocation5 + $0x2dc] sm:$0xf0] }
 0x5ad   :  { %3454 = vmatpush.bf16.msrb.mxu3 %v6602_v33  ;;  %3480 = vmatpush.bf16.msrb.mxu1 %v6606_v26  ;;  %v6217_v33 = vld [vmem:[#allocation5 + $0x410] sm:$0xf] }
 0x5ae   :  { %3492 = vmatpush.bf16.msrb.mxu2 %v6162_v51  ;;  %3518 = vmatpush.bf16.msrb.mxu0 %v6166_v56  ;;  %v7128_v26 = vld [vmem:[#allocation5 + $0x44c] sm:$0xf0]  ;;  %v5842_v51 = vor.u32 %v7033_v40, %v5841_v46  ;;  %v5846_v56 = vor.u32 %v7025_v41, %v5843_v49  ;;  %v7074_v46 = vld [vmem:[#allocation5 + $0x2a4] sm:$0xf] }
 0x5af   :  { %3448 = vmatmul.bf16.vlgmr.msra.gmra.mxu2 %v8011_v22  ;;  %3474 = vmatmul.bf16.vlgmr.msra.gmra.mxu0 %v8011_v22  ;;  %v6043_v40 = vld [vmem:[#allocation5 + $0x2e0] sm:$0xf0] }
 0x5b0   :  { %v6046_v55 = vor.u32 %v7074_v46, %v6043_v40  ;;  %v7226_v46 = vld [vmem:[#allocation5 + $0x75c] sm:$0xf0] }
 0x5b1   :  { %3455 = vmatpush.bf16.msrb.mxu3 %v6538_v54  ;;  %3481 = vmatpush.bf16.msrb.mxu1 %v6542_v58  ;;  %v6218_v54 = vor.u32 %v7128_v26, %v6217_v33  ;;  %v7233_v58 = vld [vmem:[#allocation5 + $0x79c] sm:$0xf]  ;;  %v6417_v33 = vld [vmem:[#allocation5 + $0x598] sm:$0xf] }
 0x5b2   :  { %3493 = vmatpush.bf16.msrb.mxu2 %v6098_v37  ;;  %3519 = vmatpush.bf16.msrb.mxu0 %v6102_v62  ;;  %v6674_v37 = vor.u32 %v7241_v5, %v6673_v52  ;;  %v5713_v62 = vld [vmem:[#allocation5 + $0x18] sm:$0xf]  ;;  %v6678_v20 = vor.u32 %v7233_v58, %v6675_v59  ;;  %v7169_v26 = vld [vmem:[#allocation5 + $0x59c] sm:$0xf]  ;;  %v5979_v52 = vld [vmem:[#allocation5 + $0x260] sm:$0xf0] }
 0x5b3   :  { %v5714_v14 = vor.u32 %v7001_v3, %v5713_v62  ;;  %v6422_v61 = vor.u32 %v7169_v26, %v6419_v60  ;;  %v7153_v58 = vld [vmem:[#allocation5 + $0x51c] sm:$0xf]  ;;  %v5982_v59 = vor.u32 %v7058_v10, %v5979_v52  ;;  %v7050_v62 = vld [vmem:[#allocation5 + $0x1dc] sm:$0xf0]  ;;  %v7115_v26 = vld [vmem:[#allocation5 + $0x3e4] sm:$0xf0] }
 0x5b4   :  { %v7107_v60 = vld [vmem:[#allocation5 + $0x3ac] sm:$0xf] }
 0x5b5   :  { %3456 = vmatpush.bf16.msrb.mxu3 %v6474_v63  ;;  %3482 = vmatpush.bf16.msrb.mxu1 %v6478_v1  ;;  %v6993_v63 = vld [vmem:[#allocation5 + $0x1c] sm:$0xf] }
 0x5b6   :  { %3494 = vmatpush.bf16.msrb.mxu2 %v6034_v7  ;;  %3520 = vmatpush.bf16.msrb.mxu0 %v6038_v8  ;;  %v5715_v1 = vld [vmem:[#allocation5 + $0x58] sm:$0xf0]  ;;  %v6169_v7 = vld [vmem:[#allocation5 + $0x3a0] sm:$0xf] }
 0x5b7   :  { %v7114_v8 = vld [vmem:[#allocation5 + $0x3dc] sm:$0xf0]  ;;  %v5718_v15 = vor.u32 %v6993_v63, %v5715_v1  ;;  %v7145_v63 = vld [vmem:[#allocation5 + $0x4d4] sm:$0xf0]  ;;  %v7137_v1 = vld [vmem:[#allocation5 + $0x49c] sm:$0xf] }
 0x5b8   :  { %3409 = vmatmul.bf16.vlgmr.msra.gmra.mxu3 %v8018_v31  ;;  %3435 = vmatmul.bf16.vlgmr.msra.gmra.mxu1 %v8018_v31 }
 0x5b9   :  { %3457 = vmatpush.bf16.msrb.mxu3 %v6410_v28  ;;  %3483 = vmatpush.bf16.msrb.mxu1 %v6414_v17  ;;  %v6170_v28 = vor.u32 %v7114_v8, %v6169_v7  ;;  %v6545_v17 = vld [vmem:[#allocation5 + $0x698] sm:$0xf]  ;;  %v5849_v7 = vld [vmem:[#allocation5 + $0x120] sm:$0xf] }
 0x5ba   :  { %3495 = vmatpush.bf16.msrb.mxu2 %v5970_v21  ;;  %3521 = vmatpush.bf16.msrb.mxu0 %v5974_v23  ;;  %v6174_v21 = vor.u32 %v7106_v11, %v6171_v13  ;;  %v6547_v23 = vld [vmem:[#allocation5 + $0x6d8] sm:$0xf0]  ;;  %v6546_v29 = vor.u32 %v7209_v18, %v6545_v17  ;;  %v7034_v8 = vld [vmem:[#allocation5 + $0x15c] sm:$0xf0]  ;;  %v5851_v11 = vld [vmem:[#allocation5 + $0x160] sm:$0xf0] }
 0x5bb   :  { %v6550_v30 = vor.u32 %v7201_v19, %v6547_v23  ;;  %v7121_v17 = vld [vmem:[#allocation5 + $0x41c] sm:$0xf]  ;;  %v7018_v23 = vld [vmem:[#allocation5 + $0xdc] sm:$0xf0] }
 0x5bc   :  { %v6227_v18 = vld [vmem:[#allocation5 + $0x458] sm:$0xf0] }
 0x5bd   :  { %3458 = vmatpush.bf16.msrb.mxu3 %v6346_v32  ;;  %3484 = vmatpush.bf16.msrb.mxu1 %v6350_v38  ;;  %v6106_v32 = vor.u32 %v7098_v48, %v6105_v24  ;;  %v6481_v38 = vld [vmem:[#allocation5 + $0x618] sm:$0xf]  ;;  %v6681_v24 = vld [vmem:[#allocation5 + $0x7a0] sm:$0xf] }
 0x5be   :  { %3496 = vmatpush.bf16.msrb.mxu2 %v5906_v35  ;;  %3522 = vmatpush.bf16.msrb.mxu0 %v5910_v44  ;;  %v6110_v35 = vor.u32 %v7090_v27, %v6107_v12  ;;  %v6483_v44 = vld [vmem:[#allocation5 + $0x658] sm:$0xf0]  ;;  %v6482_v41 = vor.u32 %v7193_v39, %v6481_v38  ;;  %v7242_v48 = vld [vmem:[#allocation5 + $0x7dc] sm:$0xf0]  ;;  %v7010_v27 = vld [vmem:[#allocation5 + $0xa4] sm:$0xf]  ;;  %v6230_v38 = vor.u32 %v7121_v17, %v6227_v18 }
 0x5bf   :  { %v6486_v49 = vor.u32 %v7185_v42, %v6483_v44  ;;  %v5787_v12 = vld [vmem:[#allocation5 + $0xe0] sm:$0xf0]  ;;  %v5721_v42 = vld [vmem:[#allocation5 + $0x20] sm:$0xf]  ;;  %v5985_v18 = vld [vmem:[#allocation5 + $0x228] sm:$0xf] }
 0x5c0   :  { %v5790_v44 = vor.u32 %v7010_v27, %v5787_v12  ;;  %v6427_v17 = vld [vmem:[#allocation5 + $0x5e0] sm:$0xf0]  ;;  %v6361_v12 = vld [vmem:[#allocation5 + $0x520] sm:$0xf] }
 0x5c1   :  { %3459 = vmatpush.bf16.msrb.mxu3 %v6282_v50  ;;  %3485 = vmatpush.bf16.msrb.mxu1 %v6286_v36  ;;  %v6042_v50 = vor.u32 %v7082_v6, %v6041_v45  ;;  %v7177_v36 = vld [vmem:[#allocation5 + $0x5d4] sm:$0xf0]  ;;  %v7002_v45 = vld [vmem:[#allocation5 + $0x5c] sm:$0xf0] }
 0x5c2   :  { %3497 = vmatpush.bf16.msrb.mxu2 %v5842_v51  ;;  %3523 = vmatpush.bf16.msrb.mxu0 %v5846_v56  ;;  %v5977_v51 = vld [vmem:[#allocation5 + $0x220] sm:$0xf]  ;;  %v6418_v5 = vor.u32 %v7177_v36, %v6417_v33  ;;  %v6619_v33 = vld [vmem:[#allocation5 + $0x760] sm:$0xf0]  ;;  %v6177_v36 = vld [vmem:[#allocation5 + $0x3a8] sm:$0xf] }
 0x5c3   :  { %v7066_v56 = vld [vmem:[#allocation5 + $0x25c] sm:$0xf0] }
 0x5c4   :  { %v5978_v43 = vor.u32 %v7066_v56, %v5977_v51  ;;  %v6617_v6 = vld [vmem:[#allocation5 + $0x720] sm:$0xf]  ;;  %v6179_v51 = vld [vmem:[#allocation5 + $0x3e8] sm:$0xf0] }
 0x5c5   :  { %3460 = vmatpush.bf16.msrb.mxu3 %v6218_v54  ;;  %3486 = vmatpush.bf16.msrb.mxu1 %v6222_v47  ;;  %v7161_v54 = vld [vmem:[#allocation5 + $0x554] sm:$0xf0]  ;;  %v6355_v47 = vld [vmem:[#allocation5 + $0x558] sm:$0xf0]  ;;  %v6618_v56 = vor.u32 %v7226_v46, %v6617_v6 }
 0x5c6   :  { %3498 = vmatpush.bf16.msrb.mxu2 %v5778_v0  ;;  %3524 = vmatpush.bf16.msrb.mxu0 %v5782_v2  ;;  %v7042_v0 = vld [vmem:[#allocation5 + $0x1a4] sm:$0xf]  ;;  %v6354_v3 = vor.u32 %v7161_v54, %v6353_v53  ;;  %v6358_v25 = vor.u32 %v7153_v58, %v6355_v47  ;;  %v6182_v54 = vor.u32 %v7107_v60, %v6179_v51  ;;  %v7099_v47 = vld [vmem:[#allocation5 + $0x364] sm:$0xf0]  ;;  %v5859_v60 = vld [vmem:[#allocation5 + $0x168] sm:$0xf0] }
 0x5c7   :  { %v5915_v2 = vld [vmem:[#allocation5 + $0x1e0] sm:$0xf0] }
 0x5c8   :  { %3461 = vmatmul.bf16.vlgmr.msrb.gmra.mxu3 %v8018_v31  ;;  %3487 = vmatmul.bf16.vlgmr.msrb.gmra.mxu1 %v8018_v31  ;;  %v5918_v16 = vor.u32 %v7042_v0, %v5915_v2  ;;  %v7202_v53 = vld [vmem:[#allocation5 + $0x6a4] sm:$0xf] }
 0x5c9   :  { %3505 = vmatpush.bf16.msra.mxu3 %v6674_v37  ;;  %3531 = vmatpush.bf16.msra.mxu1 %v6678_v20  ;;  %v5913_v37 = vld [vmem:[#allocation5 + $0x1a0] sm:$0xf]  ;;  %v6289_v20 = vld [vmem:[#allocation5 + $0x498] sm:$0xf]  ;;  %v6555_v58 = vld [vmem:[#allocation5 + $0x6e0] sm:$0xf0] }
 0x5ca   :  { %3499 = vmatpush.bf16.msrb.mxu2 %v5714_v14  ;;  %3525 = vmatpush.bf16.msrb.mxu0 %v5718_v15  ;;  %v5914_v57 = vor.u32 %v7050_v62, %v5913_v37  ;;  %v6290_v13 = vor.u32 %v7145_v63, %v6289_v20  ;;  %v6225_v14 = vld [vmem:[#allocation5 + $0x418] sm:$0xf]  ;;  %v6294_v15 = vor.u32 %v7137_v1, %v6291_v4  ;;  %v7091_v37 = vld [vmem:[#allocation5 + $0x32c] sm:$0xf]  ;;  %v7186_v20 = vld [vmem:[#allocation5 + $0x624] sm:$0xf] }
 0x5cb   :  { %v6115_v62 = vld [vmem:[#allocation5 + $0x368] sm:$0xf0]  ;;  %v6558_v2 = vor.u32 %v7202_v53, %v6555_v58  ;;  %v6491_v1 = vld [vmem:[#allocation5 + $0x660] sm:$0xf0]  ;;  %v7083_v4 = vld [vmem:[#allocation5 + $0x2e4] sm:$0xf0] }
 0x5cc   :  { %v6118_v63 = vor.u32 %v7091_v37, %v6115_v62  ;;  %v7019_v58 = vld [vmem:[#allocation5 + $0xe4] sm:$0xf0]  ;;  %v7011_v37 = vld [vmem:[#allocation5 + $0xac] sm:$0xf] }
 0x5cd   :  { %3506 = vmatpush.bf16.msra.mxu3 %v6610_v9  ;;  %3532 = vmatpush.bf16.msra.mxu1 %v6614_v34  ;;  %v7026_v9 = vld [vmem:[#allocation5 + $0x124] sm:$0xf]  ;;  %v5850_v34 = vor.u32 %v7034_v8, %v5849_v7  ;;  %v7075_v7 = vld [vmem:[#allocation5 + $0x2ac] sm:$0xf] }
 0x5ce   :  { %3544 = vmatpush.bf16.msra.mxu2 %v6170_v28  ;;  %3570 = vmatpush.bf16.msra.mxu0 %v6174_v21  ;;  %v7129_v28 = vld [vmem:[#allocation5 + $0x454] sm:$0xf0]  ;;  %v5854_v19 = vor.u32 %v7026_v9, %v5851_v11  ;;  %v5785_v21 = vld [vmem:[#allocation5 + $0xa0] sm:$0xf]  ;;  %v6051_v8 = vld [vmem:[#allocation5 + $0x2e8] sm:$0xf0]  ;;  %v6494_v11 = vor.u32 %v7186_v20, %v6491_v1 }
 0x5cf   :  { %3500 = vmatmul.bf16.vlgmr.msrb.gmra.mxu2 %v8011_v22  ;;  %3526 = vmatmul.bf16.vlgmr.msrb.gmra.mxu0 %v8011_v22  ;;  %v5786_v39 = vor.u32 %v7018_v23, %v5785_v21  ;;  %v7059_v21 = vld [vmem:[#allocation5 + $0x22c] sm:$0xf]  ;;  %v5729_v20 = vld [vmem:[#allocation5 + $0x28] sm:$0xf] }
 0x5d0   :  { %v5987_v23 = vld [vmem:[#allocation5 + $0x268] sm:$0xf0] }
 0x5d1   :  { %3507 = vmatpush.bf16.msra.mxu3 %v6546_v29  ;;  %3533 = vmatpush.bf16.msra.mxu1 %v6550_v30  ;;  %v6226_v29 = vor.u32 %v7129_v28, %v6225_v14  ;;  %v7234_v30 = vld [vmem:[#allocation5 + $0x7a4] sm:$0xf]  ;;  %v6425_v14 = vld [vmem:[#allocation5 + $0x5a0] sm:$0xf]  ;;  %v6054_v28 = vor.u32 %v7075_v7, %v6051_v8  ;;  %v5795_v62 = vld [vmem:[#allocation5 + $0xe8] sm:$0xf0] }
 0x5d2   :  { %3545 = vmatpush.bf16.msra.mxu2 %v6106_v32  ;;  %3571 = vmatpush.bf16.msra.mxu0 %v6110_v35  ;;  %v6683_v32 = vld [vmem:[#allocation5 + $0x7e0] sm:$0xf0]  ;;  %v6682_v35 = vor.u32 %v7242_v48, %v6681_v24  ;;  %v5798_v1 = vor.u32 %v7011_v37, %v5795_v62  ;;  %v7227_v7 = vld [vmem:[#allocation5 + $0x764] sm:$0xf0] }
 0x5d3   :  { %v6686_v40 = vor.u32 %v7234_v30, %v6683_v32  ;;  %v7154_v30 = vld [vmem:[#allocation5 + $0x524] sm:$0xf]  ;;  %v5990_v32 = vor.u32 %v7059_v21, %v5987_v23 }
 0x5d5   :  { %3508 = vmatpush.bf16.msra.mxu3 %v6482_v41  ;;  %3534 = vmatpush.bf16.msra.mxu1 %v6486_v49  ;;  %v6994_v41 = vld [vmem:[#allocation5 + $0x24] sm:$0xf] }
 0x5d6   :  { %3546 = vmatpush.bf16.msra.mxu2 %v6042_v50  ;;  %3572 = vmatpush.bf16.msra.mxu0 %v6046_v55  ;;  %v5723_v49 = vld [vmem:[#allocation5 + $0x60] sm:$0xf0]  ;;  %v5722_v55 = vor.u32 %v7002_v45, %v5721_v42  ;;  %v7051_v42 = vld [vmem:[#allocation5 + $0x1e4] sm:$0xf0] }
 0x5d7   :  { %v7218_v50 = vld [vmem:[#allocation5 + $0x724] sm:$0xf]  ;;  %v5726_v10 = vor.u32 %v6994_v41, %v5723_v49  ;;  %v7146_v41 = vld [vmem:[#allocation5 + $0x4dc] sm:$0xf0] }
 0x5d8   :  { %v6622_v52 = vor.u32 %v7218_v50, %v6619_v33  ;;  %v7138_v49 = vld [vmem:[#allocation5 + $0x4a4] sm:$0xf] }
 0x5d9   :  { %3509 = vmatpush.bf16.msra.mxu3 %v6418_v5  ;;  %3535 = vmatpush.bf16.msra.mxu1 %v6422_v61  ;;  %v6178_v5 = vor.u32 %v7115_v26, %v6177_v36  ;;  %v6553_v61 = vld [vmem:[#allocation5 + $0x6a0] sm:$0xf]  ;;  %v6299_v33 = vld [vmem:[#allocation5 + $0x4e0] sm:$0xf0]  ;;  %v5857_v36 = vld [vmem:[#allocation5 + $0x128] sm:$0xf] }
 0x5da   :  { %3547 = vmatpush.bf16.msra.mxu2 %v5978_v43  ;;  %3573 = vmatpush.bf16.msra.mxu0 %v5982_v59  ;;  %v7210_v43 = vld [vmem:[#allocation5 + $0x6dc] sm:$0xf0]  ;;  %v6113_v59 = vld [vmem:[#allocation5 + $0x328] sm:$0xf] }
 0x5db   :  { %v6554_v0 = vor.u32 %v7210_v43, %v6553_v61  ;;  %v7035_v26 = vld [vmem:[#allocation5 + $0x164] sm:$0xf0]  ;;  %v7122_v61 = vld [vmem:[#allocation5 + $0x424] sm:$0xf] }
 0x5dc   :  { %v6235_v43 = vld [vmem:[#allocation5 + $0x460] sm:$0xf0] }
 0x5dd   :  { %3510 = vmatpush.bf16.msra.mxu3 %v6354_v3  ;;  %3536 = vmatpush.bf16.msra.mxu1 %v6358_v25  ;;  %v6114_v3 = vor.u32 %v7099_v47, %v6113_v59  ;;  %v6489_v25 = vld [vmem:[#allocation5 + $0x620] sm:$0xf]  ;;  %v6689_v59 = vld [vmem:[#allocation5 + $0x7a8] sm:$0xf] }
 0x5de   :  { %3548 = vmatpush.bf16.msra.mxu2 %v5914_v57  ;;  %3574 = vmatpush.bf16.msra.mxu0 %v5918_v16  ;;  %v7194_v57 = vld [vmem:[#allocation5 + $0x65c] sm:$0xf0]  ;;  %v6049_v16 = vld [vmem:[#allocation5 + $0x2a8] sm:$0xf] }
 0x5df   :  { %v6490_v9 = vor.u32 %v7194_v57, %v6489_v25  ;;  %v7243_v47 = vld [vmem:[#allocation5 + $0x7e4] sm:$0xf0]  ;;  %v6238_v25 = vor.u32 %v7122_v61, %v6235_v43  ;;  %v6435_v43 = vld [vmem:[#allocation5 + $0x5e8] sm:$0xf0] }
 0x5e1   :  { %3511 = vmatpush.bf16.msra.mxu3 %v6290_v13  ;;  %3537 = vmatpush.bf16.msra.mxu1 %v6294_v15  ;;  %v6050_v13 = vor.u32 %v7083_v4, %v6049_v16  ;;  %v7178_v15 = vld [vmem:[#allocation5 + $0x5dc] sm:$0xf0]  ;;  %v7003_v16 = vld [vmem:[#allocation5 + $0x64] sm:$0xf0] }
 0x5e2   :  { %3549 = vmatpush.bf16.msra.mxu2 %v5850_v34  ;;  %3575 = vmatpush.bf16.msra.mxu0 %v5854_v19  ;;  %v7170_v34 = vld [vmem:[#allocation5 + $0x5a4] sm:$0xf]  ;;  %v7067_v19 = vld [vmem:[#allocation5 + $0x264] sm:$0xf0]  ;;  %v6426_v24 = vor.u32 %v7178_v15, %v6425_v14  ;;  %v6627_v14 = vld [vmem:[#allocation5 + $0x768] sm:$0xf0] }
 0x5e3   :  { %v6430_v48 = vor.u32 %v7170_v34, %v6427_v17  ;;  %v5986_v27 = vor.u32 %v7067_v19, %v5985_v18  ;;  %v6625_v4 = vld [vmem:[#allocation5 + $0x728] sm:$0xf]  ;;  %v6185_v15 = vld [vmem:[#allocation5 + $0x3b0] sm:$0xf]  ;;  %v7108_v17 = vld [vmem:[#allocation5 + $0x3b4] sm:$0xf] }
 0x5e4   :  { %v7116_v34 = vld [vmem:[#allocation5 + $0x3ec] sm:$0xf0]  ;;  %v6187_v18 = vld [vmem:[#allocation5 + $0x3f0] sm:$0xf0]  ;;  %v6626_v19 = vor.u32 %v7227_v7, %v6625_v4 }
 0x5e5   :  { %3512 = vmatpush.bf16.msra.mxu3 %v6226_v29  ;;  %3538 = vmatpush.bf16.msra.mxu1 %v6230_v38  ;;  %v7162_v29 = vld [vmem:[#allocation5 + $0x55c] sm:$0xf0]  ;;  %v6363_v38 = vld [vmem:[#allocation5 + $0x560] sm:$0xf0]  ;;  %v5931_v4 = vld [vmem:[#allocation5 + $0x1f0] sm:$0xf0] }
 0x5e6   :  { %3550 = vmatpush.bf16.msra.mxu2 %v5786_v39  ;;  %3576 = vmatpush.bf16.msra.mxu0 %v5790_v44  ;;  %v5921_v39 = vld [vmem:[#allocation5 + $0x1a8] sm:$0xf]  ;;  %v5923_v44 = vld [vmem:[#allocation5 + $0x1e8] sm:$0xf0]  ;;  %v6362_v45 = vor.u32 %v7162_v29, %v6361_v12  ;;  %v6366_v6 = vor.u32 %v7154_v30, %v6363_v38  ;;  %v6190_v29 = vor.u32 %v7108_v17, %v6187_v18  ;;  %v7100_v38 = vld [vmem:[#allocation5 + $0x36c] sm:$0xf0] }
 0x5e7   :  { %v5922_v46 = vor.u32 %v7051_v42, %v5921_v39  ;;  %v7203_v12 = vld [vmem:[#allocation5 + $0x6ac] sm:$0xf]  ;;  %v7092_v39 = vld [vmem:[#allocation5 + $0x334] sm:$0xf]  ;;  %v5865_v17 = vld [vmem:[#allocation5 + $0x130] sm:$0xf] }
 0x5e8   :  { %3513 = vmatmul.bf16.vlgmr.msra.gmra.mxu3 %v8018_v31  ;;  %3539 = vmatmul.bf16.vlgmr.msra.gmra.mxu1 %v8018_v31  ;;  %v6563_v30 = vld [vmem:[#allocation5 + $0x6e8] sm:$0xf0]  ;;  %v6123_v42 = vld [vmem:[#allocation5 + $0x370] sm:$0xf0]  ;;  %v7036_v18 = vld [vmem:[#allocation5 + $0x16c] sm:$0xf0] }
 0x5e9   :  { %3557 = vmatpush.bf16.msrb.mxu3 %v6682_v35  ;;  %3583 = vmatpush.bf16.msrb.mxu1 %v6686_v40  ;;  %v7043_v35 = vld [vmem:[#allocation5 + $0x1ac] sm:$0xf]  ;;  %v6297_v40 = vld [vmem:[#allocation5 + $0x4a0] sm:$0xf] }
 0x5ea   :  { %3551 = vmatpush.bf16.msra.mxu2 %v5722_v55  ;;  %3577 = vmatpush.bf16.msra.mxu0 %v5726_v10  ;;  %v5926_v50 = vor.u32 %v7043_v35, %v5923_v44  ;;  %v7027_v55 = vld [vmem:[#allocation5 + $0x12c] sm:$0xf]  ;;  %v6298_v51 = vor.u32 %v7146_v41, %v6297_v40  ;;  %v6302_v10 = vor.u32 %v7138_v49, %v6299_v33  ;;  %v7084_v33 = vld [vmem:[#allocation5 + $0x2ec] sm:$0xf0] }
 0x5eb   :  { %v5862_v53 = vor.u32 %v7027_v55, %v5859_v60  ;;  %v6566_v44 = vor.u32 %v7203_v12, %v6563_v30  ;;  %v7187_v40 = vld [vmem:[#allocation5 + $0x62c] sm:$0xf]  ;;  %v6126_v41 = vor.u32 %v7092_v39, %v6123_v42  ;;  %v7131_v12 = vld [vmem:[#allocation5 + $0x464] sm:$0xf0]  ;;  %v7020_v39 = vld [vmem:[#allocation5 + $0xec] sm:$0xf0] }
 0x5ec   :  { %v6499_v49 = vld [vmem:[#allocation5 + $0x668] sm:$0xf0]  ;;  %v6697_v42 = vld [vmem:[#allocation5 + $0x7b0] sm:$0xf] }
 0x5ed   :  { %3558 = vmatpush.bf16.msrb.mxu3 %v6618_v56  ;;  %3584 = vmatpush.bf16.msrb.mxu1 %v6622_v52  ;;  %v6233_v56 = vld [vmem:[#allocation5 + $0x420] sm:$0xf]  ;;  %v5858_v52 = vor.u32 %v7035_v26, %v5857_v36  ;;  %v7076_v36 = vld [vmem:[#allocation5 + $0x2b4] sm:$0xf]  ;;  %v6502_v60 = vor.u32 %v7187_v40, %v6499_v49  ;;  %v6243_v30 = vld [vmem:[#allocation5 + $0x468] sm:$0xf0] }
 0x5ee   :  { %3596 = vmatpush.bf16.msrb.mxu2 %v6178_v5  ;;  %3622 = vmatpush.bf16.msrb.mxu0 %v6182_v54  ;;  %v7130_v5 = vld [vmem:[#allocation5 + $0x45c] sm:$0xf0]  ;;  %v5793_v54 = vld [vmem:[#allocation5 + $0xa8] sm:$0xf]  ;;  %v6059_v26 = vld [vmem:[#allocation5 + $0x2f0] sm:$0xf0] }
 0x5ef   :  { %3552 = vmatmul.bf16.vlgmr.msra.gmra.mxu2 %v8011_v22  ;;  %3578 = vmatmul.bf16.vlgmr.msra.gmra.mxu0 %v8011_v22  ;;  %v5794_v57 = vor.u32 %v7019_v58, %v5793_v54  ;;  %v6062_v61 = vor.u32 %v7076_v36, %v6059_v26  ;;  %v7068_v54 = vld [vmem:[#allocation5 + $0x26c] sm:$0xf0]  ;;  %v7060_v58 = vld [vmem:[#allocation5 + $0x234] sm:$0xf] }
 0x5f0   :  { %v7236_v40 = vld [vmem:[#allocation5 + $0x7b4] sm:$0xf]  ;;  %v5737_v36 = vld [vmem:[#allocation5 + $0x30] sm:$0xf] }
 0x5f1   :  { %3559 = vmatpush.bf16.msrb.mxu3 %v6554_v0  ;;  %3585 = vmatpush.bf16.msrb.mxu1 %v6558_v2  ;;  %v6234_v0 = vor.u32 %v7130_v5, %v6233_v56  ;;  %v7235_v2 = vld [vmem:[#allocation5 + $0x7ac] sm:$0xf] }
 0x5f2   :  { %3597 = vmatpush.bf16.msrb.mxu2 %v6114_v3  ;;  %3623 = vmatpush.bf16.msrb.mxu0 %v6118_v63  ;;  %v6691_v3 = vld [vmem:[#allocation5 + $0x7e8] sm:$0xf0]  ;;  %v6690_v63 = vor.u32 %v7243_v47, %v6689_v59  ;;  %v5995_v59 = vld [vmem:[#allocation5 + $0x270] sm:$0xf0] }
 0x5f3   :  { %v6694_v8 = vor.u32 %v7235_v2, %v6691_v3  ;;  %v7171_v5 = vld [vmem:[#allocation5 + $0x5ac] sm:$0xf]  ;;  %v7163_v2 = vld [vmem:[#allocation5 + $0x564] sm:$0xf0] }
 0x5f4   :  { %v6438_v37 = vor.u32 %v7171_v5, %v6435_v43  ;;  %v7155_v3 = vld [vmem:[#allocation5 + $0x52c] sm:$0xf]  ;;  %v6996_v5 = vld [vmem:[#allocation5 + $0x34] sm:$0xf] }
 0x5f5   :  { %3560 = vmatpush.bf16.msrb.mxu3 %v6490_v9  ;;  %3586 = vmatpush.bf16.msrb.mxu1 %v6494_v11  ;;  %v6995_v9 = vld [vmem:[#allocation5 + $0x2c] sm:$0xf]  ;;  %v7220_v43 = vld [vmem:[#allocation5 + $0x734] sm:$0xf] }
 0x5f6   :  { %3598 = vmatpush.bf16.msrb.mxu2 %v6050_v13  ;;  %3624 = vmatpush.bf16.msrb.mxu0 %v6054_v28  ;;  %v5731_v11 = vld [vmem:[#allocation5 + $0x68] sm:$0xf0]  ;;  %v5730_v28 = vor.u32 %v7003_v16, %v5729_v20  ;;  %v5929_v20 = vld [vmem:[#allocation5 + $0x1b0] sm:$0xf]  ;;  %v7044_v16 = vld [vmem:[#allocation5 + $0x1b4] sm:$0xf] }
 0x5f7   :  { %v7219_v13 = vld [vmem:[#allocation5 + $0x72c] sm:$0xf]  ;;  %v5734_v21 = vor.u32 %v6995_v9, %v5731_v11 }
 0x5f8   :  { %v6630_v23 = vor.u32 %v7219_v13, %v6627_v14  ;;  %v6305_v13 = vld [vmem:[#allocation5 + $0x4a8] sm:$0xf] }
 0x5f9   :  { %3561 = vmatpush.bf16.msrb.mxu3 %v6426_v24  ;;  %3587 = vmatpush.bf16.msrb.mxu1 %v6430_v48  ;;  %v6186_v24 = vor.u32 %v7116_v34, %v6185_v15  ;;  %v6561_v48 = vld [vmem:[#allocation5 + $0x6a8] sm:$0xf]  ;;  %v7139_v15 = vld [vmem:[#allocation5 + $0x4ac] sm:$0xf]  ;;  %v5934_v34 = vor.u32 %v7044_v16, %v5931_v4  ;;  %v7204_v16 = vld [vmem:[#allocation5 + $0x6b4] sm:$0xf] }
 0x5fa   :  { %3599 = vmatpush.bf16.msrb.mxu2 %v5986_v27  ;;  %3625 = vmatpush.bf16.msrb.mxu0 %v5990_v32  ;;  %v7211_v27 = vld [vmem:[#allocation5 + $0x6e4] sm:$0xf0]  ;;  %v6121_v32 = vld [vmem:[#allocation5 + $0x330] sm:$0xf] }
 0x5fb   :  { %v6562_v35 = vor.u32 %v7211_v27, %v6561_v48  ;;  %v7147_v14 = vld [vmem:[#allocation5 + $0x4e4] sm:$0xf0]  ;;  %v5866_v27 = vor.u32 %v7036_v18, %v5865_v17  ;;  %v6505_v18 = vld [vmem:[#allocation5 + $0x630] sm:$0xf] }
 0x5fd   :  { %3562 = vmatpush.bf16.msrb.mxu3 %v6362_v45  ;;  %3588 = vmatpush.bf16.msrb.mxu1 %v6366_v6  ;;  %v6122_v45 = vor.u32 %v7100_v38, %v6121_v32  ;;  %v6497_v6 = vld [vmem:[#allocation5 + $0x628] sm:$0xf]  ;;  %v5801_v38 = vld [vmem:[#allocation5 + $0xb0] sm:$0xf] }
 0x5fe   :  { %3600 = vmatpush.bf16.msrb.mxu2 %v5922_v46  ;;  %3626 = vmatpush.bf16.msrb.mxu0 %v5926_v50  ;;  %v7195_v46 = vld [vmem:[#allocation5 + $0x664] sm:$0xf0]  ;;  %v6057_v50 = vld [vmem:[#allocation5 + $0x2b0] sm:$0xf] }
 0x5ff   :  { %v6498_v55 = vor.u32 %v7195_v46, %v6497_v6  ;;  %v5803_v6 = vld [vmem:[#allocation5 + $0xf0] sm:$0xf0] }
 0x601   :  { %3563 = vmatpush.bf16.msrb.mxu3 %v6298_v51  ;;  %3589 = vmatpush.bf16.msrb.mxu1 %v6302_v10  ;;  %v6058_v51 = vor.u32 %v7084_v33, %v6057_v50  ;;  %v6433_v10 = vld [vmem:[#allocation5 + $0x5a8] sm:$0xf]  ;;  %v5802_v50 = vor.u32 %v7020_v39, %v5801_v38  ;;  %v6067_v38 = vld [vmem:[#allocation5 + $0x2f8] sm:$0xf0] }
 0x602   :  { %3601 = vmatpush.bf16.msrb.mxu2 %v5858_v52  ;;  %3627 = vmatpush.bf16.msrb.mxu0 %v5862_v53  ;;  %v7179_v52 = vld [vmem:[#allocation5 + $0x5e4] sm:$0xf0]  ;;  %v5993_v53 = vld [vmem:[#allocation5 + $0x230] sm:$0xf] }
 0x603   :  { %v6434_v47 = vor.u32 %v7179_v52, %v6433_v10  ;;  %v5994_v62 = vor.u32 %v7068_v54, %v5993_v53  ;;  %v7228_v10 = vld [vmem:[#allocation5 + $0x76c] sm:$0xf0]  ;;  %v6635_v53 = vld [vmem:[#allocation5 + $0x770] sm:$0xf0]  ;;  %v6193_v54 = vld [vmem:[#allocation5 + $0x3b8] sm:$0xf] }
 0x605   :  { %3564 = vmatpush.bf16.msrb.mxu3 %v6234_v0  ;;  %3590 = vmatpush.bf16.msrb.mxu1 %v6238_v25  ;;  %v6369_v0 = vld [vmem:[#allocation5 + $0x528] sm:$0xf]  ;;  %v5998_v25 = vor.u32 %v7060_v58, %v5995_v59  ;;  %v7117_v58 = vld [vmem:[#allocation5 + $0x3f4] sm:$0xf0] }
 0x606   :  { %3602 = vmatpush.bf16.msrb.mxu2 %v5794_v57  ;;  %3628 = vmatpush.bf16.msrb.mxu0 %v5798_v1  ;;  %v6371_v57 = vld [vmem:[#allocation5 + $0x568] sm:$0xf0]  ;;  %v6370_v7 = vor.u32 %v7163_v2, %v6369_v0 }
 0x608   :  { %3565 = vmatmul.bf16.vlgmr.msrb.gmra.mxu3 %v8018_v31  ;;  %3591 = vmatmul.bf16.vlgmr.msrb.gmra.mxu1 %v8018_v31 }
 0x609   :  { %3609 = vmatpush.bf16.msra.mxu3 %v6690_v63  ;;  %3635 = vmatpush.bf16.msra.mxu1 %v6694_v8  ;;  %v7052_v63 = vld [vmem:[#allocation5 + $0x1ec] sm:$0xf0]  ;;  %v6374_v8 = vor.u32 %v7155_v3, %v6371_v57  ;;  %v6638_v3 = vor.u32 %v7220_v43, %v6635_v53 }
 0x60a   :  { %3603 = vmatpush.bf16.msrb.mxu2 %v5730_v28  ;;  %3629 = vmatpush.bf16.msrb.mxu0 %v5734_v21  ;;  %v8038_v56 = vpop.f32.mrf.mxu0  ;;  %v5930_v9 = vor.u32 %v7052_v63, %v5929_v20  ;;  %v6307_v28 = vld [vmem:[#allocation5 + $0x4e8] sm:$0xf0]  ;;  %v5867_v21 = vld [vmem:[#allocation5 + $0x170] sm:$0xf0]  ;;  %v6569_v20 = vld [vmem:[#allocation5 + $0x6b0] sm:$0xf] }
 0x60b   :  { %v6310_v48 = vor.u32 %v7139_v15, %v6307_v28  ;;  %v7212_v63 = vld [vmem:[#allocation5 + $0x6ec] sm:$0xf0]  ;;  %v6131_v15 = vld [vmem:[#allocation5 + $0x378] sm:$0xf0] }
 0x60c   :  { %v6570_v28 = vor.u32 %v7212_v63, %v6569_v20  ;;  %v5939_v20 = vld [vmem:[#allocation5 + $0x1f8] sm:$0xf0] }
 0x60d   :  { %3610 = vmatpush.bf16.msra.mxu3 %v6626_v19  ;;  %3636 = vmatpush.bf16.msra.mxu1 %v6630_v23  ;;  %v7028_v19 = vld [vmem:[#allocation5 + $0x134] sm:$0xf]  ;;  %v6306_v23 = vor.u32 %v7147_v14, %v6305_v13  ;;  %v7093_v14 = vld [vmem:[#allocation5 + $0x33c] sm:$0xf] }
 0x60e   :  { %3648 = vmatpush.bf16.msra.mxu2 %v6186_v24  ;;  %3674 = vmatpush.bf16.msra.mxu0 %v6190_v29  ;;  %v6241_v24 = vld [vmem:[#allocation5 + $0x428] sm:$0xf]  ;;  %v7123_v29 = vld [vmem:[#allocation5 + $0x42c] sm:$0xf]  ;;  %v5870_v32 = vor.u32 %v7028_v19, %v5867_v21 }
 0x60f   :  { %3604 = vmatmul.bf16.vlgmr.msrb.gmra.mxu2 %v8011_v22  ;;  %3630 = vmatmul.bf16.vlgmr.msrb.gmra.mxu0 %v8011_v22  ;;  %v6242_v46 = vor.u32 %v7131_v12, %v6241_v24  ;;  %v6246_v49 = vor.u32 %v7123_v29, %v6243_v30  ;;  %v7188_v24 = vld [vmem:[#allocation5 + $0x634] sm:$0xf]  ;;  %v6065_v12 = vld [vmem:[#allocation5 + $0x2b8] sm:$0xf] }
 0x610   :  { %v8040_v1 = vpop.f32.mrf.mxu2  ;;  %v7085_v29 = vld [vmem:[#allocation5 + $0x2f4] sm:$0xf0] }
 0x611   :  { %3611 = vmatpush.bf16.msra.mxu3 %v6562_v35  ;;  %3637 = vmatpush.bf16.msra.mxu1 %v6566_v44  ;;  %v7244_v44 = vld [vmem:[#allocation5 + $0x7ec] sm:$0xf0] }
 0x612   :  { %3649 = vmatpush.bf16.msra.mxu2 %v6122_v45  ;;  %3675 = vmatpush.bf16.msra.mxu0 %v6126_v41  ;;  %v3373_v11 = vpop.f32.mrf.mxu0  ;;  %v7012_v45 = vld [vmem:[#allocation5 + $0xb4] sm:$0xf]  ;;  %v6698_v26 = vor.u32 %v7244_v44, %v6697_v42 }
 0x613   :  { %v6699_v41 = vld [vmem:[#allocation5 + $0x7f0] sm:$0xf0] }
 0x614   :  { %v6702_v52 = vor.u32 %v7236_v40, %v6699_v41  ;;  %v7180_v40 = vld [vmem:[#allocation5 + $0x5ec] sm:$0xf0]  ;;  %v7172_v41 = vld [vmem:[#allocation5 + $0x5b4] sm:$0xf] }
 0x615   :  { %3612 = vmatpush.bf16.msra.mxu3 %v6498_v55  ;;  %3638 = vmatpush.bf16.msra.mxu1 %v6502_v60  ;;  %v5806_v55 = vor.u32 %v7012_v45, %v5803_v6  ;;  %v7004_v60 = vld [vmem:[#allocation5 + $0x6c] sm:$0xf0]  ;;  %v6066_v45 = vor.u32 %v7085_v29, %v6065_v12 }
 0x616   :  { %3650 = vmatpush.bf16.msra.mxu2 %v6058_v51  ;;  %3676 = vmatpush.bf16.msra.mxu0 %v6062_v61  ;;  %v6633_v51 = vld [vmem:[#allocation5 + $0x730] sm:$0xf]  ;;  %v5739_v61 = vld [vmem:[#allocation5 + $0x70] sm:$0xf0]  ;;  %v5738_v59 = vor.u32 %v7004_v60, %v5737_v36  ;;  %v6001_v36 = vld [vmem:[#allocation5 + $0x238] sm:$0xf] }
 0x617   :  { %v6634_v0 = vor.u32 %v7228_v10, %v6633_v51  ;;  %v5742_v2 = vor.u32 %v6996_v5, %v5739_v61  ;;  %v7061_v60 = vld [vmem:[#allocation5 + $0x23c] sm:$0xf] }
 0x618   :  { %v3347_v35 = vpop.f32.mrf.mxu2  ;;  %v6003_v51 = vld [vmem:[#allocation5 + $0x278] sm:$0xf0] }
 0x619   :  { %3613 = vmatpush.bf16.msra.mxu3 %v6434_v47  ;;  %3639 = vmatpush.bf16.msra.mxu1 %v6438_v37  ;;  %v7109_v47 = vld [vmem:[#allocation5 + $0x3bc] sm:$0xf] }
 0x61a   :  { %3651 = vmatpush.bf16.msra.mxu2 %v5994_v62  ;;  %3677 = vmatpush.bf16.msra.mxu0 %v5998_v25  ;;  %v8042_v33 = vpop.f32.mrf.mxu0  ;;  %v6195_v37 = vld [vmem:[#allocation5 + $0x3f8] sm:$0xf0]  ;;  %v8047_v62 = vld [vmem:[%s9190_s7] sm:$0xff]  ;;  %v6194_v25 = vor.u32 %v7117_v58, %v6193_v54  ;;  %v7164_v58 = vld [vmem:[#allocation5 + $0x56c] sm:$0xf0] }
 0x61b   :  { %v6198_v4 = vor.u32 %v7109_v47, %v6195_v37  ;;  %v2025_v11 = vperm.slane %v8047_v62, 1  ;;  %v6006_v47 = vor.u32 %v7061_v60, %v6003_v51  ;;  %v6379_v37 = vld [vmem:[#allocation5 + $0x570] sm:$0xf0]  ;;  %v6707_v60 = vld [vmem:[#allocation5 + $0x7f8] sm:$0xf0] }
 0x61d   :  { %3614 = vmatpush.bf16.msra.mxu3 %v6370_v7  ;;  %3640 = vmatpush.bf16.msra.mxu1 %v6374_v8  ;;  %v6571_v7 = vld [vmem:[#allocation5 + $0x6f0] sm:$0xf0]  ;;  %v6129_v8 = vld [vmem:[#allocation5 + $0x338] sm:$0xf]  ;;  %v3372_v30 = vadd.f32 %v8038_v56, %v2025_v11 }
 0x61e   :  { %3652 = vmatpush.bf16.msra.mxu2 %v5930_v9  ;;  %3678 = vmatpush.bf16.msra.mxu0 %v5934_v34  ;;  %v7101_v9 = vld [vmem:[#allocation5 + $0x374] sm:$0xf0]  ;;  %v2024_v34 = vperm.slane %v8047_v62, 0  ;;  %v6574_v19 = vor.u32 %v7204_v16, %v6571_v7  ;;  %v6313_v7 = vld [vmem:[#allocation5 + $0x4b0] sm:$0xf] }
 0x61f   :  { %v6130_v21 = vor.u32 %v7101_v9, %v6129_v8  ;;  %v7148_v8 = vld [vmem:[#allocation5 + $0x4ec] sm:$0xf0]  ;;  %v7140_v9 = vld [vmem:[#allocation5 + $0x4b4] sm:$0xf] }
 0x620   :  { %v8050_v57 = vpop.f32.mrf.mxu2  ;;  %v3346_v35 = vadd.f32 %v8040_v1, %v2024_v34  ;;  %v6314_v12 = vor.u32 %v7148_v8, %v6313_v7 }
 0x621   :  { %3615 = vmatpush.bf16.msra.mxu3 %v6306_v23  ;;  %3641 = vmatpush.bf16.msra.mxu1 %v6310_v48  ;;  %v7196_v23 = vld [vmem:[#allocation5 + $0x66c] sm:$0xf0]  ;;  %v6507_v48 = vld [vmem:[#allocation5 + $0x670] sm:$0xf0] }
 0x622   :  { %3653 = vmatpush.bf16.msra.mxu2 %v5866_v27  ;;  %3679 = vmatpush.bf16.msra.mxu0 %v5870_v32  ;;  %v3425_v13 = vpop.f32.mrf.mxu0  ;;  %v6134_v27 = vor.u32 %v7093_v14, %v6131_v15  ;;  %v7077_v32 = vld [vmem:[#allocation5 + $0x2bc] sm:$0xf]  ;;  %v6506_v39 = vor.u32 %v7196_v23, %v6505_v18  ;;  %v6510_v42 = vor.u32 %v7188_v24, %v6507_v48  ;;  %v7037_v18 = vld [vmem:[#allocation5 + $0x174] sm:$0xf0] }
 0x623   :  { %v5875_v23 = vld [vmem:[#allocation5 + $0x178] sm:$0xf0] }
 0x625   :  { %3616 = vmatpush.bf16.msra.mxu3 %v6242_v46  ;;  %3642 = vmatpush.bf16.msra.mxu1 %v6246_v49  ;;  %v3384_v17 = vpop.f32.mrf.mxu1  ;;  %v6441_v46 = vld [vmem:[#allocation5 + $0x5b0] sm:$0xf]  ;;  %v6070_v49 = vor.u32 %v7077_v32, %v6067_v38 }
 0x626   :  { %3654 = vmatpush.bf16.msra.mxu2 %v5802_v50  ;;  %3680 = vmatpush.bf16.msra.mxu0 %v5806_v55  ;;  %v3385_v44 = vadd.f32 %v3384_v17, %v3372_v30  ;;  %v6443_v50 = vld [vmem:[#allocation5 + $0x5f0] sm:$0xf0]  ;;  %v6442_v10 = vor.u32 %v7180_v40, %v6441_v46  ;;  %v5873_v17 = vld [vmem:[#allocation5 + $0x138] sm:$0xf]  ;;  %v6249_v30 = vld [vmem:[#allocation5 + $0x430] sm:$0xf] }
 0x627   :  { %v6446_v43 = vor.u32 %v7172_v41, %v6443_v50  ;;  %v7021_v46 = vld [vmem:[#allocation5 + $0xf4] sm:$0xf0]  ;;  %v5811_v50 = vld [vmem:[#allocation5 + $0xf8] sm:$0xf0] }
 0x628   :  { %3617 = vmatmul.bf16.vlgmr.msra.gmra.mxu3 %v8018_v31  ;;  %3643 = vmatmul.bf16.vlgmr.msra.gmra.mxu1 %v8018_v31  ;;  %v3399_v6 = vpop.f32.mrf.mxu2  ;;  %v3753_v5 = vmax.f32 %v3385_v44, 0.0  ;;  %v6251_v44 = vld [vmem:[#allocation5 + $0x470] sm:$0xf0]  ;;  %v6705_v40 = vld [vmem:[#allocation5 + $0x7b8] sm:$0xf] }
 0x629   :  { %3661 = vmatpush.bf16.msrb.mxu3 %v6698_v26  ;;  %3687 = vmatpush.bf16.msrb.mxu1 %v6702_v52  ;;  %v7069_v26 = vld [vmem:[#allocation5 + $0x274] sm:$0xf0]  ;;  %v6377_v52 = vld [vmem:[#allocation5 + $0x530] sm:$0xf] }
 0x62a   :  { %3655 = vmatpush.bf16.msra.mxu2 %v5738_v59  ;;  %3681 = vmatpush.bf16.msra.mxu0 %v5742_v2  ;;  %v6002_v54 = vor.u32 %v7069_v26, %v6001_v36  ;;  %v7156_v59 = vld [vmem:[#allocation5 + $0x534] sm:$0xf]  ;;  %v7053_v2 = vld [vmem:[#allocation5 + $0x1f4] sm:$0xf0]  ;;  %v6378_v63 = vor.u32 %v7164_v58, %v6377_v52 }
 0x62b   :  { %v3358_v56 = vpop.f32.mrf.mxu3  ;;  %v6382_v16 = vor.u32 %v7156_v59, %v6379_v37  ;;  %v5809_v6 = vld [vmem:[#allocation5 + $0xb8] sm:$0xf] }
 0x62c   :  { %v3359_v55 = vadd.f32 %v3358_v56, %v3346_v35  ;;  %v8059_v53 = vpop.f32.mrf.mxu0  ;;  %v7124_v35 = vld [vmem:[#allocation5 + $0x434] sm:$0xf]  ;;  %v7013_v56 = vld [vmem:[#allocation5 + $0xbc] sm:$0xf]  ;;  %v6641_v58 = vld [vmem:[#allocation5 + $0x738] sm:$0xf] }
 0x62d   :  { %3662 = vmatpush.bf16.msrb.mxu3 %v6634_v0  ;;  %3688 = vmatpush.bf16.msrb.mxu1 %v6638_v3  ;;  %v3386_v1 = vpop.f32.mrf.mxu1  ;;  %v5937_v0 = vld [vmem:[#allocation5 + $0x1b8] sm:$0xf]  ;;  %v6254_v26 = vor.u32 %v7124_v35, %v6251_v44  ;;  %v8111_v35 = vld [vmem:[%s9191_s8 + $0xf0] sm:$0xff]  ;;  %v7189_v44 = vld [vmem:[#allocation5 + $0x63c] sm:$0xf] }
 0x62e   :  { %3700 = vmatpush.bf16.msrb.mxu2 %v6194_v25  ;;  %3726 = vmatpush.bf16.msrb.mxu0 %v6198_v4  ;;  %v3752_v61 = vmax.f32 %v3359_v55, 0.0  ;;  %v7045_v25 = vld [vmem:[#allocation5 + $0x1bc] sm:$0xf]  ;;  %v5938_v4 = vor.u32 %v7053_v2, %v5937_v0  ;;  %v5810_v1 = vor.u32 %v7021_v46, %v5809_v6  ;;  %v7229_v37 = vld [vmem:[#allocation5 + $0x774] sm:$0xf0]  ;;  %v2028_v6 = vperm.slane %v8047_v62, 4 }
 0x62f   :  { %3656 = vmatmul.bf16.vlgmr.msra.gmra.mxu2 %v8011_v22  ;;  %3682 = vmatmul.bf16.vlgmr.msra.gmra.mxu0 %v8011_v22  ;;  %v5942_v14 = vor.u32 %v7045_v25, %v5939_v20  ;;  %v7237_v55 = vld [vmem:[#allocation5 + $0x7bc] sm:$0xf]  ;;  %v6642_v7 = vor.u32 %v7229_v37, %v6641_v58 }
 0x630   :  { %v8061_v3 = vpack.c.bf16 %v3753_v5, %v3752_v61  ;;  %v6710_v59 = vor.u32 %v7237_v55, %v6707_v60  ;;  %v6997_v0 = vld [vmem:[#allocation5 + $0x3c] sm:$0xf] }
 0x631   :  { %3663 = vmatpush.bf16.msrb.mxu3 %v6570_v28  ;;  %3689 = vmatpush.bf16.msrb.mxu1 %v6574_v19  ;;  %v6315_v28 = vld [vmem:[#allocation5 + $0x4f0] sm:$0xf0]  ;;  %v2027_v19 = vperm.slane %v8047_v62, 3  ;;  %v5747_v2 = vld [vmem:[#allocation5 + $0x78] sm:$0xf0] }
 0x632   :  { %3701 = vmatpush.bf16.msrb.mxu2 %v6130_v21  ;;  %3727 = vmatpush.bf16.msrb.mxu0 %v6134_v27  ;;  %v4006_v11 = vunpack.c.h.b16 %v8061_v3  ;;  %v4005_v13 = vunpack.c.l.b16 %v8061_v3  ;;  %v8065_v34 = vpop.f32.mrf.mxu2  ;;  %v7029_v21 = vld [vmem:[#allocation5 + $0x13c] sm:$0xf]  ;;  %v2026_v27 = vperm.slane %v8047_v62, 2  ;;  %v6318_v32 = vor.u32 %v7140_v9, %v6315_v28 }
 0x633   :  { %v3360_v15 = vpop.f32.mrf.mxu3  ;;  %v3424_v41 = vadd.f32 %v8042_v33, %v2027_v19  ;;  %v5814_v33 = vor.u32 %v7013_v56, %v5811_v50  ;;  %v6643_v20 = vld [vmem:[#allocation5 + $0x778] sm:$0xf0]  ;;  %v5750_v8 = vor.u32 %v6997_v0, %v5747_v2  ;;  %v8124_v56 = vld [vmem:[%s9191_s8 + $0x68] sm:$0xff]  ;;  %v7181_v50 = vld [vmem:[#allocation5 + $0x5f4] sm:$0xf0]  ;;  %v3450_v55 = vadd.f32 %v8065_v34, %v2028_v6 }
 0x634   :  { %v8068_v24 = vpack.c.b16 %v4006_v11, %v4006_v11  ;;  %v8070_v48 = vpack.c.b16 %v4005_v13, %v4005_v13  ;;  %v3477_v38 = vpop.f32.mrf.mxu0  ;;  %v3398_v51 = vadd.f32 %v8050_v57, %v2026_v27  ;;  %v7221_v57 = vld [vmem:[#allocation5 + $0x73c] sm:$0xf]  ;;  %v7213_v15 = vld [vmem:[#allocation5 + $0x6f4] sm:$0xf0]  ;;  %v8145_v34 = vld [vmem:[%s9191_s8 + $0xe0] sm:$0xff] }
 0x635   :  { %3664 = vmatpush.bf16.msrb.mxu3 %v6506_v39  ;;  %3690 = vmatpush.bf16.msrb.mxu1 %v6510_v42  ;;  %v3436_v29 = vpop.f32.mrf.mxu1  ;;  %v5874_v39 = vor.u32 %v7037_v18, %v5873_v17  ;;  %v7132_v42 = vld [vmem:[#allocation5 + $0x46c] sm:$0xf0]  ;;  %v6646_v11 = vor.u32 %v7221_v57, %v6643_v20  ;;  %v8085_v13 = vld [vmem:[%s9191_s8 + $0x78] sm:$0xff] }
 0x636   :  { %3702 = vmatpush.bf16.msrb.mxu2 %v6066_v45  ;;  %3728 = vmatpush.bf16.msrb.mxu0 %v6070_v49  ;;  %v5878_v45 = vor.u32 %v7029_v21, %v5875_v23  ;;  %v7245_v49 = vld [vmem:[#allocation5 + $0x7f4] sm:$0xf0]  ;;  %v6250_v36 = vor.u32 %v7132_v42, %v6249_v30  ;;  %v7205_v17 = vld [vmem:[#allocation5 + $0x6bc] sm:$0xf]  ;;  %v8100_v30 = vld [vmem:[%s9191_s8 + $0x70] sm:$0xff] }
 0x637   :  { %4011 = vrot.lane.b32.xlu2 %v8068_v24, %s7588_s0  ;;  %4009 = vrot.lane.b32.xlu1 %v8070_v48, %s7588_s0  ;;  %v6706_v52 = vor.u32 %v7245_v49, %v6705_v40  ;;  %v8091_v28 = vld [vmem:[%s9191_s8 + $0xf8] sm:$0xff] }
 0x638   :  { %v6579_v18 = vld [vmem:[#allocation5 + $0x6f8] sm:$0xf0]  ;;  %v7197_v38 = vld [vmem:[#allocation5 + $0x674] sm:$0xf0] }
 0x639   :  { %3665 = vmatpush.bf16.msrb.mxu3 %v6442_v10  ;;  %3691 = vmatpush.bf16.msrb.mxu1 %v6446_v43  ;;  %v3437_v10 = vadd.f32 %v3436_v29, %v3424_v41  ;;  %v5745_v43 = vld [vmem:[#allocation5 + $0x38] sm:$0xf]  ;;  %v6582_v29 = vor.u32 %v7205_v17, %v6579_v18  ;;  %v6387_v58 = vld [vmem:[#allocation5 + $0x578] sm:$0xf0] }
 0x63a   :  { %3703 = vmatpush.bf16.msrb.mxu2 %v6002_v54  ;;  %3729 = vmatpush.bf16.msrb.mxu0 %v6006_v47  ;;  %v3451_v61 = vpop.f32.mrf.mxu2  ;;  %v7005_v54 = vld [vmem:[#allocation5 + $0x74] sm:$0xf0] }
 0x63b   :  { %v3410_v5 = vpop.f32.mrf.mxu3  ;;  %v6385_v61 = vld [vmem:[#allocation5 + $0x538] sm:$0xf] }
 0x63c   :  { %v3411_v47 = vadd.f32 %v3410_v5, %v3398_v51  ;;  %v8155_v57 = vld [vmem:[%s9191_s8 + $0x58] sm:$0xff] }
 0x63d   :  { %3666 = vmatpush.bf16.msrb.mxu3 %v6378_v63  ;;  %3692 = vmatpush.bf16.msrb.mxu1 %v6382_v16  ;;  %v3438_v25 = vpop.f32.mrf.mxu1  ;;  %v3755_v63 = vmax.f32 %v3437_v10, 0.0  ;;  %v6321_v20 = vld [vmem:[#allocation5 + $0x4b8] sm:$0xf] }
 0x63e   :  { %3704 = vmatpush.bf16.msrb.mxu2 %v5938_v4  ;;  %3730 = vmatpush.bf16.msrb.mxu0 %v5942_v14  ;;  %v3754_v16 = vmax.f32 %v3411_v47, 0.0  ;;  %v5746_v4 = vor.u32 %v7005_v54, %v5745_v43  ;;  %v6577_v14 = vld [vmem:[#allocation5 + $0x6b8] sm:$0xf]  ;;  %v7157_v54 = vld [vmem:[#allocation5 + $0x53c] sm:$0xf] }
 0x63f   :  { %v6578_v23 = vor.u32 %v7213_v15, %v6577_v14  ;;  %v7165_v43 = vld [vmem:[#allocation5 + $0x574] sm:$0xf0]  ;;  %v6390_v25 = vor.u32 %v7157_v54, %v6387_v58 }
 0x640   :  { %v8079_v9 = vpack.c.bf16 %v3755_v63, %v3754_v16  ;;  %v6386_v0 = vor.u32 %v7165_v43, %v6385_v61  ;;  %v7149_v63 = vld [vmem:[#allocation5 + $0x4f4] sm:$0xf0] }
 0x641   :  { %3667 = vmatpush.bf16.msrb.mxu3 %v6314_v12  ;;  %3693 = vmatpush.bf16.msrb.mxu1 %v6318_v32  ;;  %v2029_v12 = vperm.slane %v8047_v62, 5  ;;  %v6513_v32 = vld [vmem:[#allocation5 + $0x638] sm:$0xf]  ;;  %v6322_v15 = vor.u32 %v7149_v63, %v6321_v20 }
 0x642   :  { %3705 = vmatpush.bf16.msrb.mxu2 %v5874_v39  ;;  %3731 = vmatpush.bf16.msrb.mxu0 %v5878_v45  ;;  %v4043_v19 = vunpack.c.l.b16 %v8079_v9  ;;  %v4044_v21 = vunpack.c.h.b16 %v8079_v9  ;;  %v6515_v45 = vld [vmem:[#allocation5 + $0x678] sm:$0xf0]  ;;  %v6514_v40 = vor.u32 %v7197_v38, %v6513_v32 }
 0x643   :  { %v3412_v27 = vpop.f32.mrf.mxu3  ;;  %v3476_v41 = vadd.f32 %v8059_v53, %v2029_v12  ;;  %v6518_v49 = vor.u32 %v7189_v44, %v6515_v45  ;;  %v6451_v53 = vld [vmem:[#allocation5 + $0x5f8] sm:$0xf0] }
 0x644   :  { %v8102_v39 = vpack.c.b16 %v4043_v19, %v4043_v19  ;;  %v8104_v42 = vpack.c.b16 %v4044_v21, %v4044_v21  ;;  %v8161_v16 = vld [vmem:[%s9191_s8 + $0xd8] sm:$0xff]  ;;  %v8169_v19 = vld [vmem:[%s9191_s8 + $0x50] sm:$0xff] }
 0x645   :  { %3668 = vmatpush.bf16.msrb.mxu3 %v6250_v36  ;;  %3694 = vmatpush.bf16.msrb.mxu1 %v6254_v26  ;;  %v3488_v46 = vpop.f32.mrf.mxu1  ;;  %v8130_v36 = vld [vmem:[%s9191_s8 + $0xe8] sm:$0xff]  ;;  %v7173_v26 = vld [vmem:[#allocation5 + $0x5bc] sm:$0xf]  ;;  %v6257_v21 = vld [vmem:[#allocation5 + $0x438] sm:$0xf] }
 0x646   :  { %3706 = vmatpush.bf16.msrb.mxu2 %v5810_v1  ;;  %3732 = vmatpush.bf16.msrb.mxu0 %v5814_v33  ;;  %v3489_v60 = vadd.f32 %v3488_v46, %v3476_v41  ;;  %v8139_v33 = vld [vmem:[%s9191_s8 + $0x60] sm:$0xff]  ;;  %v7125_v32 = vld [vmem:[#allocation5 + $0x43c] sm:$0xf] }
 0x647   :  { %4047 = vrot.lane.b32.xlu0 %v8102_v39, %s7588_s0  ;;  %4049 = vrot.lane.b32.xlu1 %v8104_v42, %s7588_s0  ;;  %v6259_v38 = vld [vmem:[#allocation5 + $0x478] sm:$0xf0] }
 0x648   :  { %3669 = vmatmul.bf16.vlgmr.msrb.gmra.mxu3 %v8018_v31  ;;  %3695 = vmatmul.bf16.vlgmr.msrb.gmra.mxu1 %v8018_v31  ;;  %v8182_v45 = vld [vmem:[%s9191_s8 + $0xb8] sm:$0xff]  ;;  %v6262_v6 = vor.u32 %v7125_v32, %v6259_v38 }
 0x649   :  { %3713 = vmatpush.bf16.msra.mxu3 %v6706_v52  ;;  %3739 = vmatpush.bf16.msra.mxu1 %v6710_v59  ;;  %v6454_v52 = vor.u32 %v7173_v26, %v6451_v53  ;;  %v3757_v59 = vmax.f32 %v3489_v60, 0.0 }
 0x64a   :  { %3707 = vmatpush.bf16.msrb.mxu2 %v5746_v4  ;;  %3733 = vmatpush.bf16.msrb.mxu0 %v5750_v8  ;;  %v7141_v4 = vld [vmem:[#allocation5 + $0x4bc] sm:$0xf] }
 0x64b   :  { %v3462_v1 = vpop.f32.mrf.mxu3 }
 0x64c   :  { %v8133_v51 = vpop.f32.mrf.mxu0  ;;  %v3463_v5 = vadd.f32 %v3462_v1, %v3450_v55 }
 0x64d   :  { %3714 = vmatpush.bf16.msra.mxu3 %v6642_v7  ;;  %3740 = vmatpush.bf16.msra.mxu1 %v6646_v11  ;;  %v3490_v37 = vpop.f32.mrf.mxu1  ;;  %v6323_v7 = vld [vmem:[#allocation5 + $0x4f8] sm:$0xf0] }
 0x64e   :  { %3882 = vmatpush.bf16.msra.mxu2 %v8085_v13  ;;  %3991 = vmatpush.bf16.msra.mxu0 %v8091_v28  ;;  %v3756_v47 = vmax.f32 %v3463_v5, 0.0  ;;  %v6326_v18 = vor.u32 %v7141_v4, %v6323_v7  ;;  %v8270_v37 = vld [vmem:[%s9190_s7 + $0x8] sm:$0xff] }
 0x64f   :  { %3708 = vmatmul.bf16.vlgmr.msrb.gmra.mxu2 %v8011_v22  ;;  %3734 = vmatmul.bf16.vlgmr.msrb.gmra.mxu0 %v8011_v22  ;;  %v6449_v22 = vld [vmem:[#allocation5 + $0x5b8] sm:$0xf]  ;;  %v2032_v20 = vperm.slane %v8270_v37, 0 }
 0x650   :  { %v6450_v10 = vor.u32 %v7181_v50, %v6449_v22  ;;  %4117 = vrot.lane.b32.xlu1 %v8070_v48, %s7587_s3  ;;  %v8150_v2 = vpack.c.bf16 %v3757_v59, %v3756_v47  ;;  %v8236_v50 = vld [vmem:[%s9191_s8 + $0x98] sm:$0xff] }
 0x651   :  { %3715 = vmatpush.bf16.msra.mxu3 %v6578_v23  ;;  %3741 = vmatpush.bf16.msra.mxu1 %v6582_v29  ;;  %v7133_v23 = vld [vmem:[#allocation5 + $0x474] sm:$0xf0]  ;;  %v8175_v29 = vld [vmem:[%s9191_s8 + $0xd0] sm:$0xff] }
 0x652   :  { %3883 = vmatpush.bf16.msra.mxu2 %v8100_v30  ;;  %3992 = vmatpush.bf16.msra.mxu0 %v8111_v35  ;;  %v3501_v48 = vpop.f32.mrf.mxu2  ;;  %v4081_v8 = vunpack.c.h.b16 %v8150_v2  ;;  %v4080_v11 = vunpack.c.l.b16 %v8150_v2  ;;  %v6258_v44 = vor.u32 %v7133_v23, %v6257_v21 }
 0x653   :  { %v3464_v17 = vpop.f32.mrf.mxu3 }
 0x654   :  { %v3529_v14 = vpop.f32.mrf.mxu0  ;;  %v4083_v27 = vpack.c.b16 %v4081_v8, %v4081_v8  ;;  %v4082_v12 = vpack.c.b16 %v4080_v11, %v4080_v11  ;;  %v8295_v17 = vld [vmem:[%s9191_s8 + $0x88] sm:$0xff] }
 0x655   :  { %3716 = vmatpush.bf16.msra.mxu3 %v6514_v40  ;;  %3742 = vmatpush.bf16.msra.mxu1 %v6518_v49 }
 0x656   :  { %3884 = vmatpush.bf16.msra.mxu2 %v8124_v56  ;;  %3993 = vmatpush.bf16.msra.mxu0 %v8130_v36 }
 0x657   :  { %4086 = vrot.lane.b32.xlu0 %v4083_v27, %s7588_s0  ;;  %4084 = vrot.lane.b32.xlu2 %v4082_v12, %s7588_s0 }
 0x658   :  { %4140 = vrot.lane.b32.xlu1 %v8104_v42, %s7587_s3  ;;  %v8198_v42 = vld [vmem:[%s9191_s8 + $0xb0] sm:$0xff] }
 0x659   :  { %3717 = vmatpush.bf16.msra.mxu3 %v6450_v10  ;;  %3743 = vmatpush.bf16.msra.mxu1 %v6454_v52  ;;  %v8245_v10 = vld [vmem:[%s9191_s8 + $0x90] sm:$0xff] }
 0x65a   :  { %3885 = vmatpush.bf16.msra.mxu2 %v8139_v33  ;;  %3994 = vmatpush.bf16.msra.mxu0 %v8145_v34  ;;  %v3503_v46 = vpop.f32.mrf.mxu2 }
 0x65d   :  { %3718 = vmatpush.bf16.msra.mxu3 %v6386_v0  ;;  %3744 = vmatpush.bf16.msra.mxu1 %v6390_v25  ;;  %v2033_v0 = vperm.slane %v8270_v37, 1  ;;  %v8277_v25 = vld [vmem:[%s9191_s8 + $0x48] sm:$0xff] }
 0x65e   :  { %3886 = vmatpush.bf16.msra.mxu2 %v8155_v57  ;;  %3995 = vmatpush.bf16.msra.mxu0 %v8161_v16 }
 0x65f   :  { %4138 = vrot.lane.b32.xlu0 %v8102_v39, %s7587_s3  ;;  %4119 = vrot.lane.b32.xlu2 %v8068_v24, %s7587_s3  ;;  %v2031_v39 = vperm.slane %v8047_v62, 7  ;;  %v8224_v24 = vld [vmem:[%s9191_s8 + $0xa0] sm:$0xff] }
 0x661   :  { %3719 = vmatpush.bf16.msra.mxu3 %v6322_v15  ;;  %3745 = vmatpush.bf16.msra.mxu1 %v6326_v18  ;;  %v3528_v41 = vadd.f32 %v8133_v51, %v2031_v39 }
 0x662   :  { %3887 = vmatpush.bf16.msra.mxu2 %v8169_v19  ;;  %3996 = vmatpush.bf16.msra.mxu0 %v8175_v29 }
 0x665   :  { %3720 = vmatpush.bf16.msra.mxu3 %v6258_v44  ;;  %6735 = vmatmul.msk.bf16.vlgmr.msra.gmra.mxu2 %vm398_vm5, %v8061_v3  ;;  %v8213_v3 = vld [vmem:[%s9191_s8 + $0xa8] sm:$0xff]  ;;  %v3540_v40 = vpop.f32.mrf.mxu1 }
 0x666   :  { %4065 = vmatpush.bf16.msrb.mxu2 %v8182_v45  ;;  %4124 = vmatpush.bf16.msrb.mxu0 %v8085_v13  ;;  %v3541_v49 = vadd.f32 %v3540_v40, %v3528_v41  ;;  %v8319_v40 = vld [vmem:[%s9191_s8 + $0xc8] sm:$0xff] }
 0x667   :  { %3746 = vmatpush.bf16.msra.mxu1 %v6262_v6  ;;  %6785 = vmatmul.msk.bf16.vlgmr.msra.gmra.mxu0 %vm398_vm5, %v8150_v2 }
 0x668   :  { %3721 = vmatmul.bf16.vlgmr.msra.gmra.mxu3 %v8018_v31  ;;  %4160 = vrot.lane.b32.xlu0 %v4083_v27, %s7587_s3  ;;  %v3759_v55 = vmax.f32 %v3541_v49, 0.0  ;;  %v8303_v27 = vld [vmem:[%s9191_s8 + $0x80] sm:$0xff]  ;;  %v2035_v49 = vperm.slane %v8270_v37, 3 }
 0x669   :  { %3938 = vmatpush.bf16.msrb.mxu3 %v8182_v45  ;;  %4158 = vrot.lane.b32.xlu2 %v4082_v12, %s7587_s3 }
 0x66a   :  { %3747 = vmatmul.bf16.vlgmr.msra.gmra.mxu1 %v8018_v31  ;;  %4066 = vmatpush.bf16.msrb.mxu2 %v8198_v42  ;;  %v2030_v31 = vperm.slane %v8047_v62, 6 }
 0x66b   :  { %4028 = vmatpush.bf16.msrb.mxu1 %v8085_v13  ;;  %4125 = vmatpush.bf16.msrb.mxu0 %v8100_v30  ;;  %v3514_v26 = vpop.f32.mrf.mxu3 }
 0x66c   :  { %v3502_v62 = vadd.f32 %v3501_v48, %v2030_v31  ;;  %v3579_v22 = vpop.f32.mrf.mxu0  ;;  %v8285_v48 = vld [vmem:[%s9191_s8 + $0x40] sm:$0xff] }
 0x66d   :  { %3939 = vmatpush.bf16.msrb.mxu3 %v8198_v42  ;;  %v3542_v51 = vpop.f32.mrf.mxu1  ;;  %v3580_v4 = vadd.f32 %v3579_v22, %v2033_v0  ;;  %v2034_v22 = vperm.slane %v8270_v37, 2 }
 0x66e   :  { %4067 = vmatpush.bf16.msrb.mxu2 %v8213_v3  ;;  %v3515_v53 = vadd.f32 %v3514_v26, %v3502_v62  ;;  %v8328_v62 = vld [vmem:[%s9191_s8 + $0xc0] sm:$0xff] }
 0x66f   :  { %4029 = vmatpush.bf16.msrb.mxu1 %v8100_v30  ;;  %4126 = vmatpush.bf16.msrb.mxu0 %v8124_v56 }
 0x670   :  { %v3758_v60 = vmax.f32 %v3515_v53, 0.0 }
 0x671   :  { %3940 = vmatpush.bf16.msrb.mxu3 %v8213_v3 }
 0x672   :  { %4068 = vmatpush.bf16.msrb.mxu2 %v8224_v24  ;;  %v8248_v1 = vpack.c.bf16 %v3759_v55, %v3758_v60  ;;  %v3553_v52 = vpop.f32.mrf.mxu2 }
 0x673   :  { %4030 = vmatpush.bf16.msrb.mxu1 %v8124_v56  ;;  %4127 = vmatpush.bf16.msrb.mxu0 %v8139_v33  ;;  %v3516_v54 = vpop.f32.mrf.mxu3  ;;  %v3554_v7 = vadd.f32 %v3553_v52, %v2032_v20 }
 0x674   :  { %v4372_v5 = vunpack.c.h.b16 %v8248_v1  ;;  %v4371_v61 = vunpack.c.l.b16 %v8248_v1  ;;  %v3581_v43 = vpop.f32.mrf.mxu0 }
 0x675   :  { %3941 = vmatpush.bf16.msrb.mxu3 %v8224_v24 }
 0x676   :  { %4069 = vmatpush.bf16.msrb.mxu2 %v8236_v50  ;;  %v8256_v58 = vpack.c.b16 %v4372_v5, %v4372_v5  ;;  %v4373_v59 = vpack.c.b16 %v4371_v61, %v4371_v61 }
 0x677   :  { %4031 = vmatpush.bf16.msrb.mxu1 %v8139_v33  ;;  %4128 = vmatpush.bf16.msrb.mxu0 %v8155_v57 }
 0x678   :  { %4377 = vrot.lane.b32.xlu2 %v8256_v58, %s7588_s0  ;;  %4375 = vrot.lane.b32.xlu1 %v4373_v59, %s7588_s0 }
 0x679   :  { %3942 = vmatpush.bf16.msrb.mxu3 %v8236_v50 }
 0x67a   :  { %4070 = vmatpush.bf16.msrb.mxu2 %v8245_v10  ;;  %v3555_v47 = vpop.f32.mrf.mxu2 }
 0x67b   :  { %4032 = vmatpush.bf16.msrb.mxu1 %v8155_v57  ;;  %4129 = vmatpush.bf16.msrb.mxu0 %v8169_v19 }
 0x67d   :  { %3943 = vmatpush.bf16.msrb.mxu3 %v8245_v10 }
 0x67e   :  { %4071 = vmatpush.bf16.msrb.mxu2 %v8295_v17 }
 0x67f   :  { %4033 = vmatpush.bf16.msrb.mxu1 %v8169_v19  ;;  %4130 = vmatpush.bf16.msrb.mxu0 %v8277_v25 }
 0x680   :  { %6760 = vmatmul.msk.bf16.vlgmr.msrb.gmra.mxu3 %vm398_vm5, %v8079_v9  ;;  %4449 = vrot.lane.b32.xlu2 %v4373_v59, %s7587_s3 }
 0x681   :  { %4102 = vmatpush.bf16.msra.mxu3 %v8091_v28 }
 0x682   :  { %4072 = vmatpush.bf16.msrb.mxu2 %v8303_v27 }
 0x683   :  { %4034 = vmatpush.bf16.msrb.mxu1 %v8277_v25  ;;  %4131 = vmatpush.bf16.msrb.mxu0 %v8285_v48 }
 0x685   :  { %4103 = vmatpush.bf16.msra.mxu3 %v8111_v35  ;;  %v3592_v63 = vpop.f32.mrf.mxu1 }
 0x686   :  { %v3593_v8 = vadd.f32 %v3592_v63, %v3580_v4  ;;  %4164 = vmatpush.bf16.msra.mxu2 %v8091_v28 }
 0x687   :  { %4035 = vmatpush.bf16.msrb.mxu1 %v8285_v48  ;;  %4201 = vmatpush.bf16.msra.mxu0 %v8213_v3 }
 0x688   :  { %v3761_v18 = vmax.f32 %v3593_v8, 0.0 }
 0x689   :  { %4104 = vmatpush.bf16.msra.mxu3 %v8130_v36 }
 0x68a   :  { %4165 = vmatpush.bf16.msra.mxu2 %v8111_v35 }
 0x68b   :  { %v3566_v14 = vpop.f32.mrf.mxu3  ;;  %4144 = vmatpush.bf16.msra.mxu1 %v8182_v45  ;;  %4202 = vmatpush.bf16.msra.mxu0 %v8224_v24 }
 0x68c   :  { %v3631_v11 = vpop.f32.mrf.mxu0  ;;  %v3567_v15 = vadd.f32 %v3566_v14, %v3554_v7 }
 0x68d   :  { %4105 = vmatpush.bf16.msra.mxu3 %v8145_v34  ;;  %v3594_v23 = vpop.f32.mrf.mxu1  ;;  %v3632_v53 = vadd.f32 %v3631_v11, %v2035_v49 }
 0x68e   :  { %v3760_v21 = vmax.f32 %v3567_v15, 0.0  ;;  %4166 = vmatpush.bf16.msra.mxu2 %v8130_v36 }
 0x68f   :  { %4145 = vmatpush.bf16.msra.mxu1 %v8198_v42  ;;  %4203 = vmatpush.bf16.msra.mxu0 %v8236_v50 }
 0x690   :  { %v8305_v12 = vpack.c.bf16 %v3761_v18, %v3760_v21 }
 0x691   :  { %4106 = vmatpush.bf16.msra.mxu3 %v8161_v16 }
 0x692   :  { %v3605_v32 = vpop.f32.mrf.mxu2  ;;  %v4396_v38 = vunpack.c.l.b16 %v8305_v12  ;;  %v4397_v44 = vunpack.c.h.b16 %v8305_v12  ;;  %4167 = vmatpush.bf16.msra.mxu2 %v8145_v34 }
 0x693   :  { %v3568_v46 = vpop.f32.mrf.mxu3  ;;  %4146 = vmatpush.bf16.msra.mxu1 %v8213_v3  ;;  %4204 = vmatpush.bf16.msra.mxu0 %v8245_v10  ;;  %v3606_v55 = vadd.f32 %v3605_v32, %v2034_v22 }
 0x694   :  { %v3633_v6 = vpop.f32.mrf.mxu0  ;;  %v4398_v39 = vpack.c.b16 %v4396_v38, %v4396_v38  ;;  %v4399_v31 = vpack.c.b16 %v4397_v44, %v4397_v44  ;;  %v2037_v38 = vperm.slane %v8270_v37, 5  ;;  %v2036_v44 = vperm.slane %v8270_v37, 4 }
 0x695   :  { %4107 = vmatpush.bf16.msra.mxu3 %v8175_v29 }
 0x696   :  { %4400 = vrot.lane.b32.xlu0 %v4398_v39, %s7588_s0  ;;  %4471 = vrot.lane.b32.xlu2 %v4399_v31, %s7587_s3 }
 0x697   :  { %4402 = vrot.lane.b32.xlu1 %v4399_v31, %s7588_s0  ;;  %4147 = vmatpush.bf16.msra.mxu1 %v8224_v24 }
 0x698   :  { %4205 = vmatpush.bf16.msra.mxu0 %v8295_v17  ;;  %4168 = vmatpush.bf16.msra.mxu2 %v8161_v16 }
 0x699   :  { %4108 = vmatpush.bf16.msra.mxu3 %v8319_v40 }
 0x69a   :  { %v3607_v41 = vpop.f32.mrf.mxu2 }
 0x69b   :  { %4148 = vmatpush.bf16.msra.mxu1 %v8236_v50 }
 0x69c   :  { %4206 = vmatpush.bf16.msra.mxu0 %v8303_v27  ;;  %4169 = vmatpush.bf16.msra.mxu2 %v8175_v29 }
 0x69d   :  { %4109 = vmatpush.bf16.msra.mxu3 %v8328_v62 }
 0x69e   :  { %4451 = vrot.lane.b32.xlu0 %v8256_v58, %s7587_s3  ;;  %v8352_v58 = vpop.permute.xlu2 %4011 }
 0x69f   :  { %4469 = vrot.lane.b32.xlu1 %v4398_v39, %s7587_s3  ;;  %4149 = vmatpush.bf16.msra.mxu1 %v8245_v10 }
 0x6a0   :  { %4170 = vmatpush.bf16.msra.mxu2 %v8319_v40 }
 0x6a1   :  { %4184 = vmatpush.bf16.msrb.mxu3 %v8124_v56 }
 0x6a3   :  { %4150 = vmatpush.bf16.msra.mxu1 %v8295_v17 }
 0x6a4   :  { %4171 = vmatpush.bf16.msra.mxu2 %v8328_v62 }
 0x6a5   :  { %4185 = vmatpush.bf16.msrb.mxu3 %v8139_v33  ;;  %v3644_v26 = vpop.f32.mrf.mxu1 }
 0x6a6   :  { %v3645_v60 = vadd.f32 %v3644_v26, %v3632_v53 }
 0x6a7   :  { %4151 = vmatpush.bf16.msra.mxu1 %v8303_v27 }
 0x6a8   :  { %v3763_v61 = vmax.f32 %v3645_v60, 0.0 }
 0x6a9   :  { %4186 = vmatpush.bf16.msrb.mxu3 %v8155_v57  ;;  %v4010_v0 = vpop.permute.xlu1 %4009 }
 0x6aa   :  { %v4014_v20 = vsel %vm398_vm5, %v4010_v0, %v8352_v58 }
 0x6ab   :  { %v3618_v52 = vpop.f32.mrf.mxu3  ;;  %4036 = vmatmul.bf16.vlgmr.msrb.gmra.mxu1 %v4014_v20 }
 0x6ac   :  { %v3683_v51 = vpop.f32.mrf.mxu0  ;;  %v3619_v5 = vadd.f32 %v3618_v52, %v3606_v55  ;;  %4218 = vmatpush.bf16.msrb.mxu1 %v8130_v36 }
 0x6ad   :  { %4187 = vmatpush.bf16.msrb.mxu3 %v8169_v19  ;;  %v3646_v54 = vpop.f32.mrf.mxu1  ;;  %v3684_v46 = vadd.f32 %v3683_v51, %v2037_v38 }
 0x6ae   :  { %v3762_v43 = vmax.f32 %v3619_v5, 0.0  ;;  %v8394_v5 = vld [vmem:[%s9191_s8 + $0x38] sm:$0xff] }
 0x6b0   :  { %v8355_v59 = vpack.c.bf16 %v3763_v61, %v3762_v43  ;;  %4219 = vmatpush.bf16.msrb.mxu1 %v8145_v34 }
 0x6b1   :  { %4188 = vmatpush.bf16.msrb.mxu3 %v8277_v25  ;;  %v4085_v18 = vpop.permute.xlu2 %4084 }
 0x6b2   :  { %v3657_v47 = vpop.f32.mrf.mxu2  ;;  %v4645_v63 = vunpack.c.l.b16 %v8355_v59  ;;  %v4646_v4 = vunpack.c.h.b16 %v8355_v59 }
 0x6b3   :  { %v3620_v8 = vpop.f32.mrf.mxu3  ;;  %v3658_v41 = vadd.f32 %v3657_v47, %v2036_v44 }
 0x6b4   :  { %v3685_v7 = vpop.f32.mrf.mxu0  ;;  %v4647_v11 = vpack.c.b16 %v4645_v63, %v4645_v63  ;;  %v8364_v14 = vpack.c.b16 %v4646_v4, %v4646_v4  ;;  %4220 = vmatpush.bf16.msrb.mxu1 %v8161_v16 }
 0x6b5   :  { %4189 = vmatpush.bf16.msrb.mxu3 %v8285_v48  ;;  %v8413_v7 = vld [vmem:[%s9191_s8 + $0x30] sm:$0xff] }
 0x6b6   :  { %4649 = vrot.lane.b32.xlu0 %v4647_v11, %s7588_s0  ;;  %4651 = vrot.lane.b32.xlu1 %v8364_v14, %s7588_s0 }
 0x6b8   :  { %4221 = vmatpush.bf16.msrb.mxu1 %v8175_v29 }
 0x6b9   :  { %v4048_v21 = vpop.permute.xlu0 %4047  ;;  %v8372_v23 = vpop.permute.xlu1 %4049 }
 0x6ba   :  { %v3659_v15 = vpop.f32.mrf.mxu2  ;;  %v8377_v32 = vsel %vm398_vm5, %v4048_v21, %v8372_v23  ;;  %v4120_v39 = vpop.permute.xlu2 %4119 }
 0x6bb   :  { %4073 = vmatmul.bf16.vlgmr.msrb.gmra.mxu2 %v8377_v32 }
 0x6bc   :  { %4283 = vmatpush.bf16.msrb.mxu2 %v8085_v13  ;;  %4222 = vmatpush.bf16.msrb.mxu1 %v8319_v40 }
 0x6be   :  { %4723 = vrot.lane.b32.xlu1 %v4647_v11, %s7587_s3 }
 0x6c0   :  { %4284 = vmatpush.bf16.msrb.mxu2 %v8100_v30  ;;  %4223 = vmatpush.bf16.msrb.mxu1 %v8328_v62 }
 0x6c2   :  { %v4118_v31 = vpop.permute.xlu1 %4117 }
 0x6c3   :  { %v4122_v22 = vsel %vm164_vm3, %v4118_v31, %v4120_v39  ;;  %v4159_v39 = vpop.permute.xlu2 %4158 }
 0x6c4   :  { %4132 = vmatmul.bf16.vlgmr.msrb.gmra.mxu0 %v4122_v22  ;;  %4285 = vmatpush.bf16.msrb.mxu2 %v8124_v56  ;;  %v8468_v22 = vld [vmem:[%s9191_s8 + $0x10] sm:$0xff] }
 0x6c5   :  { %v3696_v6 = vpop.f32.mrf.mxu1  ;;  %4300 = vmatpush.bf16.msrb.mxu0 %v8182_v45 }
 0x6c6   :  { %v3697_v49 = vadd.f32 %v3696_v6, %v3684_v46  ;;  %v8438_v6 = vld [vmem:[%s9191_s8 + $0x20] sm:$0xff]  ;;  %v8449_v46 = vld [vmem:[%s9191_s8 + $0x18] sm:$0xff] }
 0x6c8   :  { %v3765_v60 = vmax.f32 %v3697_v49, 0.0  ;;  %4286 = vmatpush.bf16.msrb.mxu2 %v8139_v33 }
 0x6c9   :  { %4301 = vmatpush.bf16.msrb.mxu0 %v8198_v42  ;;  %v8399_v54 = vpop.permute.xlu0 %4086 }
 0x6ca   :  { %v8404_v47 = vsel %vm398_vm5, %v4085_v18, %v8399_v54  ;;  %v4141_v15 = vpop.permute.xlu1 %4140  ;;  %v8424_v18 = vld [vmem:[%s9191_s8 + $0x28] sm:$0xff] }
 0x6cb   :  { %v3670_v53 = vpop.f32.mrf.mxu3  ;;  %4110 = vmatmul.bf16.vlgmr.msra.gmra.mxu3 %v8404_v47 }
 0x6cc   :  { %v8387_v26 = vpop.f32.mrf.mxu0  ;;  %v3671_v55 = vadd.f32 %v3670_v53, %v3658_v41  ;;  %4269 = vmatpush.bf16.msra.mxu3 %v8394_v5  ;;  %4287 = vmatpush.bf16.msrb.mxu2 %v8155_v57  ;;  %v2038_v53 = vperm.slane %v8270_v37, 6 }
 0x6cd   :  { %v3698_v52 = vpop.f32.mrf.mxu1  ;;  %4302 = vmatpush.bf16.msrb.mxu0 %v8213_v3 }
 0x6ce   :  { %v3764_v51 = vmax.f32 %v3671_v55, 0.0 }
 0x6d0   :  { %v8396_v61 = vpack.c.bf16 %v3765_v60, %v3764_v51  ;;  %4270 = vmatpush.bf16.msra.mxu3 %v8413_v7  ;;  %4288 = vmatpush.bf16.msrb.mxu2 %v8169_v19 }
 0x6d1   :  { %4303 = vmatpush.bf16.msrb.mxu0 %v8224_v24  ;;  %v4139_v38 = vpop.permute.xlu0 %4138 }
 0x6d2   :  { %v3709_v43 = vpop.f32.mrf.mxu2  ;;  %v4671_v0 = vunpack.c.h.b16 %v8396_v61  ;;  %v4670_v20 = vunpack.c.l.b16 %v8396_v61  ;;  %v8429_v44 = vsel %vm164_vm3, %v4139_v38, %v4141_v15 }
 0x6d3   :  { %v3672_v4 = vpop.f32.mrf.mxu3  ;;  %4152 = vmatmul.bf16.vlgmr.msra.gmra.mxu1 %v8429_v44 }
 0x6d4   :  { %v3737_v63 = vpop.f32.mrf.mxu0  ;;  %v4673_v8 = vpack.c.b16 %v4671_v0, %v4671_v0  ;;  %v4672_v11 = vpack.c.b16 %v4670_v20, %v4670_v20  ;;  %6811 = vmatmul.msk.bf16.vlgmr.msra.gmra.mxu0 %vm398_vm5, %v8372_v23  ;;  %4271 = vmatpush.bf16.msra.mxu3 %v8424_v18 }
 0x6d5   :  { %4304 = vmatpush.bf16.msrb.mxu0 %v8236_v50  ;;  %4317 = vmatpush.bf16.msra.mxu1 %v8091_v28 }
 0x6d6   :  { %4676 = vrot.lane.b32.xlu0 %v4673_v8, %s7588_s0  ;;  %4674 = vrot.lane.b32.xlu2 %v4672_v11, %s7588_s0 }
 0x6d7   :  { %4745 = vrot.lane.b32.xlu1 %v4673_v8, %s7587_s3 }
 0x6d8   :  { %4272 = vmatpush.bf16.msra.mxu3 %v8438_v6 }
 0x6d9   :  { %4305 = vmatpush.bf16.msrb.mxu0 %v8245_v10  ;;  %4318 = vmatpush.bf16.msra.mxu1 %v8111_v35 }
 0x6da   :  { %v3711_v21 = vpop.f32.mrf.mxu2  ;;  %v4161_v31 = vpop.permute.xlu0 %4160 }
 0x6db   :  { %v8457_v49 = vsel %vm164_vm3, %v4159_v39, %v4161_v31  ;;  %6810 = vmatmul.msk.bf16.vlgmr.msrb.gmra.mxu3 %vm398_vm5, %v8352_v58  ;;  %v3710_v58 = vadd.f32 %v3709_v43, %v2038_v53  ;;  %v8524_v31 = vld [vmem:[%s9191_s8 + $0x8] sm:$0xff]  ;;  %v8529_v53 = vpop.permute.xlu2 %4377 }
 0x6dc   :  { %4172 = vmatmul.bf16.vlgmr.msra.gmra.mxu2 %v8457_v49  ;;  %4273 = vmatpush.bf16.msra.mxu3 %v8449_v46 }
 0x6dd   :  { %4381 = vmatpush.bf16.msra.mxu0 %v8182_v45  ;;  %4356 = vmatpush.bf16.msra.mxu2 %v8085_v13 }
 0x6de   :  { %4743 = vrot.lane.b32.xlu0 %v4672_v11, %s7587_s3  ;;  %4725 = vrot.lane.b32.xlu2 %v8364_v14, %s7587_s3  ;;  %v2039_v14 = vperm.slane %v8270_v37, 7 }
 0x6df   :  { %4319 = vmatpush.bf16.msra.mxu1 %v8130_v36 }
 0x6e0   :  { %v3736_v60 = vadd.f32 %v8387_v26, %v2039_v14  ;;  %4274 = vmatpush.bf16.msra.mxu3 %v8468_v22 }
 0x6e1   :  { %4382 = vmatpush.bf16.msra.mxu0 %v8198_v42  ;;  %4357 = vmatpush.bf16.msra.mxu2 %v8100_v30 }
 0x6e3   :  { %4320 = vmatpush.bf16.msra.mxu1 %v8145_v34 }
 0x6e4   :  { %v8453_v41 = vpop.f32.mrf.mxu0  ;;  %4342 = vmatpush.bf16.msrb.mxu3 %v8394_v5  ;;  %6812 = vmatmul.msk.bf16.vlgmr.msrb.gmra.mxu1 %vm398_vm5, %v8399_v54 }
 0x6e5   :  { %4383 = vmatpush.bf16.msra.mxu0 %v8213_v3  ;;  %4358 = vmatpush.bf16.msra.mxu2 %v8124_v56 }
 0x6e6   :  { %6839 = vmatmul.msk.bf16.vlgmr.msrb.gmra.mxu0 %vm398_vm5, %v8248_v1 }
 0x6e7   :  { %v3748_v55 = vpop.f32.mrf.mxu1  ;;  %4321 = vmatpush.bf16.msra.mxu1 %v8161_v16 }
 0x6e8   :  { %v3889_v51 = vpop.f32.mrf.mxu2  ;;  %v3749_v52 = vadd.f32 %v3748_v55, %v3736_v60  ;;  %4343 = vmatpush.bf16.msrb.mxu3 %v8413_v7 }
 0x6e9   :  { %4384 = vmatpush.bf16.msra.mxu0 %v8224_v24  ;;  %4359 = vmatpush.bf16.msra.mxu2 %v8139_v33 }
 0x6ea   :  { %v3767_v26 = vmax.f32 %v3749_v52, 0.0 }
 0x6eb   :  { %v3722_v37 = vpop.f32.mrf.mxu3  ;;  %4322 = vmatpush.bf16.msra.mxu1 %v8175_v29  ;;  %6837 = vmatmul.msk.bf16.vlgmr.msra.gmra.mxu3 %vm398_vm5, %v8079_v9  ;;  %v8512_v9 = vld [vmem:[%s9192_s9] ss:$0 sm:$0xff] }
 0x6ec   :  { %v4000_v0 = vpop.f32.mrf.mxu0  ;;  %v3723_v20 = vadd.f32 %v3722_v37, %v3710_v58  ;;  %4344 = vmatpush.bf16.msrb.mxu3 %v8424_v18  ;;  %6838 = vmatmul.msk.bf16.vlgmr.msrb.gmra.mxu2 %vm398_vm5, %v8150_v2  ;;  %v4376_v2 = vpop.permute.xlu1 %4375  ;;  %v3896_v14 = vadd.f32 %v8512_v9, %v3889_v51  ;;  %v8543_v51 = vld [vmem:[%s9191_s8] sm:$0xff] }
 0x6ed   :  { %4385 = vmatpush.bf16.msra.mxu0 %v8236_v50  ;;  %4360 = vmatpush.bf16.msra.mxu2 %v8155_v57  ;;  %v8535_v60 = vsel %vm398_vm5, %v4376_v2, %v8529_v53  ;;  %v4450_v37 = vpop.permute.xlu2 %4449  ;;  %v8712_v2 = vld [vmem:[%s9191_s8 + $0xe8] sm:$0xff] }
 0x6ee   :  { %v3766_v43 = vmax.f32 %v3723_v20, 0.0 }
 0x6ef   :  { %v3750_v63 = vpop.f32.mrf.mxu1  ;;  %4406 = vmatpush.bf16.msrb.mxu1 %v8091_v28 }
 0x6f0   :  { %v8487_v4 = vpack.c.bf16 %v3767_v26, %v3766_v43  ;;  %v3891_v8 = vpop.f32.mrf.mxu2  ;;  %4345 = vmatpush.bf16.msrb.mxu3 %v8438_v6 }
 0x6f1   :  { %4386 = vmatpush.bf16.msra.mxu0 %v8245_v10  ;;  %4361 = vmatpush.bf16.msra.mxu2 %v8169_v19  ;;  %v8662_v8 = vld [vmem:[%s9191_s8 + $0x78] sm:$0xff] }
 0x6f2   :  { %v4903_v11 = vunpack.c.h.b16 %v8487_v4  ;;  %v4902_v15 = vunpack.c.l.b16 %v8487_v4 }
 0x6f3   :  { %v3724_v21 = vpop.f32.mrf.mxu3  ;;  %4407 = vmatpush.bf16.msrb.mxu1 %v8111_v35 }
 0x6f4   :  { %v4905_v38 = vpack.c.b16 %v4903_v11, %v4903_v11  ;;  %v4904_v39 = vpack.c.b16 %v4902_v15, %v4902_v15  ;;  %4346 = vmatpush.bf16.msrb.mxu3 %v8449_v46  ;;  %6840 = vmatmul.msk.bf16.vlgmr.msra.gmra.mxu1 %vm398_vm5, %v8305_v12 }
 0x6f5   :  { %4387 = vmatpush.bf16.msra.mxu0 %v8295_v17  ;;  %4362 = vmatpush.bf16.msra.mxu2 %v8277_v25  ;;  %v4472_v26 = vpop.permute.xlu2 %4471 }
 0x6f6   :  { %4908 = vrot.lane.b32.xlu0 %v4905_v38, %s7588_s0  ;;  %4906 = vrot.lane.b32.xlu2 %v4904_v39, %s7588_s0 }
 0x6f7   :  { %4955 = vrot.lane.b32.xlu1 %v4904_v39, %s7587_s3  ;;  %4408 = vmatpush.bf16.msrb.mxu1 %v8130_v36  ;;  %v8703_v39 = vld [vmem:[%s9191_s8 + $0xf0] sm:$0xff] }
 0x6f8   :  { %4347 = vmatpush.bf16.msrb.mxu3 %v8468_v22 }
 0x6f9   :  { %4388 = vmatpush.bf16.msra.mxu0 %v8303_v27  ;;  %4363 = vmatpush.bf16.msra.mxu2 %v8285_v48 }
 0x6fb   :  { %4409 = vmatpush.bf16.msrb.mxu1 %v8145_v34 }
 0x6fc   :  { %4389 = vmatmul.bf16.vlgmr.msra.gmra.mxu0 %v8535_v60  ;;  %4348 = vmatpush.bf16.msrb.mxu3 %v8524_v31 }
 0x6fd   :  { %4455 = vmatpush.bf16.msrb.mxu0 %v8182_v45  ;;  %4435 = vmatpush.bf16.msrb.mxu2 %v8085_v13 }
 0x6fe   :  { %4957 = vrot.lane.b32.xlu2 %v4905_v38, %s7587_s3  ;;  %4364 = vmatmul.bf16.vlgmr.msra.gmra.mxu2 %v8404_v47 }
 0x6ff   :  { %4410 = vmatpush.bf16.msrb.mxu1 %v8161_v16 }
 0x700   :  { %4349 = vmatpush.bf16.msrb.mxu3 %v8543_v51 }
 0x701   :  { %4456 = vmatpush.bf16.msrb.mxu0 %v8198_v42  ;;  %4436 = vmatpush.bf16.msrb.mxu2 %v8100_v30 }
 0x703   :  { %v3945_v55 = vpop.f32.mrf.mxu3  ;;  %4411 = vmatpush.bf16.msrb.mxu1 %v8175_v29  ;;  %4350 = vmatmul.bf16.vlgmr.msrb.gmra.mxu3 %v8377_v32 }
 0x704   :  { %v3949_v58 = vadd.f32 %v3945_v55, %v3896_v14  ;;  %4421 = vmatpush.bf16.msra.mxu3 %v8394_v5 }
 0x705   :  { %4457 = vmatpush.bf16.msrb.mxu0 %v8213_v3  ;;  %4437 = vmatpush.bf16.msrb.mxu2 %v8124_v56 }
 0x706   :  { %v8546_v52 = vadd.f32 %v8453_v41, %v3949_v58 }
 0x707   :  { %4412 = vmatpush.bf16.msrb.mxu1 %v8319_v40 }
 0x708   :  { %4422 = vmatpush.bf16.msra.mxu3 %v8413_v7  ;;  %v4401_v47 = vpop.permute.xlu0 %4400 }
 0x709   :  { %4458 = vmatpush.bf16.msrb.mxu0 %v8224_v24  ;;  %4438 = vmatpush.bf16.msrb.mxu2 %v8139_v33  ;;  %v8562_v41 = vpop.permute.xlu1 %4402 }
 0x70a   :  { %v8570_v32 = vsel %vm398_vm5, %v4401_v47, %v8562_v41 }
 0x70b   :  { %v3947_v0 = vpop.f32.mrf.mxu3  ;;  %4413 = vmatpush.bf16.msrb.mxu1 %v8328_v62 }
 0x70c   :  { %4423 = vmatpush.bf16.msra.mxu3 %v8424_v18 }
 0x70d   :  { %4459 = vmatpush.bf16.msrb.mxu0 %v8236_v50  ;;  %4439 = vmatpush.bf16.msrb.mxu2 %v8155_v57 }
 0x70e   :  { %4414 = vmatmul.bf16.vlgmr.msrb.gmra.mxu1 %v8570_v32 }
 0x70f   :  { %4475 = vmatpush.bf16.msra.mxu1 %v8091_v28 }
 0x710   :  { %4424 = vmatpush.bf16.msra.mxu3 %v8438_v6  ;;  %v4452_v28 = vpop.permute.xlu0 %4451 }
 0x711   :  { %4460 = vmatpush.bf16.msrb.mxu0 %v8245_v10  ;;  %4440 = vmatpush.bf16.msrb.mxu2 %v8169_v19  ;;  %v8588_v20 = vsel %vm164_vm3, %v4450_v37, %v4452_v28  ;;  %v8738_v37 = vld [vmem:[%s9191_s8 + $0xd8] sm:$0xff] }
 0x713   :  { %4476 = vmatpush.bf16.msra.mxu1 %v8111_v35 }
 0x714   :  { %4425 = vmatpush.bf16.msra.mxu3 %v8449_v46 }
 0x715   :  { %4461 = vmatpush.bf16.msrb.mxu0 %v8295_v17  ;;  %4441 = vmatpush.bf16.msrb.mxu2 %v8277_v25 }
 0x717   :  { %4477 = vmatpush.bf16.msra.mxu1 %v8130_v36 }
 0x718   :  { %4426 = vmatpush.bf16.msra.mxu3 %v8468_v22 }
 0x719   :  { %4462 = vmatpush.bf16.msrb.mxu0 %v8303_v27  ;;  %4442 = vmatpush.bf16.msrb.mxu2 %v8285_v48 }
 0x71b   :  { %4478 = vmatpush.bf16.msra.mxu1 %v8145_v34 }
 0x71c   :  { %4463 = vmatmul.bf16.vlgmr.msrb.gmra.mxu0 %v8588_v20  ;;  %4427 = vmatpush.bf16.msra.mxu3 %v8524_v31 }
 0x71d   :  { %4523 = vmatpush.bf16.msra.mxu0 %v8213_v3  ;;  %4506 = vmatpush.bf16.msra.mxu2 %v8124_v56 }
 0x71e   :  { %4443 = vmatmul.bf16.vlgmr.msrb.gmra.mxu2 %v8457_v49  ;;  %v4470_v49 = vpop.permute.xlu1 %4469 }
 0x71f   :  { %4479 = vmatpush.bf16.msra.mxu1 %v8161_v16 }
 0x720   :  { %4428 = vmatpush.bf16.msra.mxu3 %v8543_v51 }
 0x721   :  { %4524 = vmatpush.bf16.msra.mxu0 %v8224_v24  ;;  %4507 = vmatpush.bf16.msra.mxu2 %v8139_v33 }
 0x723   :  { %4480 = vmatpush.bf16.msra.mxu1 %v8175_v29  ;;  %4429 = vmatmul.bf16.vlgmr.msra.gmra.mxu3 %v8429_v44  ;;  %v8612_v44 = vsel %vm164_vm3, %v4470_v49, %v4472_v26 }
 0x724   :  { %4492 = vmatpush.bf16.msrb.mxu3 %v8424_v18 }
 0x725   :  { %4525 = vmatpush.bf16.msra.mxu0 %v8236_v50  ;;  %4508 = vmatpush.bf16.msra.mxu2 %v8155_v57 }
 0x727   :  { %4481 = vmatpush.bf16.msra.mxu1 %v8319_v40 }
 0x728   :  { %4493 = vmatpush.bf16.msrb.mxu3 %v8438_v6  ;;  %v4037_v43 = vpop.f32.mrf.mxu1  ;;  %v4650_v58 = vpop.permute.xlu0 %4649 }
 0x729   :  { %4526 = vmatpush.bf16.msra.mxu0 %v8245_v10  ;;  %4509 = vmatpush.bf16.msra.mxu2 %v8169_v19 }
 0x72b   :  { %4482 = vmatpush.bf16.msra.mxu1 %v8328_v62 }
 0x72c   :  { %4494 = vmatpush.bf16.msrb.mxu3 %v8449_v46 }
 0x72d   :  { %4527 = vmatpush.bf16.msra.mxu0 %v8295_v17  ;;  %4510 = vmatpush.bf16.msra.mxu2 %v8277_v25 }
 0x72e   :  { %4483 = vmatmul.bf16.vlgmr.msra.gmra.mxu1 %v8612_v44 }
 0x72f   :  { %4540 = vmatpush.bf16.msrb.mxu1 %v8130_v36 }
 0x730   :  { %4495 = vmatpush.bf16.msrb.mxu3 %v8468_v22 }
 0x731   :  { %4528 = vmatpush.bf16.msra.mxu0 %v8303_v27  ;;  %4511 = vmatpush.bf16.msra.mxu2 %v8285_v48 }
 0x733   :  { %4541 = vmatpush.bf16.msrb.mxu1 %v8145_v34 }
 0x734   :  { %6851 = vmatmul.msk.bf16.vlgmr.msra.gmra.mxu0 %vm398_vm5, %v8529_v53  ;;  %4496 = vmatpush.bf16.msrb.mxu3 %v8524_v31 }
 0x735   :  { %4586 = vmatpush.bf16.msrb.mxu0 %v8182_v45  ;;  %4569 = vmatpush.bf16.msrb.mxu2 %v8085_v13  ;;  %v4039_v13 = vpop.f32.mrf.mxu1 }
 0x736   :  { %6850 = vmatmul.msk.bf16.vlgmr.msra.gmra.mxu2 %vm398_vm5, %v8399_v54 }
 0x737   :  { %4542 = vmatpush.bf16.msrb.mxu1 %v8161_v16 }
 0x738   :  { %4497 = vmatpush.bf16.msrb.mxu3 %v8543_v51 }
 0x739   :  { %4587 = vmatpush.bf16.msrb.mxu0 %v8198_v42  ;;  %4570 = vmatpush.bf16.msrb.mxu2 %v8100_v30  ;;  %v8647_v30 = vld [vmem:[%s9191_s8 + $0xf8] sm:$0xff] }
 0x73b   :  { %4543 = vmatpush.bf16.msrb.mxu1 %v8175_v29  ;;  %6849 = vmatmul.msk.bf16.vlgmr.msrb.gmra.mxu3 %vm398_vm5, %v8372_v23  ;;  %v4041_v23 = vadd.f32 %v8512_v9, %v4037_v43 }
 0x73c   :  { %4555 = vmatpush.bf16.msra.mxu3 %v8394_v5 }
 0x73d   :  { %4588 = vmatpush.bf16.msrb.mxu0 %v8213_v3  ;;  %4571 = vmatpush.bf16.msrb.mxu2 %v8124_v56 }
 0x73e   :  { %v4074_v54 = vpop.f32.mrf.mxu2 }
 0x73f   :  { %4544 = vmatpush.bf16.msrb.mxu1 %v8319_v40  ;;  %v4078_v63 = vadd.f32 %v4074_v54, %v4041_v23 }
 0x740   :  { %4556 = vmatpush.bf16.msra.mxu3 %v8413_v7 }
 0x741   :  { %4589 = vmatpush.bf16.msrb.mxu0 %v8224_v24  ;;  %4572 = vmatpush.bf16.msrb.mxu2 %v8139_v33  ;;  %v4133_v11 = vpop.f32.mrf.mxu0 }
 0x742   :  { %v4137_v15 = vadd.f32 %v8512_v9, %v4133_v11 }
 0x743   :  { %4545 = vmatpush.bf16.msrb.mxu1 %v8328_v62 }
 0x744   :  { %4557 = vmatpush.bf16.msra.mxu3 %v8424_v18 }
 0x745   :  { %4590 = vmatpush.bf16.msrb.mxu0 %v8236_v50  ;;  %4573 = vmatpush.bf16.msrb.mxu2 %v8155_v57 }
 0x746   :  { %6852 = vmatmul.msk.bf16.vlgmr.msrb.gmra.mxu1 %vm398_vm5, %v8562_v41 }
 0x747   :  { %4603 = vmatpush.bf16.msra.mxu1 %v8647_v30 }
 0x748   :  { %4558 = vmatpush.bf16.msra.mxu3 %v8438_v6 }
 0x749   :  { %4591 = vmatpush.bf16.msrb.mxu0 %v8245_v10  ;;  %4574 = vmatpush.bf16.msrb.mxu2 %v8169_v19 }
 0x74b   :  { %4604 = vmatpush.bf16.msra.mxu1 %v8111_v35  ;;  %v8675_v35 = vld [vmem:[%s9191_s8 + $0x70] sm:$0xff] }
 0x74c   :  { %6855 = vmatmul.msk.bf16.vlgmr.msrb.gmra.mxu0 %vm398_vm5, %v8355_v59  ;;  %4559 = vmatpush.bf16.msra.mxu3 %v8449_v46 }
 0x74d   :  { %4655 = vmatpush.bf16.msra.mxu0 %v8182_v45  ;;  %4630 = vmatpush.bf16.msra.mxu2 %v8662_v8 }
 0x74e   :  { %6854 = vmatmul.msk.bf16.vlgmr.msrb.gmra.mxu2 %vm398_vm5, %v8305_v12  ;;  %v4135_v12 = vpop.f32.mrf.mxu0 }
 0x74f   :  { %4605 = vmatpush.bf16.msra.mxu1 %v8130_v36  ;;  %v4076_v36 = vpop.f32.mrf.mxu2 }
 0x750   :  { %4560 = vmatpush.bf16.msra.mxu3 %v8468_v22  ;;  %v8749_v36 = vld [vmem:[%s9191_s8 + $0xd0] sm:$0xff] }
 0x751   :  { %4656 = vmatpush.bf16.msra.mxu0 %v8198_v42  ;;  %4631 = vmatpush.bf16.msra.mxu2 %v8675_v35 }
 0x753   :  { %4606 = vmatpush.bf16.msra.mxu1 %v8145_v34  ;;  %6853 = vmatmul.msk.bf16.vlgmr.msra.gmra.mxu3 %vm398_vm5, %v8248_v1  ;;  %v4111_v34 = vpop.f32.mrf.mxu3  ;;  %v4003_v1 = vmax.f32 %v8546_v52, 0.0  ;;  %v8716_v52 = vpop.permute.xlu1 %4651 }
 0x754   :  { %4616 = vmatpush.bf16.msrb.mxu3 %v8394_v5  ;;  %v8730_v0 = vsel %vm398_vm5, %v4650_v58, %v8716_v52 }
 0x755   :  { %4657 = vmatpush.bf16.msra.mxu0 %v8213_v3  ;;  %4632 = vmatpush.bf16.msra.mxu2 %v8124_v56  ;;  %v4115_v56 = vadd.f32 %v4111_v34, %v4078_v63 }
 0x757   :  { %4607 = vmatpush.bf16.msra.mxu1 %v8161_v16  ;;  %v4153_v16 = vpop.f32.mrf.mxu1  ;;  %v4116_v21 = vmax.f32 %v4115_v56, 0.0 }
 0x758   :  { %4617 = vmatpush.bf16.msrb.mxu3 %v8413_v7 }
 0x759   :  { %4658 = vmatpush.bf16.msra.mxu0 %v8224_v24  ;;  %4633 = vmatpush.bf16.msra.mxu2 %v8139_v33  ;;  %v4157_v33 = vadd.f32 %v4153_v16, %v4137_v15  ;;  %v5022_v38 = vmax.f32 %v4003_v1, %v4116_v21  ;;  %v8772_v16 = vpop.permute.xlu0 %4676  ;;  %v4675_v1 = vpop.permute.xlu2 %4674 }
 0x75b   :  { %4608 = vmatpush.bf16.msra.mxu1 %v8175_v29  ;;  %v4208_v29 = vpop.f32.mrf.mxu0 }
 0x75c   :  { %4618 = vmatpush.bf16.msrb.mxu3 %v8424_v18 }
 0x75d   :  { %4659 = vmatpush.bf16.msra.mxu0 %v8236_v50  ;;  %4634 = vmatpush.bf16.msra.mxu2 %v8155_v57  ;;  %v4113_v57 = vpop.f32.mrf.mxu3 }
 0x75e   :  { %6856 = vmatmul.msk.bf16.vlgmr.msra.gmra.mxu1 %vm398_vm5, %v8396_v61  ;;  %v8796_v57 = vld [vmem:[%s9191_s8 + $0x50] sm:$0xff] }
 0x75f   :  { %4680 = vmatpush.bf16.msrb.mxu1 %v8647_v30  ;;  %v4155_v14 = vpop.f32.mrf.mxu1  ;;  %v4173_v47 = vpop.f32.mrf.mxu2 }
 0x760   :  { %4619 = vmatpush.bf16.msrb.mxu3 %v8438_v6 }
 0x761   :  { %4660 = vmatpush.bf16.msra.mxu0 %v8245_v10  ;;  %4635 = vmatpush.bf16.msra.mxu2 %v8169_v19  ;;  %v8723_v19 = vld [vmem:[%s9191_s8 + $0xe0] sm:$0xff]  ;;  %v4726_v58 = vpop.permute.xlu2 %4725 }
 0x763   :  { %4681 = vmatpush.bf16.msrb.mxu1 %v8703_v39  ;;  %v4210_v55 = vpop.f32.mrf.mxu0 }
 0x764   :  { %4620 = vmatpush.bf16.msrb.mxu3 %v8449_v46 }
 0x765   :  { %4661 = vmatpush.bf16.msra.mxu0 %v8295_v17  ;;  %4636 = vmatpush.bf16.msra.mxu2 %v8277_v25  ;;  %v4191_v28 = vpop.f32.mrf.mxu3 }
 0x766   :  { %v4195_v49 = vadd.f32 %v8512_v9, %v4191_v28 }
 0x767   :  { %4682 = vmatpush.bf16.msrb.mxu1 %v8712_v2  ;;  %v4225_v26 = vpop.f32.mrf.mxu1  ;;  %v4175_v12 = vpop.f32.mrf.mxu2 }
 0x768   :  { %4621 = vmatpush.bf16.msrb.mxu3 %v8468_v22  ;;  %v4212_v13 = vadd.f32 %v4208_v29, %v4195_v49 }
 0x769   :  { %4662 = vmatpush.bf16.msra.mxu0 %v8303_v27  ;;  %4637 = vmatpush.bf16.msra.mxu2 %v8285_v48 }
 0x76a   :  { %v4229_v11 = vadd.f32 %v4225_v26, %v4212_v13  ;;  %v8831_v13 = vld [vmem:[%s9191_s8 + $0xa0] sm:$0xff] }
 0x76b   :  { %4683 = vmatpush.bf16.msrb.mxu1 %v8723_v19  ;;  %v4307_v23 = vpop.f32.mrf.mxu0 }
 0x76c   :  { %4663 = vmatmul.bf16.vlgmr.msra.gmra.mxu0 %v8730_v0  ;;  %4622 = vmatpush.bf16.msrb.mxu3 %v8524_v31 }
 0x76d   :  { %4729 = vmatpush.bf16.msrb.mxu0 %v8182_v45  ;;  %4709 = vmatpush.bf16.msrb.mxu2 %v8662_v8  ;;  %v4177_v45 = vadd.f32 %v4173_v47, %v4157_v33  ;;  %v4193_v34 = vpop.f32.mrf.mxu3 }
 0x76e   :  { %4638 = vmatmul.bf16.vlgmr.msra.gmra.mxu2 %v8570_v32  ;;  %v8758_v32 = vld [vmem:[%s9191_s8 + $0x68] sm:$0xff] }
 0x76f   :  { %4684 = vmatpush.bf16.msrb.mxu1 %v8738_v37  ;;  %v4178_v43 = vmax.f32 %v4177_v45, 0.0  ;;  %v4290_v29 = vpop.f32.mrf.mxu2  ;;  %v4724_v45 = vpop.permute.xlu1 %4723 }
 0x770   :  { %4623 = vmatpush.bf16.msrb.mxu3 %v8543_v51 }
 0x771   :  { %4730 = vmatpush.bf16.msrb.mxu0 %v8198_v42  ;;  %4710 = vmatpush.bf16.msrb.mxu2 %v8675_v35  ;;  %v5023_v54 = vmax.f32 %v5022_v38, %v4178_v43  ;;  %v5030_v63 = vmax.f32 %v4116_v21, %v4178_v43  ;;  %v4230_v42 = vmax.f32 %v4229_v11, 0.0  ;;  %v8785_v21 = vld [vmem:[%s9191_s8 + $0x58] sm:$0xff]  ;;  %v8821_v43 = vsel %vm164_vm3, %v4724_v45, %v4726_v58  ;;  %v8852_v11 = vld [vmem:[%s9191_s8 + $0x90] sm:$0xff] }
 0x773   :  { %4685 = vmatpush.bf16.msrb.mxu1 %v8749_v36  ;;  %4624 = vmatmul.bf16.vlgmr.msrb.gmra.mxu3 %v8535_v60  ;;  %v8761_v15 = vmax.f32 %v5030_v63, %v4230_v42  ;;  %v4309_v56 = vpop.f32.mrf.mxu0  ;;  %v8769_v60 = vld [vmem:[%s9191_s8 + $0x60] sm:$0xff] }
 0x774   :  { %4695 = vmatpush.bf16.msra.mxu3 %v8394_v5 }
 0x775   :  { %4731 = vmatpush.bf16.msrb.mxu0 %v8213_v3  ;;  %4711 = vmatpush.bf16.msrb.mxu2 %v8758_v32  ;;  %v4227_v3 = vpop.f32.mrf.mxu1  ;;  %v4276_v33 = vpop.f32.mrf.mxu3 }
 0x777   :  { %4686 = vmatpush.bf16.msrb.mxu1 %v8319_v40  ;;  %v4746_v3 = vpop.permute.xlu1 %4745 }
 0x778   :  { %4696 = vmatpush.bf16.msra.mxu3 %v8413_v7 }
 0x779   :  { %4732 = vmatpush.bf16.msrb.mxu0 %v8224_v24  ;;  %4712 = vmatpush.bf16.msrb.mxu2 %v8769_v60  ;;  %v8780_v24 = vsel %vm398_vm5, %v4675_v1, %v8772_v16 }
 0x77b   :  { %4687 = vmatpush.bf16.msrb.mxu1 %v8328_v62  ;;  %v4390_v28 = vpop.f32.mrf.mxu0 }
 0x77c   :  { %4697 = vmatpush.bf16.msra.mxu3 %v8424_v18 }
 0x77d   :  { %4733 = vmatpush.bf16.msrb.mxu0 %v8236_v50  ;;  %4713 = vmatpush.bf16.msrb.mxu2 %v8785_v21  ;;  %v4280_v50 = vadd.f32 %v8512_v9, %v4276_v33  ;;  %v4324_v38 = vpop.f32.mrf.mxu1  ;;  %v8866_v33 = vld [vmem:[%s9191_s8 + $0x48] sm:$0xff] }
 0x77e   :  { %4688 = vmatmul.bf16.vlgmr.msrb.gmra.mxu1 %v8780_v24 }
 0x77f   :  { %4749 = vmatpush.bf16.msra.mxu1 %v8647_v30  ;;  %v4294_v30 = vadd.f32 %v4290_v29, %v4280_v50 }
 0x780   :  { %4698 = vmatpush.bf16.msra.mxu3 %v8438_v6 }
 0x781   :  { %4734 = vmatpush.bf16.msrb.mxu0 %v8245_v10  ;;  %4714 = vmatpush.bf16.msrb.mxu2 %v8796_v57  ;;  %v4311_v14 = vadd.f32 %v4307_v23, %v4294_v30  ;;  %v4278_v10 = vpop.f32.mrf.mxu3 }
 0x783   :  { %4750 = vmatpush.bf16.msra.mxu1 %v8703_v39  ;;  %v8802_v55 = vadd.f32 %v4324_v38, %v4311_v14  ;;  %v4292_v39 = vpop.f32.mrf.mxu2  ;;  %v4392_v23 = vpop.f32.mrf.mxu0 }
 0x784   :  { %4699 = vmatpush.bf16.msra.mxu3 %v8449_v46 }
 0x785   :  { %4735 = vmatpush.bf16.msrb.mxu0 %v8295_v17  ;;  %4715 = vmatpush.bf16.msrb.mxu2 %v8277_v25  ;;  %v4329_v47 = vmax.f32 %v8802_v55, 0.0  ;;  %v8816_v25 = vld [vmem:[%s9191_s8 + $0xa8] sm:$0xff]  ;;  %v4326_v26 = vpop.f32.mrf.mxu1 }
 0x787   :  { %4751 = vmatpush.bf16.msra.mxu1 %v8712_v2  ;;  %v8811_v49 = vmax.f32 %v5023_v54, %v4329_v47 }
 0x788   :  { %4700 = vmatpush.bf16.msra.mxu3 %v8468_v22 }
 0x789   :  { %4736 = vmatpush.bf16.msrb.mxu0 %v8303_v27  ;;  %4716 = vmatpush.bf16.msrb.mxu2 %v8285_v48  ;;  %v4351_v54 = vpop.f32.mrf.mxu3 }
 0x78a   :  { %v4355_v63 = vadd.f32 %v8512_v9, %v4351_v54 }
 0x78b   :  { %4752 = vmatpush.bf16.msra.mxu1 %v8723_v19  ;;  %v4365_v48 = vpop.f32.mrf.mxu2 }
 0x78c   :  { %4737 = vmatmul.bf16.vlgmr.msrb.gmra.mxu0 %v8821_v43  ;;  %4701 = vmatpush.bf16.msra.mxu3 %v8524_v31  ;;  %v4369_v12 = vadd.f32 %v4365_v48, %v4355_v63 }
 0x78d   :  { %4797 = vmatpush.bf16.msra.mxu0 %v8816_v25  ;;  %4780 = vmatpush.bf16.msra.mxu2 %v8758_v32  ;;  %v4415_v34 = vpop.f32.mrf.mxu1 }
 0x78e   :  { %4717 = vmatmul.bf16.vlgmr.msrb.gmra.mxu2 %v8612_v44  ;;  %v8841_v44 = vld [vmem:[%s9191_s8 + $0x98] sm:$0xff]  ;;  %v4394_v56 = vadd.f32 %v4390_v28, %v4369_v12  ;;  %v8980_v12 = vld [vmem:[%s9191_s8 + $0x88] sm:$0xff] }
 0x78f   :  { %4753 = vmatpush.bf16.msra.mxu1 %v8738_v37 }
 0x790   :  { %4702 = vmatpush.bf16.msra.mxu3 %v8543_v51  ;;  %v4419_v29 = vadd.f32 %v4415_v34, %v4394_v56 }
 0x791   :  { %4798 = vmatpush.bf16.msra.mxu0 %v8831_v13  ;;  %4781 = vmatpush.bf16.msra.mxu2 %v8769_v60  ;;  %v4353_v50 = vpop.f32.mrf.mxu3 }
 0x792   :  { %v8871_v30 = vmax.f32 %v4419_v29, 0.0 }
 0x793   :  { %4754 = vmatpush.bf16.msra.mxu1 %v8749_v36  ;;  %4703 = vmatmul.bf16.vlgmr.msra.gmra.mxu3 %v8588_v20  ;;  %v4367_v42 = vpop.f32.mrf.mxu2  ;;  %v4744_v20 = vpop.permute.xlu0 %4743 }
 0x794   :  { %4766 = vmatpush.bf16.msrb.mxu3 %v8424_v18  ;;  %v8861_v1 = vsel %vm164_vm3, %v4744_v20, %v4746_v3  ;;  %v8895_v14 = vmax.f32 %v4329_v47, %v8871_v30 }
 0x795   :  { %4799 = vmatpush.bf16.msra.mxu0 %v8841_v44  ;;  %4782 = vmatpush.bf16.msra.mxu2 %v8785_v21  ;;  %v4417_v38 = vpop.f32.mrf.mxu1 }
 0x797   :  { %4755 = vmatpush.bf16.msra.mxu1 %v8319_v40 }
 0x798   :  { %4767 = vmatpush.bf16.msrb.mxu3 %v8438_v6 }
 0x799   :  { %4800 = vmatpush.bf16.msra.mxu0 %v8852_v11  ;;  %4783 = vmatpush.bf16.msra.mxu2 %v8796_v57  ;;  %v4464_v55 = vpop.f32.mrf.mxu0 }
 0x79b   :  { %4756 = vmatpush.bf16.msra.mxu1 %v8328_v62  ;;  %v8985_v29 = vpop.permute.xlu0 %4908 }
 0x79c   :  { %4768 = vmatpush.bf16.msrb.mxu3 %v8449_v46 }
 0x79d   :  { %4801 = vmatpush.bf16.msra.mxu0 %v8295_v17  ;;  %4784 = vmatpush.bf16.msra.mxu2 %v8866_v33  ;;  %v8878_v17 = vld [vmem:[%s9191_s8 + $0xb8] sm:$0xff] }
 0x79e   :  { %4757 = vmatmul.bf16.vlgmr.msra.gmra.mxu1 %v8861_v1 }
 0x79f   :  { %4814 = vmatpush.bf16.msrb.mxu1 %v8712_v2  ;;  %v8884_v2 = vld [vmem:[%s9191_s8 + $0x40] sm:$0xff] }
 0x7a0   :  { %4769 = vmatpush.bf16.msrb.mxu3 %v8468_v22 }
 0x7a1   :  { %4802 = vmatpush.bf16.msra.mxu0 %v8303_v27  ;;  %4785 = vmatpush.bf16.msra.mxu2 %v8884_v2  ;;  %v5032_v27 = vmax.f32 %v8761_v15, %v8871_v30  ;;  %v8906_v15 = vld [vmem:[%s9191_s8 + $0xb0] sm:$0xff] }
 0x7a3   :  { %4815 = vmatpush.bf16.msrb.mxu1 %v8723_v19  ;;  %v5025_v19 = vmax.f32 %v8811_v49, %v8871_v30 }
 0x7a4   :  { %6859 = vmatmul.msk.bf16.vlgmr.msra.gmra.mxu0 %vm398_vm5, %v8716_v52  ;;  %4770 = vmatpush.bf16.msrb.mxu3 %v8524_v31 }
 0x7a5   :  { %4860 = vmatpush.bf16.msrb.mxu0 %v8878_v17  ;;  %4843 = vmatpush.bf16.msrb.mxu2 %v8662_v8 }
 0x7a6   :  { %6858 = vmatmul.msk.bf16.vlgmr.msra.gmra.mxu2 %vm398_vm5, %v8562_v41  ;;  %v4444_v41 = vpop.f32.mrf.mxu2 }
 0x7a7   :  { %4816 = vmatpush.bf16.msrb.mxu1 %v8738_v37  ;;  %v4466_v37 = vpop.f32.mrf.mxu0 }
 0x7a8   :  { %4771 = vmatpush.bf16.msrb.mxu3 %v8543_v51 }
 0x7a9   :  { %4861 = vmatpush.bf16.msrb.mxu0 %v8906_v15  ;;  %4844 = vmatpush.bf16.msrb.mxu2 %v8675_v35 }
 0x7ab   :  { %4817 = vmatpush.bf16.msrb.mxu1 %v8749_v36  ;;  %6857 = vmatmul.msk.bf16.vlgmr.msrb.gmra.mxu3 %vm398_vm5, %v8529_v53  ;;  %v4484_v10 = vpop.f32.mrf.mxu1 }
 0x7ac   :  { %4829 = vmatpush.bf16.msra.mxu3 %v8394_v5 }
 0x7ad   :  { %4862 = vmatpush.bf16.msrb.mxu0 %v8816_v25  ;;  %4845 = vmatpush.bf16.msrb.mxu2 %v8758_v32 }
 0x7af   :  { %4818 = vmatpush.bf16.msrb.mxu1 %v8319_v40  ;;  %v4430_v40 = vpop.f32.mrf.mxu3 }
 0x7b0   :  { %4830 = vmatpush.bf16.msra.mxu3 %v8413_v7  ;;  %v4434_v53 = vadd.f32 %v8512_v9, %v4430_v40 }
 0x7b1   :  { %4863 = vmatpush.bf16.msrb.mxu0 %v8831_v13  ;;  %4846 = vmatpush.bf16.msrb.mxu2 %v8769_v60  ;;  %v4530_v58 = vpop.f32.mrf.mxu0 }
 0x7b2   :  { %v4448_v36 = vadd.f32 %v4444_v41, %v4434_v53 }
 0x7b3   :  { %4819 = vmatpush.bf16.msrb.mxu1 %v8328_v62  ;;  %v4446_v62 = vpop.f32.mrf.mxu2 }
 0x7b4   :  { %4831 = vmatpush.bf16.msra.mxu3 %v8424_v18  ;;  %v4468_v39 = vadd.f32 %v4464_v55, %v4448_v36 }
 0x7b5   :  { %4864 = vmatpush.bf16.msrb.mxu0 %v8841_v44  ;;  %4847 = vmatpush.bf16.msrb.mxu2 %v8785_v21 }
 0x7b6   :  { %6860 = vmatmul.msk.bf16.vlgmr.msrb.gmra.mxu1 %vm398_vm5, %v8772_v16 }
 0x7b7   :  { %4873 = vmatpush.bf16.msra.mxu1 %v8394_v5  ;;  %v4432_v47 = vpop.f32.mrf.mxu3 }
 0x7b8   :  { %4832 = vmatpush.bf16.msra.mxu3 %v8438_v6 }
 0x7b9   :  { %4865 = vmatpush.bf16.msrb.mxu0 %v8852_v11  ;;  %4848 = vmatpush.bf16.msrb.mxu2 %v8796_v57  ;;  %v4532_v26 = vpop.f32.mrf.mxu0 }
 0x7bb   :  { %4874 = vmatpush.bf16.msra.mxu1 %v8413_v7 }
 0x7bc   :  { %6863 = vmatmul.msk.bf16.vlgmr.msrb.gmra.mxu0 %vm398_vm5, %v8487_v4  ;;  %4833 = vmatpush.bf16.msra.mxu3 %v8449_v46  ;;  %v4486_v4 = vpop.f32.mrf.mxu1 }
 0x7bd   :  { %4927 = vmatpush.bf16.msra.mxu0 %v8394_v5  ;;  %4912 = vmatpush.bf16.msra.mxu2 %v8878_v17  ;;  %v4488_v5 = vadd.f32 %v4484_v10, %v4468_v39 }
 0x7be   :  { %6862 = vmatmul.msk.bf16.vlgmr.msrb.gmra.mxu2 %vm398_vm5, %v8396_v61 }
 0x7bf   :  { %4875 = vmatpush.bf16.msra.mxu1 %v8424_v18  ;;  %v8944_v28 = vmax.f32 %v4488_v5, 0.0  ;;  %v4499_v48 = vpop.f32.mrf.mxu3 }
 0x7c0   :  { %4834 = vmatpush.bf16.msra.mxu3 %v8468_v22  ;;  %v4503_v23 = vadd.f32 %v8512_v9, %v4499_v48 }
 0x7c1   :  { %4928 = vmatpush.bf16.msra.mxu0 %v8413_v7  ;;  %4913 = vmatpush.bf16.msra.mxu2 %v8906_v15  ;;  %v5033_v61 = vmax.f32 %v5032_v27, %v8944_v28  ;;  %v5046_v7 = vmax.f32 %v8871_v30, %v8944_v28  ;;  %v8956_v45 = vmax.f32 %v5025_v19, %v8944_v28 }
 0x7c2   :  { %v5039_v49 = vmax.f32 %v8895_v14, %v8944_v28 }
 0x7c3   :  { %4876 = vmatpush.bf16.msra.mxu1 %v8438_v6  ;;  %6861 = vmatmul.msk.bf16.vlgmr.msra.gmra.mxu3 %vm398_vm5, %v8355_v59  ;;  %v4513_v59 = vpop.f32.mrf.mxu2 }
 0x7c4   :  { %4887 = vmatpush.bf16.msrb.mxu3 %v8662_v8  ;;  %v4517_v63 = vadd.f32 %v4513_v59, %v4503_v23  ;;  %v4547_v42 = vpop.f32.mrf.mxu1 }
 0x7c5   :  { %4929 = vmatpush.bf16.msra.mxu0 %v8424_v18  ;;  %4914 = vmatpush.bf16.msra.mxu2 %v8816_v25 }
 0x7c6   :  { %v4534_v20 = vadd.f32 %v4530_v58, %v4517_v63 }
 0x7c7   :  { %4877 = vmatpush.bf16.msra.mxu1 %v8449_v46  ;;  %v4501_v56 = vpop.f32.mrf.mxu3 }
 0x7c8   :  { %4888 = vmatpush.bf16.msrb.mxu3 %v8675_v35  ;;  %v4551_v34 = vadd.f32 %v4547_v42, %v4534_v20 }
 0x7c9   :  { %4930 = vmatpush.bf16.msra.mxu0 %v8438_v6  ;;  %4915 = vmatpush.bf16.msra.mxu2 %v8831_v13  ;;  %v4593_v3 = vpop.f32.mrf.mxu0 }
 0x7ca   :  { %v4552_v50 = vmax.f32 %v4551_v34, 0.0 }
 0x7cb   :  { %4878 = vmatpush.bf16.msra.mxu1 %v8468_v22  ;;  %v4515_v54 = vpop.f32.mrf.mxu2 }
 0x7cc   :  { %4889 = vmatpush.bf16.msrb.mxu3 %v8758_v32  ;;  %v8996_v30 = vmax.f32 %v5033_v61, %v4552_v50  ;;  %v8998_v38 = vmax.f32 %v5046_v7, %v4552_v50  ;;  %v4549_v27 = vpop.f32.mrf.mxu1 }
 0x7cd   :  { %4931 = vmatpush.bf16.msra.mxu0 %v8449_v46  ;;  %4916 = vmatpush.bf16.msra.mxu2 %v8841_v44 }
 0x7cf   :  { %4879 = vmatpush.bf16.msra.mxu1 %v8524_v31 }
 0x7d0   :  { %4890 = vmatpush.bf16.msrb.mxu3 %v8769_v60 }
 0x7d1   :  { %4932 = vmatpush.bf16.msra.mxu0 %v8468_v22  ;;  %4917 = vmatpush.bf16.msra.mxu2 %v8852_v11  ;;  %v4595_v55 = vpop.f32.mrf.mxu0 }
 0x7d3   :  { %4880 = vmatpush.bf16.msra.mxu1 %v8543_v51  ;;  %v4576_v19 = vpop.f32.mrf.mxu2 }
 0x7d4   :  { %4891 = vmatpush.bf16.msrb.mxu3 %v8785_v21 }
 0x7d5   :  { %4933 = vmatpush.bf16.msra.mxu0 %v8524_v31  ;;  %4918 = vmatpush.bf16.msra.mxu2 %v8980_v12 }
 0x7d6   :  { %4881 = vmatmul.bf16.vlgmr.msra.gmra.mxu1 %v8730_v0  ;;  %v4907_v0 = vpop.permute.xlu2 %4906 }
 0x7d7   :  { %4941 = vmatpush.bf16.msrb.mxu1 %v8662_v8  ;;  %v8993_v8 = vld [vmem:[%s9191_s8 + $0x80] sm:$0xff] }
 0x7d8   :  { %4892 = vmatpush.bf16.msrb.mxu3 %v8796_v57 }
 0x7d9   :  { %4934 = vmatpush.bf16.msra.mxu0 %v8543_v51  ;;  %4919 = vmatpush.bf16.msra.mxu2 %v8993_v8 }
 0x7db   :  { %4942 = vmatpush.bf16.msrb.mxu1 %v8675_v35  ;;  %v4910_v35 = vsel %vm398_vm5, %v4907_v0, %v8985_v29 }
 0x7dc   :  { %4935 = vmatmul.bf16.vlgmr.msra.gmra.mxu0 %v8821_v43  ;;  %4893 = vmatpush.bf16.msrb.mxu3 %v8866_v33  ;;  %v4610_v43 = vpop.f32.mrf.mxu1 }
 0x7dd   :  { %4992 = vmatpush.bf16.msrb.mxu0 %v8758_v32  ;;  %4978 = vmatpush.bf16.msrb.mxu2 %v8424_v18  ;;  %v4562_v18 = vpop.f32.mrf.mxu3 }
 0x7de   :  { %4920 = vmatmul.bf16.vlgmr.msra.gmra.mxu2 %v4910_v35 }
 0x7df   :  { %4943 = vmatpush.bf16.msrb.mxu1 %v8758_v32  ;;  %v4578_v32 = vpop.f32.mrf.mxu2 }
 0x7e0   :  { %4894 = vmatpush.bf16.msrb.mxu3 %v8884_v2 }
 0x7e1   :  { %4993 = vmatpush.bf16.msrb.mxu0 %v8769_v60  ;;  %4979 = vmatpush.bf16.msrb.mxu2 %v8438_v6  ;;  %v4566_v6 = vadd.f32 %v8512_v9, %v4562_v18 }
 0x7e3   :  { %4944 = vmatpush.bf16.msrb.mxu1 %v8769_v60  ;;  %4895 = vmatmul.bf16.vlgmr.msrb.gmra.mxu3 %v8780_v24  ;;  %v4580_v60 = vadd.f32 %v4576_v19, %v4566_v6 }
 0x7e4   :  { %4961 = vmatpush.bf16.msra.mxu3 %v8878_v17 }
 0x7e5   :  { %4994 = vmatpush.bf16.msrb.mxu0 %v8785_v21  ;;  %4980 = vmatpush.bf16.msrb.mxu2 %v8449_v46  ;;  %v4597_v24 = vadd.f32 %v4593_v3, %v4580_v60 }
 0x7e7   :  { %4945 = vmatpush.bf16.msrb.mxu1 %v8785_v21  ;;  %v4614_v46 = vadd.f32 %v4610_v43, %v4597_v24  ;;  %v4564_v21 = vpop.f32.mrf.mxu3 }
 0x7e8   :  { %4962 = vmatpush.bf16.msra.mxu3 %v8906_v15  ;;  %v4612_v15 = vpop.f32.mrf.mxu1 }
 0x7e9   :  { %4995 = vmatpush.bf16.msrb.mxu0 %v8796_v57  ;;  %4981 = vmatpush.bf16.msrb.mxu2 %v8468_v22  ;;  %v4615_v17 = vmax.f32 %v4614_v46, 0.0 }
 0x7eb   :  { %4946 = vmatpush.bf16.msrb.mxu1 %v8796_v57  ;;  %v5027_v22 = vmax.f32 %v8956_v45, %v4615_v17  ;;  %v5040_v57 = vmax.f32 %v5039_v49, %v4615_v17 }
 0x7ec   :  { %4963 = vmatpush.bf16.msra.mxu3 %v8816_v25 }
 0x7ed   :  { %4996 = vmatpush.bf16.msrb.mxu0 %v8866_v33  ;;  %4982 = vmatpush.bf16.msrb.mxu2 %v8524_v31  ;;  %v4664_v31 = vpop.f32.mrf.mxu0 }
 0x7ef   :  { %4947 = vmatpush.bf16.msrb.mxu1 %v8866_v33 }
 0x7f0   :  { %4964 = vmatpush.bf16.msra.mxu3 %v8831_v13 }
 0x7f1   :  { %4997 = vmatpush.bf16.msrb.mxu0 %v8884_v2  ;;  %4983 = vmatpush.bf16.msrb.mxu2 %v8543_v51  ;;  %v4639_v51 = vpop.f32.mrf.mxu2 }
 0x7f3   :  { %4948 = vmatpush.bf16.msrb.mxu1 %v8884_v2 }
 0x7f4   :  { %6865 = vmatmul.msk.bf16.vlgmr.msrb.gmra.mxu0 %vm398_vm5, %v8772_v16  ;;  %4965 = vmatpush.bf16.msra.mxu3 %v8841_v44  ;;  %v4956_v16 = vpop.permute.xlu1 %4955 }
 0x7f5   :  { %6864 = vmatmul.msk.bf16.vlgmr.msrb.gmra.mxu2 %vm398_vm5, %v8716_v52  ;;  %v4666_v33 = vpop.f32.mrf.mxu0 }
 0x7f6   :  { %4949 = vmatmul.bf16.vlgmr.msrb.gmra.mxu1 %v8861_v1  ;;  %v4625_v1 = vpop.f32.mrf.mxu3 }
 0x7f7   :  { %5009 = vmatpush.bf16.msra.mxu1 %v8816_v25  ;;  %v4958_v25 = vpop.permute.xlu2 %4957 }
 0x7f8   :  { %4966 = vmatpush.bf16.msra.mxu3 %v8852_v11  ;;  %v4959_v52 = vsel %vm164_vm3, %v4956_v16, %v4958_v25 }
 0x7f9   :  { %v4641_v2 = vpop.f32.mrf.mxu2 }
 0x7fb   :  { %5010 = vmatpush.bf16.msra.mxu1 %v8831_v13  ;;  %v4629_v13 = vadd.f32 %v8512_v9, %v4625_v1  ;;  %v4689_v41 = vpop.f32.mrf.mxu1 }
 0x7fc   :  { %4967 = vmatpush.bf16.msra.mxu3 %v8980_v12 }
 0x7fd   :  { %v4643_v14 = vadd.f32 %v4639_v51, %v4629_v13 }
 0x7ff   :  { %5011 = vmatpush.bf16.msra.mxu1 %v8841_v44  ;;  %v4668_v44 = vadd.f32 %v4664_v31, %v4643_v14 }
 0x800   :  { %4968 = vmatpush.bf16.msra.mxu3 %v8993_v8 }
 0x801   :  { %v4693_v37 = vadd.f32 %v4689_v41, %v4668_v44 }
 0x803   :  { %5012 = vmatpush.bf16.msra.mxu1 %v8852_v11  ;;  %4969 = vmatmul.bf16.vlgmr.msra.gmra.mxu3 %v4959_v52  ;;  %v4627_v11 = vpop.f32.mrf.mxu3  ;;  %v4694_v40 = vmax.f32 %v4693_v37, 0.0  ;;  %v4691_v36 = vpop.f32.mrf.mxu1  ;;  %v7501_v52 = vld [vmem:[%s9192_s9] ss:$0 sm:$0xff] }
 0x804   :  { %v5094_v36 = vld [vmem:[%s9193_s10 + $0xf0] sm:$0xff] }
 0x805   :  { %v5028_v53 = vmax.f32 %v5027_v22, %v4694_v40  ;;  %v5041_v62 = vmax.f32 %v5040_v57, %v4694_v40  ;;  %v5035_v10 = vmax.f32 %v8996_v30, %v4694_v40  ;;  %v5048_v39 = vmax.f32 %v8998_v38, %v4694_v40  ;;  %v5079_v40 = vld [vmem:[%s9193_s10 + $0x78] sm:$0xff] }
 0x806   :  { %5100 = vmatpush.msra.mxu2 %v5079_v40 }
 0x807   :  { %5013 = vmatpush.bf16.msra.mxu1 %v8980_v12 }
 0x809   :  { %v4738_v5 = vpop.f32.mrf.mxu0 }
 0x80b   :  { %5014 = vmatpush.bf16.msra.mxu1 %v8993_v8 }
 0x80e   :  { %6866 = vmatmul.msk.bf16.vlgmr.msra.gmra.mxu1 %vm398_vm5, %v8985_v29 }
 0x811   :  { %v4718_v58 = vpop.f32.mrf.mxu2  ;;  %v4740_v47 = vpop.f32.mrf.mxu0 }
 0x812   :  { %v5092_v47 = vld [vmem:[%s9193_s10 + $0xe0] sm:$0xff] }
 0x816   :  { %v4704_v28 = vpop.f32.mrf.mxu3 }
 0x817   :  { %v4708_v4 = vadd.f32 %v8512_v9, %v4704_v28  ;;  %v5075_v28 = vld [vmem:[%s9193_s10 + $0x58] sm:$0xff] }
 0x819   :  { %v4720_v61 = vpop.f32.mrf.mxu2  ;;  %v4722_v7 = vadd.f32 %v4718_v58, %v4708_v4  ;;  %v5076_v58 = vld [vmem:[%s9193_s10 + $0x60] sm:$0xff]  ;;  %v5091_v4 = vld [vmem:[%s9193_s10 + $0xd8] sm:$0xff] }
 0x81b   :  { %v4758_v45 = vpop.f32.mrf.mxu1  ;;  %v4742_v49 = vadd.f32 %v4738_v5, %v4722_v7  ;;  %v5093_v5 = vld [vmem:[%s9193_s10 + $0xe8] sm:$0xff] }
 0x81d   :  { %v4762_v59 = vadd.f32 %v4758_v45, %v4742_v49  ;;  %v5074_v45 = vld [vmem:[%s9193_s10 + $0x50] sm:$0xff] }
 0x81e   :  { %v4706_v48 = vpop.f32.mrf.mxu3  ;;  %v5090_v49 = vld [vmem:[%s9193_s10 + $0xd0] sm:$0xff] }
 0x81f   :  { %v4763_v23 = vmax.f32 %v4762_v59, 0.0  ;;  %v5089_v48 = vld [vmem:[%s9193_s10 + $0xc8] sm:$0xff] }
 0x821   :  { %v4804_v26 = vpop.f32.mrf.mxu0  ;;  %v9054_v54 = vmax.f32 %v5028_v53, %v4763_v23  ;;  %v5036_v42 = vmax.f32 %v5035_v10, %v4763_v23  ;;  %v5049_v20 = vmax.f32 %v5048_v39, %v4763_v23  ;;  %v5042_v12 = vmax.f32 %v5041_v62, %v4763_v23  ;;  %v5095_v53 = vld [vmem:[%s9193_s10 + $0xf8] sm:$0xff]  ;;  %v5078_v62 = vld [vmem:[%s9193_s10 + $0x70] sm:$0xff]  ;;  %v5077_v39 = vld [vmem:[%s9193_s10 + $0x68] sm:$0xff] }
 0x822   :  { %5120 = vmatpush.msrb.mxu3 %v5095_v53  ;;  %5101 = vmatpush.msra.mxu2 %v5078_v62  ;;  %v5072_v23 = vld [vmem:[%s9193_s10 + $0x40] sm:$0xff] }
 0x823   :  { %v4760_v63 = vpop.f32.mrf.mxu1 }
 0x824   :  { %5121 = vmatpush.msrb.mxu3 %v5094_v36  ;;  %5102 = vmatpush.msra.mxu2 %v5077_v39  ;;  %v5088_v63 = vld [vmem:[%s9193_s10 + $0xc0] sm:$0xff] }
 0x826   :  { %5122 = vmatpush.msrb.mxu3 %v5093_v5  ;;  %5103 = vmatpush.msra.mxu2 %v5076_v58 }
 0x828   :  { %5123 = vmatpush.msrb.mxu3 %v5092_v47  ;;  %5104 = vmatpush.msra.mxu2 %v5075_v28 }
 0x829   :  { %v4787_v34 = vpop.f32.mrf.mxu2  ;;  %v4806_v3 = vpop.f32.mrf.mxu0 }
 0x82a   :  { %5124 = vmatpush.msrb.mxu3 %v5091_v4  ;;  %5105 = vmatpush.msra.mxu2 %v5074_v45  ;;  %v5086_v3 = vld [vmem:[%s9193_s10 + $0xb0] sm:$0xff] }
 0x82c   :  { %5125 = vmatpush.msrb.mxu3 %v5090_v49 }
 0x82e   :  { %v4773_v56 = vpop.f32.mrf.mxu3  ;;  %5126 = vmatpush.msrb.mxu3 %v5089_v48 }
 0x82f   :  { %v4777_v29 = vadd.f32 %v8512_v9, %v4773_v56 }
 0x830   :  { %5127 = vmatpush.msrb.mxu3 %v5088_v63 }
 0x831   :  { %v4789_v50 = vpop.f32.mrf.mxu2  ;;  %v4791_v8 = vadd.f32 %v4787_v34, %v4777_v29  ;;  %v5070_v34 = vld [vmem:[%s9193_s10 + $0x30] sm:$0xff] }
 0x832   :  { %v5069_v50 = vld [vmem:[%s9193_s10 + $0x28] sm:$0xff] }
 0x833   :  { %v4821_v0 = vpop.f32.mrf.mxu1  ;;  %v4808_v30 = vadd.f32 %v4804_v26, %v4791_v8  ;;  %v5073_v26 = vld [vmem:[%s9193_s10 + $0x48] sm:$0xff] }
 0x834   :  { %5106 = vmatpush.msra.mxu2 %v5073_v26  ;;  %v5085_v8 = vld [vmem:[%s9193_s10 + $0xa8] sm:$0xff] }
 0x835   :  { %v4825_v38 = vadd.f32 %v4821_v0, %v4808_v30  ;;  %v5068_v30 = vld [vmem:[%s9193_s10 + $0x20] sm:$0xff] }
 0x836   :  { %v4775_v35 = vpop.f32.mrf.mxu3  ;;  %5107 = vmatpush.msra.mxu2 %v5072_v23 }
 0x837   :  { %v4826_v19 = vmax.f32 %v4825_v38, 0.0  ;;  %v5084_v38 = vld [vmem:[%s9193_s10 + $0xa0] sm:$0xff] }
 0x839   :  { %v4867_v27 = vpop.f32.mrf.mxu0  ;;  %v9057_v55 = vmax.f32 %v5036_v42, %v4826_v19  ;;  %v9059_v18 = vmax.f32 %v5049_v20, %v4826_v19  ;;  %v5071_v42 = vld [vmem:[%s9193_s10 + $0x38] sm:$0xff] }
 0x83a   :  { %v5087_v20 = vld [vmem:[%s9193_s10 + $0xb8] sm:$0xff]  ;;  %5108 = vmatpush.msra.mxu2 %v5071_v42 }
 0x83b   :  { %v4823_v6 = vpop.f32.mrf.mxu1  ;;  %5128 = vmatpush.msrb.mxu3 %v5087_v20 }
 0x83c   :  { %5109 = vmatpush.msra.mxu2 %v5070_v34  ;;  %v5067_v6 = vld [vmem:[%s9193_s10 + $0x18] sm:$0xff] }
 0x83d   :  { %5129 = vmatpush.msrb.mxu3 %v5086_v3 }
 0x83e   :  { %5110 = vmatpush.msra.mxu2 %v5069_v50 }
 0x83f   :  { %5130 = vmatpush.msrb.mxu3 %v5085_v8 }
 0x840   :  { %5111 = vmatpush.msra.mxu2 %v5068_v30 }
 0x841   :  { %v4850_v32 = vpop.f32.mrf.mxu2  ;;  %v4869_v60 = vpop.f32.mrf.mxu0  ;;  %5131 = vmatpush.msrb.mxu3 %v5084_v38 }
 0x842   :  { %5112 = vmatpush.msra.mxu2 %v5067_v6 }
 0x846   :  { %v4836_v43 = vpop.f32.mrf.mxu3 }
 0x847   :  { %v4840_v24 = vadd.f32 %v8512_v9, %v4836_v43 }
 0x849   :  { %v4852_v46 = vpop.f32.mrf.mxu2  ;;  %v4854_v21 = vadd.f32 %v4850_v32, %v4840_v24  ;;  %v5083_v32 = vld [vmem:[%s9193_s10 + $0x98] sm:$0xff] }
 0x84a   :  { %5132 = vmatpush.msrb.mxu3 %v5083_v32 }
 0x84b   :  { %v4871_v17 = vadd.f32 %v4867_v27, %v4854_v21  ;;  %v5066_v21 = vld [vmem:[%s9193_s10 + $0x10] sm:$0xff] }
 0x84c   :  { %5113 = vmatpush.msra.mxu2 %v5066_v21 }
 0x84d   :  { %v4872_v22 = vmax.f32 %v4871_v17, 0.0  ;;  %v5082_v17 = vld [vmem:[%s9193_s10 + $0x90] sm:$0xff] }
 0x84e   :  { %v4838_v57 = vpop.f32.mrf.mxu3  ;;  %5133 = vmatpush.msrb.mxu3 %v5082_v17 }
 0x84f   :  { %v5043_v15 = vmax.f32 %v5042_v12, %v4872_v22 }
 0x853   :  { %v4882_v31 = vpop.f32.mrf.mxu1 }
 0x854   :  { %v4886_v1 = vadd.f32 %v7501_v52, %v4882_v31 }
 0x859   :  { %v4936_v51 = vpop.f32.mrf.mxu0 }
 0x85a   :  { %v4940_v56 = vadd.f32 %v7501_v52, %v4936_v51 }
 0x85b   :  { %v4884_v16 = vpop.f32.mrf.mxu1 }
 0x861   :  { %v4921_v33 = vpop.f32.mrf.mxu2  ;;  %v4938_v25 = vpop.f32.mrf.mxu0 }
 0x862   :  { %v5081_v25 = vld [vmem:[%s9193_s10 + $0x88] sm:$0xff] }
 0x863   :  { %5134 = vmatpush.msrb.mxu3 %v5081_v25 }
 0x866   :  { %v4896_v13 = vpop.f32.mrf.mxu3 }
 0x867   :  { %v4900_v2 = vadd.f32 %v4896_v13, %v4886_v1 }
 0x869   :  { %v4923_v14 = vpop.f32.mrf.mxu2  ;;  %v9065_v9 = vadd.f32 %v4921_v33, %v4900_v2  ;;  %v5065_v33 = vld [vmem:[%s9193_s10 + $0x8] sm:$0xff] }
 0x86a   :  { %5114 = vmatpush.msra.mxu2 %v5065_v33 }
 0x86b   :  { %v4926_v41 = vmax.f32 %v9065_v9, 0.0 }
 0x86d   :  { %v9070_v44 = vmax.f32 %v5043_v15, %v4926_v41  ;;  %v5051_v24 = vmax.f32 %v9059_v18, %v4926_v41  ;;  %v7410_v41 = vld [vmem:[%s9194_s11] ss:$0 sm:$0xff] }
 0x86e   :  { %v4898_v11 = vpop.f32.mrf.mxu3 }
 0x871   :  { %v4999_v37 = vpop.f32.mrf.mxu0 }
 0x873   :  { %v4950_v10 = vpop.f32.mrf.mxu1 }
 0x874   :  { %v4954_v0 = vadd.f32 %v4950_v10, %v4940_v56 }
 0x878   :  { %v4985_v7 = vpop.f32.mrf.mxu2 }
 0x879   :  { %v5001_v61 = vpop.f32.mrf.mxu0  ;;  %v4989_v29 = vadd.f32 %v7501_v52, %v4985_v7  ;;  %v5064_v52 = vld [vmem:[%s9193_s10] sm:$0xff] }
 0x87a   :  { %5115 = vmatpush.msra.mxu2 %v5064_v52 }
 0x87b   :  { %v4952_v59 = vpop.f32.mrf.mxu1  ;;  %v5003_v19 = vadd.f32 %v4999_v37, %v4989_v29 }
 0x880   :  { %v4987_v12 = vpop.f32.mrf.mxu2 }
 0x886   :  { %v4970_v27 = vpop.f32.mrf.mxu3 }
 0x887   :  { %v4974_v35 = vadd.f32 %v4970_v27, %v4954_v0 }
 0x889   :  { %v4975_v43 = vmax.f32 %v4974_v35, 0.0 }
 0x88b   :  { %v5016_v60 = vpop.f32.mrf.mxu1  ;;  %v5045_v22 = vmax.f32 %v9070_v44, %v4975_v43  ;;  %v5052_v57 = vmax.f32 %v5051_v24, %v4975_v43 }
 0x88c   :  { %v5020_v46 = vadd.f32 %v5016_v60, %v5003_v19 }
 0x88e   :  { %v5021_v15 = vmax.f32 %v5020_v46, 0.0  ;;  %v4972_v51 = vpop.f32.mrf.mxu3 }
 0x890   :  { %v5053_v31 = vmax.f32 %v5052_v57, %v5021_v15 }
 0x892   :  { %v7403_v18 = vpack.i.bf16 %v5053_v31, %v9057_v55  ;;  %v5080_v55 = vld [vmem:[%s9193_s10 + $0x80] sm:$0xff]  ;;  %s7589_s10 = smov [#allocation7]  }
 0x893   :  { %v5018_v16 = vpop.f32.mrf.mxu1  ;;  %5135 = vmatpush.msrb.mxu3 %v5080_v55  ;;  %s5166_s24 = sshll.u32 %s7589_s10, 4  ;;  %s5167_s24 = int_to_ptr.vmem [resolvable:$true] %s5166_s24 }
 0x894   :  { %7404 = vrot.lane.b32.xlu0 %v7403_v18, %s7585_s16 }
 0x906   :  { %v7405_v1 = vpop.permute.xlu0 %7404 }
 0x907   :  { %v7407_v13 = vunpack.i.h.bf16 %v7405_v1  ;;  %v7406_v2 = vunpack.i.l.bf16 %v7405_v1 }
 0x909   :  { %v5063_v14 = vsel %vm396_vm4, %v5045_v22, %v7407_v13  ;;  %v5062_v9 = vsel %vm396_vm4, %v9054_v54, %v7406_v2 }
 0x90a   :  { %5116 = vmatmul.f32.vlgmr.msra.gmra.mxu2 %v5062_v9  ;;  %5136 = vmatmul.f32.vlgmr.msrb.gmra.mxu3 %v5063_v14 }
 0x98d   :  { %v5117_v44 = vpop.f32.mrf.mxu2  ;;  %v5137_v11 = vpop.f32.mrf.mxu3 }
 0x98e   :  { %v5118_v37 = vadd.f32 %v7410_v41, %v5117_v44 }
 0x990   :  { %v5138_v40 = vadd.f32 %v5137_v11, %v5118_v37 }
 0x992   :  { %v6867_v53 = vmul.f32 -1.442695, %v5138_v40 }
 0x994   :  { %7475 = vpow2.f32 %v6867_v53 }
 0x99a   :  { %v7476_v62 = vpop.eup %7475 }
 0x99b   :  { %v5143_v36 = vadd.f32 1.0, %v7476_v62 }
 0x99d   :  { %7477 = vrcp.f32 %v5143_v36  ;;  %v5155_v58 = vand.u32 2147483648, %v5143_v36  ;;  %v5153_v47 = vand.u32 2147483647, %v5143_v36  ;;  %vm5149_vm7 = vweird.f32 %v5143_v36 }
 0x99f   :  { %v5156_v4 = vor.u32 1.1754944e-38, %v5155_v58  ;;  %vm5154_vm10 = vcmp.eq.f32.partialorder %v5153_v47, 8.507059e+37 }
 0x9a3   :  { %v7478_v10 = vpop.eup %7477 }
 0x9a4   :  { %v5145_v39 = vmul.f32 %v7478_v10, %v5143_v36  ;;  %vm5150_vm3 = vweird.f32 %v7478_v10 }
 0x9a5   :  { %vm5151_vm8 = vmor %vm5149_vm7, %vm5150_vm3 }
 0x9a6   :  { %v5146_v5 = vsub.f32 1.0, %v5145_v39 }
 0x9a8   :  { %v5147_v54 = vmul.f32 %v7478_v10, %v5146_v5 }
 0x9aa   :  { %v5148_v28 = vadd.f32 %v7478_v10, %v5147_v54 }
 0x9ac   :  { %v5152_v61 = vsel %vm5151_vm8, %v7478_v10, %v5148_v28 }
 0x9ad   :  { %v5157_v7 = vsel %vm5154_vm10, %v5156_v4, %v5152_v61 }
 0x9ae   :  { %5160 = vst.msk [vmem:[#allocation7] sm:$0x3] %vm5159_vm9, %v5157_v7 }
 0x9af   :  { %5171 = dma.vmem_to_hbm [thread:$0]  %s5167_s24, 32, %s5169_s25, [#allocation4]  }
 0x9b0   :  { %7578 = dma.done.wait [#allocation4], 32  }
 0x9b1   :  { %7579 = vsyncadd [#allocation4], 4294967264 }
 0x9b2   :  { %5176 = vsyncpa [#allocation3], 1 }
 0x9b3   :  { %5177 = vsyncpa [#allocation6], 1 }
 0x9b4   :  { %5178 = vsyncpa [#allocation4], 1 }

</bundles_post_ra>
